<compile_context>
chip_gen: v7x
topology: tpu7x:2x2x1
jax: 0.10.0
libtpu: 0.0.40
codegen_flags: <defaults>
</compile_context>

<pallas_src>
import math

import jax
import jax.numpy as jnp
from jax.experimental import pallas as pl
from jax.experimental.pallas import tpu as pltpu

# ---------------- model hyper-params (small, deterministic) ----------------
BATCH = 2
SEQ = 8
INPUT_SIZE = 4
HIDDEN = 32
NUM_LAYERS = 2
OUTPUT_SIZE1 = 8      # unused by the module's forward (kept for fidelity)
OUTPUT_SIZE2 = 16

GRID_SIZE = 5         # efficient-KAN defaults
SPLINE_ORDER = 3
GRID_RANGE = (-1.0, 1.0)
N_COEFF = GRID_SIZE + SPLINE_ORDER              # 8
N_GRID_PTS = GRID_SIZE + 2 * SPLINE_ORDER + 1   # 12


# --------------------------- fused forward kernel ---------------------------
def _lstm_kan_fused_kernel(x_ref, wih1_ref, whh1_ref, b1_ref,
                           wih2_ref, whh2_ref, b2_ref, kanw_ref, out_ref):
    """x_ref: (S, B, F) time-major. Whole model in one kernel, state in values."""
    f32 = jnp.float32
    B = x_ref.shape[1]
    H = HIDDEN

    # Weights are tiny (~100 KB total); load once.
    wih1 = wih1_ref[...]   # (F, 4H)
    whh1 = whh1_ref[...]   # (H, 4H)
    b1 = b1_ref[...]       # (1, 4H)
    wih2 = wih2_ref[...]   # (H, 4H)
    whh2 = whh2_ref[...]   # (H, 4H)
    b2 = b2_ref[...]       # (1, 4H)

    h1 = jnp.zeros((B, H), f32)
    c1 = jnp.zeros((B, H), f32)
    h2 = jnp.zeros((B, H), f32)
    c2 = jnp.zeros((B, H), f32)

    def cell(gates, c_prev):
        # PyTorch gate order: i, f, g, o (lane slices of the 4H=128 gate row).
        i_g = jax.nn.sigmoid(gates[:, 0 * H:1 * H])
        f_g = jax.nn.sigmoid(gates[:, 1 * H:2 * H])
        g_g = jnp.tanh(gates[:, 2 * H:3 * H])
        o_g = jax.nn.sigmoid(gates[:, 3 * H:4 * H])
        c_new = f_g * c_prev + i_g * g_g
        h_new = o_g * jnp.tanh(c_new)
        return h_new, c_new

    # Fully unrolled time recurrence (SEQ is a static compile-time constant).
    for t in range(SEQ):
        x_t = x_ref[t]                                           # (B, F)
        g1 = (jnp.dot(x_t, wih1, preferred_element_type=f32)
              + jnp.dot(h1, whh1, preferred_element_type=f32) + b1)
        h1, c1 = cell(g1, c1)
        # TODO(synk): inter-layer dropout of nn.LSTM is training-only (identity here).
        g2 = (jnp.dot(h1, wih2, preferred_element_type=f32)
              + jnp.dot(h2, whh2, preferred_element_type=f32) + b2)
        h2, c2 = cell(g2, c2)

    # ------------------- KAN head on the last top-layer hidden ----------------
    xk = h2                                                       # (B, H)

    # Uniform extended knot vector: identical for every channel, so keep the 12
    # knots as compile-time scalars and do Cox-de Boor elementwise on (B, H).
    step = (GRID_RANGE[1] - GRID_RANGE[0]) / GRID_SIZE
    knots = [GRID_RANGE[0] + (j - SPLINE_ORDER) * step for j in range(N_GRID_PTS)]

    # order-0 bases: list of (B, H) arrays
    bases = [((xk >= knots[j]) & (xk < knots[j + 1])).astype(f32)
             for j in range(N_GRID_PTS - 1)]
    # Cox-de Boor recursion up to SPLINE_ORDER (denominators are nonzero
    # compile-time constants because the grid is uniform).
    for k in range(1, SPLINE_ORDER + 1):
        nxt = []
        for j in range(len(bases) - 1):
            left = (xk - knots[j]) * (1.0 / (knots[j + k] - knots[j]))
            right = (knots[j + k + 1] - xk) * (1.0 / (knots[j + k + 1] - knots[j + 1]))
            nxt.append(left * bases[j] + right * bases[j + 1])
        bases = nxt
    # bases: N_COEFF arrays, each (B, H) -- no lane gathers needed downstream.

    # kanw_ref: (1 + N_COEFF, H, O); slot 0 = SiLU/base branch, slots 1.. = spline.
    acc = jnp.dot(jax.nn.silu(xk), kanw_ref[0], preferred_element_type=f32)
    for c in range(N_COEFF):
        acc = acc + jnp.dot(bases[c], kanw_ref[c + 1], preferred_element_type=f32)
    out_ref[...] = acc


def lstm_kan_pallas_call(x_tm, p):
    """x_tm: (S, B, F) time-major. Returns (B, OUTPUT_SIZE2)."""
    S, B, F = x_tm.shape
    O = p["kan_w"].shape[2]

    def full(shape):
        return pl.BlockSpec(shape, lambda i, _r=len(shape): (0,) * _r)

    return pl.pallas_call(
        _lstm_kan_fused_kernel,
        out_shape=jax.ShapeDtypeStruct((B, O), jnp.float32),
        grid_spec=pltpu.PrefetchScalarGridSpec(
            num_scalar_prefetch=0,
            grid=(1,),                      # whole model in one kernel invocation
            in_specs=[
                full((S, B, F)),
                full(p["wih1"].shape), full(p["whh1"].shape), full(p["b1"].shape),
                full(p["wih2"].shape), full(p["whh2"].shape), full(p["b2"].shape),
                full(p["kan_w"].shape),
            ],
            out_specs=full((B, O)),
        ),
        compiler_params=pltpu.CompilerParams(
            dimension_semantics=("arbitrary",)),   # serial recurrence; no core split
    )(x_tm, p["wih1"], p["whh1"], p["b1"],
      p["wih2"], p["whh2"], p["b2"], p["kan_w"])


# ------------------------------ parameter init ------------------------------
def init_params(key):
    bound = 1.0 / math.sqrt(HIDDEN)
    feat = INPUT_SIZE
    layer_w = []
    for _ in range(NUM_LAYERS):
        key, k1, k2, k3, k4 = jax.random.split(key, 5)
        w_ih = jax.random.uniform(k1, (4 * HIDDEN, feat), jnp.float32, -bound, bound)
        w_hh = jax.random.uniform(k2, (4 * HIDDEN, HIDDEN), jnp.float32, -bound, bound)
        b_ih = jax.random.uniform(k3, (4 * HIDDEN,), jnp.float32, -bound, bound)
        b_hh = jax.random.uniform(k4, (4 * HIDDEN,), jnp.float32, -bound, bound)
        layer_w.append((w_ih.T, w_hh.T, (b_ih + b_hh).reshape(1, 4 * HIDDEN)))
        feat = HIDDEN

    # KANLinear(HIDDEN -> OUTPUT_SIZE2)
    key, k1, k2, k3 = jax.random.split(key, 4)
    base_w = jax.random.uniform(k1, (OUTPUT_SIZE2, HIDDEN), jnp.float32,
                                -bound, bound)
    spline_w = 0.1 * jax.random.normal(k2, (OUTPUT_SIZE2, HIDDEN, N_COEFF),
                                       jnp.float32)
    spline_scaler = jax.random.uniform(k3, (OUTPUT_SIZE2, HIDDEN), jnp.float32,
                                       -bound, bound)
    scaled_spline_w = spline_w * spline_scaler[..., None]        # (O, H, C)

    # Pack the KAN weights host-side: slot 0 = base branch (H, O),
    # slots 1..C = spline coefficient c transposed to (H, O).
    blocks = [base_w.T] + [scaled_spline_w[:, :, c].T for c in range(N_COEFF)]
    kan_w = jnp.stack(blocks, axis=0)                            # (C+1, H, O)

    assert NUM_LAYERS == 2, "fused kernel is written for the module's 2 layers"
    (wih1, whh1, b1), (wih2, whh2, b2) = layer_w
    return {"wih1": wih1, "whh1": whh1, "b1": b1,
            "wih2": wih2, "whh2": whh2, "b2": b2,
            "kan_w": kan_w}


# --------------------------------- forward ---------------------------------
@jax.jit
def lstm_kan_forward(x, params):
    # x: (B, S, INPUT_SIZE) batch_first -> (B, OUTPUT_SIZE2)
    x_tm = jnp.transpose(x, (1, 0, 2))          # time-major (S, B, F)
    return lstm_kan_pallas_call(x_tm, params)


if __name__ == "__main__":
    key = jax.random.PRNGKey(0)
    key, pkey, xkey = jax.random.split(key, 3)
    params = init_params(pkey)
    x = jax.random.normal(xkey, (BATCH, SEQ, INPUT_SIZE), jnp.float32)

    out = lstm_kan_forward(x, params)
    out = jax.block_until_ready(out)

    assert out.shape == (BATCH, OUTPUT_SIZE2), out.shape
    assert bool(jnp.all(jnp.isfinite(out)))
    print("KERNEL_OK")
</pallas_src>

<mosaic_0001>
module attributes {stable_mosaic.version = 11 : i64} {
  func.func @_lstm_kan_fused_kernel(%arg0: i32, %arg1: memref<8x2x4xf32, #tpu.memory_space<vmem>>, %arg2: memref<4x128xf32, #tpu.memory_space<vmem>>, %arg3: memref<32x128xf32, #tpu.memory_space<vmem>>, %arg4: memref<1x128xf32, #tpu.memory_space<vmem>>, %arg5: memref<32x128xf32, #tpu.memory_space<vmem>>, %arg6: memref<32x128xf32, #tpu.memory_space<vmem>>, %arg7: memref<1x128xf32, #tpu.memory_space<vmem>>, %arg8: memref<9x32x16xf32, #tpu.memory_space<vmem>>, %arg9: memref<2x16xf32, #tpu.memory_space<vmem>>) attributes {dimension_semantics = [#tpu.dimension_semantics<arbitrary>], iteration_bounds = array<i64: 1>, scalar_prefetch = 0 : i64, scratch_operands = 0 : i64, tpu.core_type = #tpu.core_type<tc>, window_params = [{pipeline_mode = #tpu.pipeline_mode<synchronous>, transform_indices = @transform_0, window_bounds = array<i64: 8, 2, 4>}, {pipeline_mode = #tpu.pipeline_mode<synchronous>, transform_indices = @transform_1, window_bounds = array<i64: 4, 128>}, {pipeline_mode = #tpu.pipeline_mode<synchronous>, transform_indices = @transform_2, window_bounds = array<i64: 32, 128>}, {pipeline_mode = #tpu.pipeline_mode<synchronous>, transform_indices = @transform_3, window_bounds = array<i64: 1, 128>}, {pipeline_mode = #tpu.pipeline_mode<synchronous>, transform_indices = @transform_4, window_bounds = array<i64: 32, 128>}, {pipeline_mode = #tpu.pipeline_mode<synchronous>, transform_indices = @transform_5, window_bounds = array<i64: 32, 128>}, {pipeline_mode = #tpu.pipeline_mode<synchronous>, transform_indices = @transform_6, window_bounds = array<i64: 1, 128>}, {pipeline_mode = #tpu.pipeline_mode<synchronous>, transform_indices = @transform_7, window_bounds = array<i64: 9, 32, 16>}, {pipeline_mode = #tpu.pipeline_mode<synchronous>, transform_indices = @transform_8, window_bounds = array<i64: 2, 16>}]} {
    %c0 = arith.constant 0 : index
    %c0_0 = arith.constant 0 : index
    %0 = vector.load %arg2[%c0, %c0_0] : memref<4x128xf32, #tpu.memory_space<vmem>>, vector<4x128xf32>
    %c0_1 = arith.constant 0 : index
    %c0_2 = arith.constant 0 : index
    %1 = vector.load %arg3[%c0_1, %c0_2] : memref<32x128xf32, #tpu.memory_space<vmem>>, vector<32x128xf32>
    %c0_3 = arith.constant 0 : index
    %c0_4 = arith.constant 0 : index
    %2 = vector.load %arg4[%c0_3, %c0_4] : memref<1x128xf32, #tpu.memory_space<vmem>>, vector<1x128xf32>
    %c0_5 = arith.constant 0 : index
    %c0_6 = arith.constant 0 : index
    %3 = vector.load %arg5[%c0_5, %c0_6] : memref<32x128xf32, #tpu.memory_space<vmem>>, vector<32x128xf32>
    %c0_7 = arith.constant 0 : index
    %c0_8 = arith.constant 0 : index
    %4 = vector.load %arg6[%c0_7, %c0_8] : memref<32x128xf32, #tpu.memory_space<vmem>>, vector<32x128xf32>
    %c0_9 = arith.constant 0 : index
    %c0_10 = arith.constant 0 : index
    %5 = vector.load %arg7[%c0_9, %c0_10] : memref<1x128xf32, #tpu.memory_space<vmem>>, vector<1x128xf32>
    %cst = arith.constant 0.000000e+00 : f32
    %6 = vector.broadcast %cst : f32 to vector<2x32xf32>
    %cst_11 = arith.constant 0.000000e+00 : f32
    %7 = vector.broadcast %cst_11 : f32 to vector<2x32xf32>
    %cst_12 = arith.constant 0.000000e+00 : f32
    %8 = vector.broadcast %cst_12 : f32 to vector<2x32xf32>
    %cst_13 = arith.constant 0.000000e+00 : f32
    %9 = vector.broadcast %cst_13 : f32 to vector<2x32xf32>
    %c0_14 = arith.constant 0 : index
    %c0_15 = arith.constant 0 : index
    %c0_16 = arith.constant 0 : index
    %10 = vector.load %arg1[%c0_14, %c0_15, %c0_16] : memref<8x2x4xf32, #tpu.memory_space<vmem>>, vector<1x2x4xf32>
    %11 = vector.shape_cast %10 : vector<1x2x4xf32> to vector<2x4xf32>
    %cst_17 = arith.constant dense<0.000000e+00> : vector<2x128xf32>
    %12 = tpu.matmul %11, %0, %cst_17 {dimension_numbers = #tpu.dot_dimension_numbers<[1], [0], [0], [1], [0, 0, 1, 1], [], []>} : vector<2x4xf32>, vector<4x128xf32>, vector<2x128xf32> -> vector<2x128xf32>
    %cst_18 = arith.constant dense<0.000000e+00> : vector<2x128xf32>
    %13 = tpu.matmul %6, %1, %cst_18 {dimension_numbers = #tpu.dot_dimension_numbers<[1], [0], [0], [1], [0, 0, 1, 1], [], []>} : vector<2x32xf32>, vector<32x128xf32>, vector<2x128xf32> -> vector<2x128xf32>
    %14 = arith.addf %12, %13 : vector<2x128xf32>
    %15 = vector.broadcast %2 : vector<1x128xf32> to vector<2x128xf32>
    %16 = arith.addf %14, %15 : vector<2x128xf32>
    %17 = vector.extract_strided_slice %16 {offsets = [0, 0], sizes = [2, 32], strides = [1, 1]} : vector<2x128xf32> to vector<2x32xf32>
    %18 = arith.negf %17 : vector<2x32xf32>
    %19 = math.exp %18 : vector<2x32xf32>
    %cst_19 = arith.constant 1.000000e+00 : f32
    %20 = vector.broadcast %cst_19 : f32 to vector<2x32xf32>
    %21 = arith.addf %20, %19 : vector<2x32xf32>
    %22 = arith.divf %20, %21 : vector<2x32xf32>
    %23 = vector.extract_strided_slice %16 {offsets = [0, 32], sizes = [2, 32], strides = [1, 1]} : vector<2x128xf32> to vector<2x32xf32>
    %24 = arith.negf %23 : vector<2x32xf32>
    %25 = math.exp %24 : vector<2x32xf32>
    %cst_20 = arith.constant 1.000000e+00 : f32
    %26 = vector.broadcast %cst_20 : f32 to vector<2x32xf32>
    %27 = arith.addf %26, %25 : vector<2x32xf32>
    %28 = arith.divf %26, %27 : vector<2x32xf32>
    %29 = vector.extract_strided_slice %16 {offsets = [0, 64], sizes = [2, 32], strides = [1, 1]} : vector<2x128xf32> to vector<2x32xf32>
    %30 = math.tanh %29 : vector<2x32xf32>
    %31 = vector.extract_strided_slice %16 {offsets = [0, 96], sizes = [2, 32], strides = [1, 1]} : vector<2x128xf32> to vector<2x32xf32>
    %32 = arith.negf %31 : vector<2x32xf32>
    %33 = math.exp %32 : vector<2x32xf32>
    %cst_21 = arith.constant 1.000000e+00 : f32
    %34 = vector.broadcast %cst_21 : f32 to vector<2x32xf32>
    %35 = arith.addf %34, %33 : vector<2x32xf32>
    %36 = arith.divf %34, %35 : vector<2x32xf32>
    %37 = arith.mulf %28, %7 : vector<2x32xf32>
    %38 = arith.mulf %22, %30 : vector<2x32xf32>
    %39 = arith.addf %37, %38 : vector<2x32xf32>
    %40 = math.tanh %39 : vector<2x32xf32>
    %41 = arith.mulf %36, %40 : vector<2x32xf32>
    %cst_22 = arith.constant dense<0.000000e+00> : vector<2x128xf32>
    %42 = tpu.matmul %41, %3, %cst_22 {dimension_numbers = #tpu.dot_dimension_numbers<[1], [0], [0], [1], [0, 0, 1, 1], [], []>} : vector<2x32xf32>, vector<32x128xf32>, vector<2x128xf32> -> vector<2x128xf32>
    %cst_23 = arith.constant dense<0.000000e+00> : vector<2x128xf32>
    %43 = tpu.matmul %8, %4, %cst_23 {dimension_numbers = #tpu.dot_dimension_numbers<[1], [0], [0], [1], [0, 0, 1, 1], [], []>} : vector<2x32xf32>, vector<32x128xf32>, vector<2x128xf32> -> vector<2x128xf32>
    %44 = arith.addf %42, %43 : vector<2x128xf32>
    %45 = vector.broadcast %5 : vector<1x128xf32> to vector<2x128xf32>
    %46 = arith.addf %44, %45 : vector<2x128xf32>
    %47 = vector.extract_strided_slice %46 {offsets = [0, 0], sizes = [2, 32], strides = [1, 1]} : vector<2x128xf32> to vector<2x32xf32>
    %48 = arith.negf %47 : vector<2x32xf32>
    %49 = math.exp %48 : vector<2x32xf32>
    %cst_24 = arith.constant 1.000000e+00 : f32
    %50 = vector.broadcast %cst_24 : f32 to vector<2x32xf32>
    %51 = arith.addf %50, %49 : vector<2x32xf32>
    %52 = arith.divf %50, %51 : vector<2x32xf32>
    %53 = vector.extract_strided_slice %46 {offsets = [0, 32], sizes = [2, 32], strides = [1, 1]} : vector<2x128xf32> to vector<2x32xf32>
    %54 = arith.negf %53 : vector<2x32xf32>
    %55 = math.exp %54 : vector<2x32xf32>
    %cst_25 = arith.constant 1.000000e+00 : f32
    %56 = vector.broadcast %cst_25 : f32 to vector<2x32xf32>
    %57 = arith.addf %56, %55 : vector<2x32xf32>
    %58 = arith.divf %56, %57 : vector<2x32xf32>
    %59 = vector.extract_strided_slice %46 {offsets = [0, 64], sizes = [2, 32], strides = [1, 1]} : vector<2x128xf32> to vector<2x32xf32>
    %60 = math.tanh %59 : vector<2x32xf32>
    %61 = vector.extract_strided_slice %46 {offsets = [0, 96], sizes = [2, 32], strides = [1, 1]} : vector<2x128xf32> to vector<2x32xf32>
    %62 = arith.negf %61 : vector<2x32xf32>
    %63 = math.exp %62 : vector<2x32xf32>
    %cst_26 = arith.constant 1.000000e+00 : f32
    %64 = vector.broadcast %cst_26 : f32 to vector<2x32xf32>
    %65 = arith.addf %64, %63 : vector<2x32xf32>
    %66 = arith.divf %64, %65 : vector<2x32xf32>
    %67 = arith.mulf %58, %9 : vector<2x32xf32>
    %68 = arith.mulf %52, %60 : vector<2x32xf32>
    %69 = arith.addf %67, %68 : vector<2x32xf32>
    %70 = math.tanh %69 : vector<2x32xf32>
    %71 = arith.mulf %66, %70 : vector<2x32xf32>
    %c1 = arith.constant 1 : index
    %c0_27 = arith.constant 0 : index
    %c0_28 = arith.constant 0 : index
    %72 = vector.load %arg1[%c1, %c0_27, %c0_28] : memref<8x2x4xf32, #tpu.memory_space<vmem>>, vector<1x2x4xf32>
    %73 = vector.shape_cast %72 : vector<1x2x4xf32> to vector<2x4xf32>
    %cst_29 = arith.constant dense<0.000000e+00> : vector<2x128xf32>
    %74 = tpu.matmul %73, %0, %cst_29 {dimension_numbers = #tpu.dot_dimension_numbers<[1], [0], [0], [1], [0, 0, 1, 1], [], []>} : vector<2x4xf32>, vector<4x128xf32>, vector<2x128xf32> -> vector<2x128xf32>
    %cst_30 = arith.constant dense<0.000000e+00> : vector<2x128xf32>
    %75 = tpu.matmul %41, %1, %cst_30 {dimension_numbers = #tpu.dot_dimension_numbers<[1], [0], [0], [1], [0, 0, 1, 1], [], []>} : vector<2x32xf32>, vector<32x128xf32>, vector<2x128xf32> -> vector<2x128xf32>
    %76 = arith.addf %74, %75 : vector<2x128xf32>
    %77 = vector.broadcast %2 : vector<1x128xf32> to vector<2x128xf32>
    %78 = arith.addf %76, %77 : vector<2x128xf32>
    %79 = vector.extract_strided_slice %78 {offsets = [0, 0], sizes = [2, 32], strides = [1, 1]} : vector<2x128xf32> to vector<2x32xf32>
    %80 = arith.negf %79 : vector<2x32xf32>
    %81 = math.exp %80 : vector<2x32xf32>
    %cst_31 = arith.constant 1.000000e+00 : f32
    %82 = vector.broadcast %cst_31 : f32 to vector<2x32xf32>
    %83 = arith.addf %82, %81 : vector<2x32xf32>
    %84 = arith.divf %82, %83 : vector<2x32xf32>
    %85 = vector.extract_strided_slice %78 {offsets = [0, 32], sizes = [2, 32], strides = [1, 1]} : vector<2x128xf32> to vector<2x32xf32>
    %86 = arith.negf %85 : vector<2x32xf32>
    %87 = math.exp %86 : vector<2x32xf32>
    %cst_32 = arith.constant 1.000000e+00 : f32
    %88 = vector.broadcast %cst_32 : f32 to vector<2x32xf32>
    %89 = arith.addf %88, %87 : vector<2x32xf32>
    %90 = arith.divf %88, %89 : vector<2x32xf32>
    %91 = vector.extract_strided_slice %78 {offsets = [0, 64], sizes = [2, 32], strides = [1, 1]} : vector<2x128xf32> to vector<2x32xf32>
    %92 = math.tanh %91 : vector<2x32xf32>
    %93 = vector.extract_strided_slice %78 {offsets = [0, 96], sizes = [2, 32], strides = [1, 1]} : vector<2x128xf32> to vector<2x32xf32>
    %94 = arith.negf %93 : vector<2x32xf32>
    %95 = math.exp %94 : vector<2x32xf32>
    %cst_33 = arith.constant 1.000000e+00 : f32
    %96 = vector.broadcast %cst_33 : f32 to vector<2x32xf32>
    %97 = arith.addf %96, %95 : vector<2x32xf32>
    %98 = arith.divf %96, %97 : vector<2x32xf32>
    %99 = arith.mulf %90, %39 : vector<2x32xf32>
    %100 = arith.mulf %84, %92 : vector<2x32xf32>
    %101 = arith.addf %99, %100 : vector<2x32xf32>
    %102 = math.tanh %101 : vector<2x32xf32>
    %103 = arith.mulf %98, %102 : vector<2x32xf32>
    %cst_34 = arith.constant dense<0.000000e+00> : vector<2x128xf32>
    %104 = tpu.matmul %103, %3, %cst_34 {dimension_numbers = #tpu.dot_dimension_numbers<[1], [0], [0], [1], [0, 0, 1, 1], [], []>} : vector<2x32xf32>, vector<32x128xf32>, vector<2x128xf32> -> vector<2x128xf32>
    %cst_35 = arith.constant dense<0.000000e+00> : vector<2x128xf32>
    %105 = tpu.matmul %71, %4, %cst_35 {dimension_numbers = #tpu.dot_dimension_numbers<[1], [0], [0], [1], [0, 0, 1, 1], [], []>} : vector<2x32xf32>, vector<32x128xf32>, vector<2x128xf32> -> vector<2x128xf32>
    %106 = arith.addf %104, %105 : vector<2x128xf32>
    %107 = vector.broadcast %5 : vector<1x128xf32> to vector<2x128xf32>
    %108 = arith.addf %106, %107 : vector<2x128xf32>
    %109 = vector.extract_strided_slice %108 {offsets = [0, 0], sizes = [2, 32], strides = [1, 1]} : vector<2x128xf32> to vector<2x32xf32>
    %110 = arith.negf %109 : vector<2x32xf32>
    %111 = math.exp %110 : vector<2x32xf32>
    %cst_36 = arith.constant 1.000000e+00 : f32
    %112 = vector.broadcast %cst_36 : f32 to vector<2x32xf32>
    %113 = arith.addf %112, %111 : vector<2x32xf32>
    %114 = arith.divf %112, %113 : vector<2x32xf32>
    %115 = vector.extract_strided_slice %108 {offsets = [0, 32], sizes = [2, 32], strides = [1, 1]} : vector<2x128xf32> to vector<2x32xf32>
    %116 = arith.negf %115 : vector<2x32xf32>
    %117 = math.exp %116 : vector<2x32xf32>
    %cst_37 = arith.constant 1.000000e+00 : f32
    %118 = vector.broadcast %cst_37 : f32 to vector<2x32xf32>
    %119 = arith.addf %118, %117 : vector<2x32xf32>
    %120 = arith.divf %118, %119 : vector<2x32xf32>
    %121 = vector.extract_strided_slice %108 {offsets = [0, 64], sizes = [2, 32], strides = [1, 1]} : vector<2x128xf32> to vector<2x32xf32>
    %122 = math.tanh %121 : vector<2x32xf32>
    %123 = vector.extract_strided_slice %108 {offsets = [0, 96], sizes = [2, 32], strides = [1, 1]} : vector<2x128xf32> to vector<2x32xf32>
    %124 = arith.negf %123 : vector<2x32xf32>
    %125 = math.exp %124 : vector<2x32xf32>
    %cst_38 = arith.constant 1.000000e+00 : f32
    %126 = vector.broadcast %cst_38 : f32 to vector<2x32xf32>
    %127 = arith.addf %126, %125 : vector<2x32xf32>
    %128 = arith.divf %126, %127 : vector<2x32xf32>
    %129 = arith.mulf %120, %69 : vector<2x32xf32>
    %130 = arith.mulf %114, %122 : vector<2x32xf32>
    %131 = arith.addf %129, %130 : vector<2x32xf32>
    %132 = math.tanh %131 : vector<2x32xf32>
    %133 = arith.mulf %128, %132 : vector<2x32xf32>
    %c2 = arith.constant 2 : index
    %c0_39 = arith.constant 0 : index
    %c0_40 = arith.constant 0 : index
    %134 = vector.load %arg1[%c2, %c0_39, %c0_40] : memref<8x2x4xf32, #tpu.memory_space<vmem>>, vector<1x2x4xf32>
    %135 = vector.shape_cast %134 : vector<1x2x4xf32> to vector<2x4xf32>
    %cst_41 = arith.constant dense<0.000000e+00> : vector<2x128xf32>
    %136 = tpu.matmul %135, %0, %cst_41 {dimension_numbers = #tpu.dot_dimension_numbers<[1], [0], [0], [1], [0, 0, 1, 1], [], []>} : vector<2x4xf32>, vector<4x128xf32>, vector<2x128xf32> -> vector<2x128xf32>
    %cst_42 = arith.constant dense<0.000000e+00> : vector<2x128xf32>
    %137 = tpu.matmul %103, %1, %cst_42 {dimension_numbers = #tpu.dot_dimension_numbers<[1], [0], [0], [1], [0, 0, 1, 1], [], []>} : vector<2x32xf32>, vector<32x128xf32>, vector<2x128xf32> -> vector<2x128xf32>
    %138 = arith.addf %136, %137 : vector<2x128xf32>
    %139 = vector.broadcast %2 : vector<1x128xf32> to vector<2x128xf32>
    %140 = arith.addf %138, %139 : vector<2x128xf32>
    %141 = vector.extract_strided_slice %140 {offsets = [0, 0], sizes = [2, 32], strides = [1, 1]} : vector<2x128xf32> to vector<2x32xf32>
    %142 = arith.negf %141 : vector<2x32xf32>
    %143 = math.exp %142 : vector<2x32xf32>
    %cst_43 = arith.constant 1.000000e+00 : f32
    %144 = vector.broadcast %cst_43 : f32 to vector<2x32xf32>
    %145 = arith.addf %144, %143 : vector<2x32xf32>
    %146 = arith.divf %144, %145 : vector<2x32xf32>
    %147 = vector.extract_strided_slice %140 {offsets = [0, 32], sizes = [2, 32], strides = [1, 1]} : vector<2x128xf32> to vector<2x32xf32>
    %148 = arith.negf %147 : vector<2x32xf32>
    %149 = math.exp %148 : vector<2x32xf32>
    %cst_44 = arith.constant 1.000000e+00 : f32
    %150 = vector.broadcast %cst_44 : f32 to vector<2x32xf32>
    %151 = arith.addf %150, %149 : vector<2x32xf32>
    %152 = arith.divf %150, %151 : vector<2x32xf32>
    %153 = vector.extract_strided_slice %140 {offsets = [0, 64], sizes = [2, 32], strides = [1, 1]} : vector<2x128xf32> to vector<2x32xf32>
    %154 = math.tanh %153 : vector<2x32xf32>
    %155 = vector.extract_strided_slice %140 {offsets = [0, 96], sizes = [2, 32], strides = [1, 1]} : vector<2x128xf32> to vector<2x32xf32>
    %156 = arith.negf %155 : vector<2x32xf32>
    %157 = math.exp %156 : vector<2x32xf32>
    %cst_45 = arith.constant 1.000000e+00 : f32
    %158 = vector.broadcast %cst_45 : f32 to vector<2x32xf32>
    %159 = arith.addf %158, %157 : vector<2x32xf32>
    %160 = arith.divf %158, %159 : vector<2x32xf32>
    %161 = arith.mulf %152, %101 : vector<2x32xf32>
    %162 = arith.mulf %146, %154 : vector<2x32xf32>
    %163 = arith.addf %161, %162 : vector<2x32xf32>
    %164 = math.tanh %163 : vector<2x32xf32>
    %165 = arith.mulf %160, %164 : vector<2x32xf32>
    %cst_46 = arith.constant dense<0.000000e+00> : vector<2x128xf32>
    %166 = tpu.matmul %165, %3, %cst_46 {dimension_numbers = #tpu.dot_dimension_numbers<[1], [0], [0], [1], [0, 0, 1, 1], [], []>} : vector<2x32xf32>, vector<32x128xf32>, vector<2x128xf32> -> vector<2x128xf32>
    %cst_47 = arith.constant dense<0.000000e+00> : vector<2x128xf32>
    %167 = tpu.matmul %133, %4, %cst_47 {dimension_numbers = #tpu.dot_dimension_numbers<[1], [0], [0], [1], [0, 0, 1, 1], [], []>} : vector<2x32xf32>, vector<32x128xf32>, vector<2x128xf32> -> vector<2x128xf32>
    %168 = arith.addf %166, %167 : vector<2x128xf32>
    %169 = vector.broadcast %5 : vector<1x128xf32> to vector<2x128xf32>
    %170 = arith.addf %168, %169 : vector<2x128xf32>
    %171 = vector.extract_strided_slice %170 {offsets = [0, 0], sizes = [2, 32], strides = [1, 1]} : vector<2x128xf32> to vector<2x32xf32>
    %172 = arith.negf %171 : vector<2x32xf32>
    %173 = math.exp %172 : vector<2x32xf32>
    %cst_48 = arith.constant 1.000000e+00 : f32
    %174 = vector.broadcast %cst_48 : f32 to vector<2x32xf32>
    %175 = arith.addf %174, %173 : vector<2x32xf32>
    %176 = arith.divf %174, %175 : vector<2x32xf32>
    %177 = vector.extract_strided_slice %170 {offsets = [0, 32], sizes = [2, 32], strides = [1, 1]} : vector<2x128xf32> to vector<2x32xf32>
    %178 = arith.negf %177 : vector<2x32xf32>
    %179 = math.exp %178 : vector<2x32xf32>
    %cst_49 = arith.constant 1.000000e+00 : f32
    %180 = vector.broadcast %cst_49 : f32 to vector<2x32xf32>
    %181 = arith.addf %180, %179 : vector<2x32xf32>
    %182 = arith.divf %180, %181 : vector<2x32xf32>
    %183 = vector.extract_strided_slice %170 {offsets = [0, 64], sizes = [2, 32], strides = [1, 1]} : vector<2x128xf32> to vector<2x32xf32>
    %184 = math.tanh %183 : vector<2x32xf32>
    %185 = vector.extract_strided_slice %170 {offsets = [0, 96], sizes = [2, 32], strides = [1, 1]} : vector<2x128xf32> to vector<2x32xf32>
    %186 = arith.negf %185 : vector<2x32xf32>
    %187 = math.exp %186 : vector<2x32xf32>
    %cst_50 = arith.constant 1.000000e+00 : f32
    %188 = vector.broadcast %cst_50 : f32 to vector<2x32xf32>
    %189 = arith.addf %188, %187 : vector<2x32xf32>
    %190 = arith.divf %188, %189 : vector<2x32xf32>
    %191 = arith.mulf %182, %131 : vector<2x32xf32>
    %192 = arith.mulf %176, %184 : vector<2x32xf32>
    %193 = arith.addf %191, %192 : vector<2x32xf32>
    %194 = math.tanh %193 : vector<2x32xf32>
    %195 = arith.mulf %190, %194 : vector<2x32xf32>
    %c3 = arith.constant 3 : index
    %c0_51 = arith.constant 0 : index
    %c0_52 = arith.constant 0 : index
    %196 = vector.load %arg1[%c3, %c0_51, %c0_52] : memref<8x2x4xf32, #tpu.memory_space<vmem>>, vector<1x2x4xf32>
    %197 = vector.shape_cast %196 : vector<1x2x4xf32> to vector<2x4xf32>
    %cst_53 = arith.constant dense<0.000000e+00> : vector<2x128xf32>
    %198 = tpu.matmul %197, %0, %cst_53 {dimension_numbers = #tpu.dot_dimension_numbers<[1], [0], [0], [1], [0, 0, 1, 1], [], []>} : vector<2x4xf32>, vector<4x128xf32>, vector<2x128xf32> -> vector<2x128xf32>
    %cst_54 = arith.constant dense<0.000000e+00> : vector<2x128xf32>
    %199 = tpu.matmul %165, %1, %cst_54 {dimension_numbers = #tpu.dot_dimension_numbers<[1], [0], [0], [1], [0, 0, 1, 1], [], []>} : vector<2x32xf32>, vector<32x128xf32>, vector<2x128xf32> -> vector<2x128xf32>
    %200 = arith.addf %198, %199 : vector<2x128xf32>
    %201 = vector.broadcast %2 : vector<1x128xf32> to vector<2x128xf32>
    %202 = arith.addf %200, %201 : vector<2x128xf32>
    %203 = vector.extract_strided_slice %202 {offsets = [0, 0], sizes = [2, 32], strides = [1, 1]} : vector<2x128xf32> to vector<2x32xf32>
    %204 = arith.negf %203 : vector<2x32xf32>
    %205 = math.exp %204 : vector<2x32xf32>
    %cst_55 = arith.constant 1.000000e+00 : f32
    %206 = vector.broadcast %cst_55 : f32 to vector<2x32xf32>
    %207 = arith.addf %206, %205 : vector<2x32xf32>
    %208 = arith.divf %206, %207 : vector<2x32xf32>
    %209 = vector.extract_strided_slice %202 {offsets = [0, 32], sizes = [2, 32], strides = [1, 1]} : vector<2x128xf32> to vector<2x32xf32>
    %210 = arith.negf %209 : vector<2x32xf32>
    %211 = math.exp %210 : vector<2x32xf32>
    %cst_56 = arith.constant 1.000000e+00 : f32
    %212 = vector.broadcast %cst_56 : f32 to vector<2x32xf32>
    %213 = arith.addf %212, %211 : vector<2x32xf32>
    %214 = arith.divf %212, %213 : vector<2x32xf32>
    %215 = vector.extract_strided_slice %202 {offsets = [0, 64], sizes = [2, 32], strides = [1, 1]} : vector<2x128xf32> to vector<2x32xf32>
    %216 = math.tanh %215 : vector<2x32xf32>
    %217 = vector.extract_strided_slice %202 {offsets = [0, 96], sizes = [2, 32], strides = [1, 1]} : vector<2x128xf32> to vector<2x32xf32>
    %218 = arith.negf %217 : vector<2x32xf32>
    %219 = math.exp %218 : vector<2x32xf32>
    %cst_57 = arith.constant 1.000000e+00 : f32
    %220 = vector.broadcast %cst_57 : f32 to vector<2x32xf32>
    %221 = arith.addf %220, %219 : vector<2x32xf32>
    %222 = arith.divf %220, %221 : vector<2x32xf32>
    %223 = arith.mulf %214, %163 : vector<2x32xf32>
    %224 = arith.mulf %208, %216 : vector<2x32xf32>
    %225 = arith.addf %223, %224 : vector<2x32xf32>
    %226 = math.tanh %225 : vector<2x32xf32>
    %227 = arith.mulf %222, %226 : vector<2x32xf32>
    %cst_58 = arith.constant dense<0.000000e+00> : vector<2x128xf32>
    %228 = tpu.matmul %227, %3, %cst_58 {dimension_numbers = #tpu.dot_dimension_numbers<[1], [0], [0], [1], [0, 0, 1, 1], [], []>} : vector<2x32xf32>, vector<32x128xf32>, vector<2x128xf32> -> vector<2x128xf32>
    %cst_59 = arith.constant dense<0.000000e+00> : vector<2x128xf32>
    %229 = tpu.matmul %195, %4, %cst_59 {dimension_numbers = #tpu.dot_dimension_numbers<[1], [0], [0], [1], [0, 0, 1, 1], [], []>} : vector<2x32xf32>, vector<32x128xf32>, vector<2x128xf32> -> vector<2x128xf32>
    %230 = arith.addf %228, %229 : vector<2x128xf32>
    %231 = vector.broadcast %5 : vector<1x128xf32> to vector<2x128xf32>
    %232 = arith.addf %230, %231 : vector<2x128xf32>
    %233 = vector.extract_strided_slice %232 {offsets = [0, 0], sizes = [2, 32], strides = [1, 1]} : vector<2x128xf32> to vector<2x32xf32>
    %234 = arith.negf %233 : vector<2x32xf32>
    %235 = math.exp %234 : vector<2x32xf32>
    %cst_60 = arith.constant 1.000000e+00 : f32
    %236 = vector.broadcast %cst_60 : f32 to vector<2x32xf32>
    %237 = arith.addf %236, %235 : vector<2x32xf32>
    %238 = arith.divf %236, %237 : vector<2x32xf32>
    %239 = vector.extract_strided_slice %232 {offsets = [0, 32], sizes = [2, 32], strides = [1, 1]} : vector<2x128xf32> to vector<2x32xf32>
    %240 = arith.negf %239 : vector<2x32xf32>
    %241 = math.exp %240 : vector<2x32xf32>
    %cst_61 = arith.constant 1.000000e+00 : f32
    %242 = vector.broadcast %cst_61 : f32 to vector<2x32xf32>
    %243 = arith.addf %242, %241 : vector<2x32xf32>
    %244 = arith.divf %242, %243 : vector<2x32xf32>
    %245 = vector.extract_strided_slice %232 {offsets = [0, 64], sizes = [2, 32], strides = [1, 1]} : vector<2x128xf32> to vector<2x32xf32>
    %246 = math.tanh %245 : vector<2x32xf32>
    %247 = vector.extract_strided_slice %232 {offsets = [0, 96], sizes = [2, 32], strides = [1, 1]} : vector<2x128xf32> to vector<2x32xf32>
    %248 = arith.negf %247 : vector<2x32xf32>
    %249 = math.exp %248 : vector<2x32xf32>
    %cst_62 = arith.constant 1.000000e+00 : f32
    %250 = vector.broadcast %cst_62 : f32 to vector<2x32xf32>
    %251 = arith.addf %250, %249 : vector<2x32xf32>
    %252 = arith.divf %250, %251 : vector<2x32xf32>
    %253 = arith.mulf %244, %193 : vector<2x32xf32>
    %254 = arith.mulf %238, %246 : vector<2x32xf32>
    %255 = arith.addf %253, %254 : vector<2x32xf32>
    %256 = math.tanh %255 : vector<2x32xf32>
    %257 = arith.mulf %252, %256 : vector<2x32xf32>
    %c4 = arith.constant 4 : index
    %c0_63 = arith.constant 0 : index
    %c0_64 = arith.constant 0 : index
    %258 = vector.load %arg1[%c4, %c0_63, %c0_64] : memref<8x2x4xf32, #tpu.memory_space<vmem>>, vector<1x2x4xf32>
    %259 = vector.shape_cast %258 : vector<1x2x4xf32> to vector<2x4xf32>
    %cst_65 = arith.constant dense<0.000000e+00> : vector<2x128xf32>
    %260 = tpu.matmul %259, %0, %cst_65 {dimension_numbers = #tpu.dot_dimension_numbers<[1], [0], [0], [1], [0, 0, 1, 1], [], []>} : vector<2x4xf32>, vector<4x128xf32>, vector<2x128xf32> -> vector<2x128xf32>
    %cst_66 = arith.constant dense<0.000000e+00> : vector<2x128xf32>
    %261 = tpu.matmul %227, %1, %cst_66 {dimension_numbers = #tpu.dot_dimension_numbers<[1], [0], [0], [1], [0, 0, 1, 1], [], []>} : vector<2x32xf32>, vector<32x128xf32>, vector<2x128xf32> -> vector<2x128xf32>
    %262 = arith.addf %260, %261 : vector<2x128xf32>
    %263 = vector.broadcast %2 : vector<1x128xf32> to vector<2x128xf32>
    %264 = arith.addf %262, %263 : vector<2x128xf32>
    %265 = vector.extract_strided_slice %264 {offsets = [0, 0], sizes = [2, 32], strides = [1, 1]} : vector<2x128xf32> to vector<2x32xf32>
    %266 = arith.negf %265 : vector<2x32xf32>
    %267 = math.exp %266 : vector<2x32xf32>
    %cst_67 = arith.constant 1.000000e+00 : f32
    %268 = vector.broadcast %cst_67 : f32 to vector<2x32xf32>
    %269 = arith.addf %268, %267 : vector<2x32xf32>
    %270 = arith.divf %268, %269 : vector<2x32xf32>
    %271 = vector.extract_strided_slice %264 {offsets = [0, 32], sizes = [2, 32], strides = [1, 1]} : vector<2x128xf32> to vector<2x32xf32>
    %272 = arith.negf %271 : vector<2x32xf32>
    %273 = math.exp %272 : vector<2x32xf32>
    %cst_68 = arith.constant 1.000000e+00 : f32
    %274 = vector.broadcast %cst_68 : f32 to vector<2x32xf32>
    %275 = arith.addf %274, %273 : vector<2x32xf32>
    %276 = arith.divf %274, %275 : vector<2x32xf32>
    %277 = vector.extract_strided_slice %264 {offsets = [0, 64], sizes = [2, 32], strides = [1, 1]} : vector<2x128xf32> to vector<2x32xf32>
    %278 = math.tanh %277 : vector<2x32xf32>
    %279 = vector.extract_strided_slice %264 {offsets = [0, 96], sizes = [2, 32], strides = [1, 1]} : vector<2x128xf32> to vector<2x32xf32>
    %280 = arith.negf %279 : vector<2x32xf32>
    %281 = math.exp %280 : vector<2x32xf32>
    %cst_69 = arith.constant 1.000000e+00 : f32
    %282 = vector.broadcast %cst_69 : f32 to vector<2x32xf32>
    %283 = arith.addf %282, %281 : vector<2x32xf32>
    %284 = arith.divf %282, %283 : vector<2x32xf32>
    %285 = arith.mulf %276, %225 : vector<2x32xf32>
    %286 = arith.mulf %270, %278 : vector<2x32xf32>
    %287 = arith.addf %285, %286 : vector<2x32xf32>
    %288 = math.tanh %287 : vector<2x32xf32>
    %289 = arith.mulf %284, %288 : vector<2x32xf32>
    %cst_70 = arith.constant dense<0.000000e+00> : vector<2x128xf32>
    %290 = tpu.matmul %289, %3, %cst_70 {dimension_numbers = #tpu.dot_dimension_numbers<[1], [0], [0], [1], [0, 0, 1, 1], [], []>} : vector<2x32xf32>, vector<32x128xf32>, vector<2x128xf32> -> vector<2x128xf32>
    %cst_71 = arith.constant dense<0.000000e+00> : vector<2x128xf32>
    %291 = tpu.matmul %257, %4, %cst_71 {dimension_numbers = #tpu.dot_dimension_numbers<[1], [0], [0], [1], [0, 0, 1, 1], [], []>} : vector<2x32xf32>, vector<32x128xf32>, vector<2x128xf32> -> vector<2x128xf32>
    %292 = arith.addf %290, %291 : vector<2x128xf32>
    %293 = vector.broadcast %5 : vector<1x128xf32> to vector<2x128xf32>
    %294 = arith.addf %292, %293 : vector<2x128xf32>
    %295 = vector.extract_strided_slice %294 {offsets = [0, 0], sizes = [2, 32], strides = [1, 1]} : vector<2x128xf32> to vector<2x32xf32>
    %296 = arith.negf %295 : vector<2x32xf32>
    %297 = math.exp %296 : vector<2x32xf32>
    %cst_72 = arith.constant 1.000000e+00 : f32
    %298 = vector.broadcast %cst_72 : f32 to vector<2x32xf32>
    %299 = arith.addf %298, %297 : vector<2x32xf32>
    %300 = arith.divf %298, %299 : vector<2x32xf32>
    %301 = vector.extract_strided_slice %294 {offsets = [0, 32], sizes = [2, 32], strides = [1, 1]} : vector<2x128xf32> to vector<2x32xf32>
    %302 = arith.negf %301 : vector<2x32xf32>
    %303 = math.exp %302 : vector<2x32xf32>
    %cst_73 = arith.constant 1.000000e+00 : f32
    %304 = vector.broadcast %cst_73 : f32 to vector<2x32xf32>
    %305 = arith.addf %304, %303 : vector<2x32xf32>
    %306 = arith.divf %304, %305 : vector<2x32xf32>
    %307 = vector.extract_strided_slice %294 {offsets = [0, 64], sizes = [2, 32], strides = [1, 1]} : vector<2x128xf32> to vector<2x32xf32>
    %308 = math.tanh %307 : vector<2x32xf32>
    %309 = vector.extract_strided_slice %294 {offsets = [0, 96], sizes = [2, 32], strides = [1, 1]} : vector<2x128xf32> to vector<2x32xf32>
    %310 = arith.negf %309 : vector<2x32xf32>
    %311 = math.exp %310 : vector<2x32xf32>
    %cst_74 = arith.constant 1.000000e+00 : f32
    %312 = vector.broadcast %cst_74 : f32 to vector<2x32xf32>
    %313 = arith.addf %312, %311 : vector<2x32xf32>
    %314 = arith.divf %312, %313 : vector<2x32xf32>
    %315 = arith.mulf %306, %255 : vector<2x32xf32>
    %316 = arith.mulf %300, %308 : vector<2x32xf32>
    %317 = arith.addf %315, %316 : vector<2x32xf32>
    %318 = math.tanh %317 : vector<2x32xf32>
    %319 = arith.mulf %314, %318 : vector<2x32xf32>
    %c5 = arith.constant 5 : index
    %c0_75 = arith.constant 0 : index
    %c0_76 = arith.constant 0 : index
    %320 = vector.load %arg1[%c5, %c0_75, %c0_76] : memref<8x2x4xf32, #tpu.memory_space<vmem>>, vector<1x2x4xf32>
    %321 = vector.shape_cast %320 : vector<1x2x4xf32> to vector<2x4xf32>
    %cst_77 = arith.constant dense<0.000000e+00> : vector<2x128xf32>
    %322 = tpu.matmul %321, %0, %cst_77 {dimension_numbers = #tpu.dot_dimension_numbers<[1], [0], [0], [1], [0, 0, 1, 1], [], []>} : vector<2x4xf32>, vector<4x128xf32>, vector<2x128xf32> -> vector<2x128xf32>
    %cst_78 = arith.constant dense<0.000000e+00> : vector<2x128xf32>
    %323 = tpu.matmul %289, %1, %cst_78 {dimension_numbers = #tpu.dot_dimension_numbers<[1], [0], [0], [1], [0, 0, 1, 1], [], []>} : vector<2x32xf32>, vector<32x128xf32>, vector<2x128xf32> -> vector<2x128xf32>
    %324 = arith.addf %322, %323 : vector<2x128xf32>
    %325 = vector.broadcast %2 : vector<1x128xf32> to vector<2x128xf32>
    %326 = arith.addf %324, %325 : vector<2x128xf32>
    %327 = vector.extract_strided_slice %326 {offsets = [0, 0], sizes = [2, 32], strides = [1, 1]} : vector<2x128xf32> to vector<2x32xf32>
    %328 = arith.negf %327 : vector<2x32xf32>
    %329 = math.exp %328 : vector<2x32xf32>
    %cst_79 = arith.constant 1.000000e+00 : f32
    %330 = vector.broadcast %cst_79 : f32 to vector<2x32xf32>
    %331 = arith.addf %330, %329 : vector<2x32xf32>
    %332 = arith.divf %330, %331 : vector<2x32xf32>
    %333 = vector.extract_strided_slice %326 {offsets = [0, 32], sizes = [2, 32], strides = [1, 1]} : vector<2x128xf32> to vector<2x32xf32>
    %334 = arith.negf %333 : vector<2x32xf32>
    %335 = math.exp %334 : vector<2x32xf32>
    %cst_80 = arith.constant 1.000000e+00 : f32
    %336 = vector.broadcast %cst_80 : f32 to vector<2x32xf32>
    %337 = arith.addf %336, %335 : vector<2x32xf32>
    %338 = arith.divf %336, %337 : vector<2x32xf32>
    %339 = vector.extract_strided_slice %326 {offsets = [0, 64], sizes = [2, 32], strides = [1, 1]} : vector<2x128xf32> to vector<2x32xf32>
    %340 = math.tanh %339 : vector<2x32xf32>
    %341 = vector.extract_strided_slice %326 {offsets = [0, 96], sizes = [2, 32], strides = [1, 1]} : vector<2x128xf32> to vector<2x32xf32>
    %342 = arith.negf %341 : vector<2x32xf32>
    %343 = math.exp %342 : vector<2x32xf32>
    %cst_81 = arith.constant 1.000000e+00 : f32
    %344 = vector.broadcast %cst_81 : f32 to vector<2x32xf32>
    %345 = arith.addf %344, %343 : vector<2x32xf32>
    %346 = arith.divf %344, %345 : vector<2x32xf32>
    %347 = arith.mulf %338, %287 : vector<2x32xf32>
    %348 = arith.mulf %332, %340 : vector<2x32xf32>
    %349 = arith.addf %347, %348 : vector<2x32xf32>
    %350 = math.tanh %349 : vector<2x32xf32>
    %351 = arith.mulf %346, %350 : vector<2x32xf32>
    %cst_82 = arith.constant dense<0.000000e+00> : vector<2x128xf32>
    %352 = tpu.matmul %351, %3, %cst_82 {dimension_numbers = #tpu.dot_dimension_numbers<[1], [0], [0], [1], [0, 0, 1, 1], [], []>} : vector<2x32xf32>, vector<32x128xf32>, vector<2x128xf32> -> vector<2x128xf32>
    %cst_83 = arith.constant dense<0.000000e+00> : vector<2x128xf32>
    %353 = tpu.matmul %319, %4, %cst_83 {dimension_numbers = #tpu.dot_dimension_numbers<[1], [0], [0], [1], [0, 0, 1, 1], [], []>} : vector<2x32xf32>, vector<32x128xf32>, vector<2x128xf32> -> vector<2x128xf32>
    %354 = arith.addf %352, %353 : vector<2x128xf32>
    %355 = vector.broadcast %5 : vector<1x128xf32> to vector<2x128xf32>
    %356 = arith.addf %354, %355 : vector<2x128xf32>
    %357 = vector.extract_strided_slice %356 {offsets = [0, 0], sizes = [2, 32], strides = [1, 1]} : vector<2x128xf32> to vector<2x32xf32>
    %358 = arith.negf %357 : vector<2x32xf32>
    %359 = math.exp %358 : vector<2x32xf32>
    %cst_84 = arith.constant 1.000000e+00 : f32
    %360 = vector.broadcast %cst_84 : f32 to vector<2x32xf32>
    %361 = arith.addf %360, %359 : vector<2x32xf32>
    %362 = arith.divf %360, %361 : vector<2x32xf32>
    %363 = vector.extract_strided_slice %356 {offsets = [0, 32], sizes = [2, 32], strides = [1, 1]} : vector<2x128xf32> to vector<2x32xf32>
    %364 = arith.negf %363 : vector<2x32xf32>
    %365 = math.exp %364 : vector<2x32xf32>
    %cst_85 = arith.constant 1.000000e+00 : f32
    %366 = vector.broadcast %cst_85 : f32 to vector<2x32xf32>
    %367 = arith.addf %366, %365 : vector<2x32xf32>
    %368 = arith.divf %366, %367 : vector<2x32xf32>
    %369 = vector.extract_strided_slice %356 {offsets = [0, 64], sizes = [2, 32], strides = [1, 1]} : vector<2x128xf32> to vector<2x32xf32>
    %370 = math.tanh %369 : vector<2x32xf32>
    %371 = vector.extract_strided_slice %356 {offsets = [0, 96], sizes = [2, 32], strides = [1, 1]} : vector<2x128xf32> to vector<2x32xf32>
    %372 = arith.negf %371 : vector<2x32xf32>
    %373 = math.exp %372 : vector<2x32xf32>
    %cst_86 = arith.constant 1.000000e+00 : f32
    %374 = vector.broadcast %cst_86 : f32 to vector<2x32xf32>
    %375 = arith.addf %374, %373 : vector<2x32xf32>
    %376 = arith.divf %374, %375 : vector<2x32xf32>
    %377 = arith.mulf %368, %317 : vector<2x32xf32>
    %378 = arith.mulf %362, %370 : vector<2x32xf32>
    %379 = arith.addf %377, %378 : vector<2x32xf32>
    %380 = math.tanh %379 : vector<2x32xf32>
    %381 = arith.mulf %376, %380 : vector<2x32xf32>
    %c6 = arith.constant 6 : index
    %c0_87 = arith.constant 0 : index
    %c0_88 = arith.constant 0 : index
    %382 = vector.load %arg1[%c6, %c0_87, %c0_88] : memref<8x2x4xf32, #tpu.memory_space<vmem>>, vector<1x2x4xf32>
    %383 = vector.shape_cast %382 : vector<1x2x4xf32> to vector<2x4xf32>
    %cst_89 = arith.constant dense<0.000000e+00> : vector<2x128xf32>
    %384 = tpu.matmul %383, %0, %cst_89 {dimension_numbers = #tpu.dot_dimension_numbers<[1], [0], [0], [1], [0, 0, 1, 1], [], []>} : vector<2x4xf32>, vector<4x128xf32>, vector<2x128xf32> -> vector<2x128xf32>
    %cst_90 = arith.constant dense<0.000000e+00> : vector<2x128xf32>
    %385 = tpu.matmul %351, %1, %cst_90 {dimension_numbers = #tpu.dot_dimension_numbers<[1], [0], [0], [1], [0, 0, 1, 1], [], []>} : vector<2x32xf32>, vector<32x128xf32>, vector<2x128xf32> -> vector<2x128xf32>
    %386 = arith.addf %384, %385 : vector<2x128xf32>
    %387 = vector.broadcast %2 : vector<1x128xf32> to vector<2x128xf32>
    %388 = arith.addf %386, %387 : vector<2x128xf32>
    %389 = vector.extract_strided_slice %388 {offsets = [0, 0], sizes = [2, 32], strides = [1, 1]} : vector<2x128xf32> to vector<2x32xf32>
    %390 = arith.negf %389 : vector<2x32xf32>
    %391 = math.exp %390 : vector<2x32xf32>
    %cst_91 = arith.constant 1.000000e+00 : f32
    %392 = vector.broadcast %cst_91 : f32 to vector<2x32xf32>
    %393 = arith.addf %392, %391 : vector<2x32xf32>
    %394 = arith.divf %392, %393 : vector<2x32xf32>
    %395 = vector.extract_strided_slice %388 {offsets = [0, 32], sizes = [2, 32], strides = [1, 1]} : vector<2x128xf32> to vector<2x32xf32>
    %396 = arith.negf %395 : vector<2x32xf32>
    %397 = math.exp %396 : vector<2x32xf32>
    %cst_92 = arith.constant 1.000000e+00 : f32
    %398 = vector.broadcast %cst_92 : f32 to vector<2x32xf32>
    %399 = arith.addf %398, %397 : vector<2x32xf32>
    %400 = arith.divf %398, %399 : vector<2x32xf32>
    %401 = vector.extract_strided_slice %388 {offsets = [0, 64], sizes = [2, 32], strides = [1, 1]} : vector<2x128xf32> to vector<2x32xf32>
    %402 = math.tanh %401 : vector<2x32xf32>
    %403 = vector.extract_strided_slice %388 {offsets = [0, 96], sizes = [2, 32], strides = [1, 1]} : vector<2x128xf32> to vector<2x32xf32>
    %404 = arith.negf %403 : vector<2x32xf32>
    %405 = math.exp %404 : vector<2x32xf32>
    %cst_93 = arith.constant 1.000000e+00 : f32
    %406 = vector.broadcast %cst_93 : f32 to vector<2x32xf32>
    %407 = arith.addf %406, %405 : vector<2x32xf32>
    %408 = arith.divf %406, %407 : vector<2x32xf32>
    %409 = arith.mulf %400, %349 : vector<2x32xf32>
    %410 = arith.mulf %394, %402 : vector<2x32xf32>
    %411 = arith.addf %409, %410 : vector<2x32xf32>
    %412 = math.tanh %411 : vector<2x32xf32>
    %413 = arith.mulf %408, %412 : vector<2x32xf32>
    %cst_94 = arith.constant dense<0.000000e+00> : vector<2x128xf32>
    %414 = tpu.matmul %413, %3, %cst_94 {dimension_numbers = #tpu.dot_dimension_numbers<[1], [0], [0], [1], [0, 0, 1, 1], [], []>} : vector<2x32xf32>, vector<32x128xf32>, vector<2x128xf32> -> vector<2x128xf32>
    %cst_95 = arith.constant dense<0.000000e+00> : vector<2x128xf32>
    %415 = tpu.matmul %381, %4, %cst_95 {dimension_numbers = #tpu.dot_dimension_numbers<[1], [0], [0], [1], [0, 0, 1, 1], [], []>} : vector<2x32xf32>, vector<32x128xf32>, vector<2x128xf32> -> vector<2x128xf32>
    %416 = arith.addf %414, %415 : vector<2x128xf32>
    %417 = vector.broadcast %5 : vector<1x128xf32> to vector<2x128xf32>
    %418 = arith.addf %416, %417 : vector<2x128xf32>
    %419 = vector.extract_strided_slice %418 {offsets = [0, 0], sizes = [2, 32], strides = [1, 1]} : vector<2x128xf32> to vector<2x32xf32>
    %420 = arith.negf %419 : vector<2x32xf32>
    %421 = math.exp %420 : vector<2x32xf32>
    %cst_96 = arith.constant 1.000000e+00 : f32
    %422 = vector.broadcast %cst_96 : f32 to vector<2x32xf32>
    %423 = arith.addf %422, %421 : vector<2x32xf32>
    %424 = arith.divf %422, %423 : vector<2x32xf32>
    %425 = vector.extract_strided_slice %418 {offsets = [0, 32], sizes = [2, 32], strides = [1, 1]} : vector<2x128xf32> to vector<2x32xf32>
    %426 = arith.negf %425 : vector<2x32xf32>
    %427 = math.exp %426 : vector<2x32xf32>
    %cst_97 = arith.constant 1.000000e+00 : f32
    %428 = vector.broadcast %cst_97 : f32 to vector<2x32xf32>
    %429 = arith.addf %428, %427 : vector<2x32xf32>
    %430 = arith.divf %428, %429 : vector<2x32xf32>
    %431 = vector.extract_strided_slice %418 {offsets = [0, 64], sizes = [2, 32], strides = [1, 1]} : vector<2x128xf32> to vector<2x32xf32>
    %432 = math.tanh %431 : vector<2x32xf32>
    %433 = vector.extract_strided_slice %418 {offsets = [0, 96], sizes = [2, 32], strides = [1, 1]} : vector<2x128xf32> to vector<2x32xf32>
    %434 = arith.negf %433 : vector<2x32xf32>
    %435 = math.exp %434 : vector<2x32xf32>
    %cst_98 = arith.constant 1.000000e+00 : f32
    %436 = vector.broadcast %cst_98 : f32 to vector<2x32xf32>
    %437 = arith.addf %436, %435 : vector<2x32xf32>
    %438 = arith.divf %436, %437 : vector<2x32xf32>
    %439 = arith.mulf %430, %379 : vector<2x32xf32>
    %440 = arith.mulf %424, %432 : vector<2x32xf32>
    %441 = arith.addf %439, %440 : vector<2x32xf32>
    %442 = math.tanh %441 : vector<2x32xf32>
    %443 = arith.mulf %438, %442 : vector<2x32xf32>
    %c7 = arith.constant 7 : index
    %c0_99 = arith.constant 0 : index
    %c0_100 = arith.constant 0 : index
    %444 = vector.load %arg1[%c7, %c0_99, %c0_100] : memref<8x2x4xf32, #tpu.memory_space<vmem>>, vector<1x2x4xf32>
    %445 = vector.shape_cast %444 : vector<1x2x4xf32> to vector<2x4xf32>
    %cst_101 = arith.constant dense<0.000000e+00> : vector<2x128xf32>
    %446 = tpu.matmul %445, %0, %cst_101 {dimension_numbers = #tpu.dot_dimension_numbers<[1], [0], [0], [1], [0, 0, 1, 1], [], []>} : vector<2x4xf32>, vector<4x128xf32>, vector<2x128xf32> -> vector<2x128xf32>
    %cst_102 = arith.constant dense<0.000000e+00> : vector<2x128xf32>
    %447 = tpu.matmul %413, %1, %cst_102 {dimension_numbers = #tpu.dot_dimension_numbers<[1], [0], [0], [1], [0, 0, 1, 1], [], []>} : vector<2x32xf32>, vector<32x128xf32>, vector<2x128xf32> -> vector<2x128xf32>
    %448 = arith.addf %446, %447 : vector<2x128xf32>
    %449 = vector.broadcast %2 : vector<1x128xf32> to vector<2x128xf32>
    %450 = arith.addf %448, %449 : vector<2x128xf32>
    %451 = vector.extract_strided_slice %450 {offsets = [0, 0], sizes = [2, 32], strides = [1, 1]} : vector<2x128xf32> to vector<2x32xf32>
    %452 = arith.negf %451 : vector<2x32xf32>
    %453 = math.exp %452 : vector<2x32xf32>
    %cst_103 = arith.constant 1.000000e+00 : f32
    %454 = vector.broadcast %cst_103 : f32 to vector<2x32xf32>
    %455 = arith.addf %454, %453 : vector<2x32xf32>
    %456 = arith.divf %454, %455 : vector<2x32xf32>
    %457 = vector.extract_strided_slice %450 {offsets = [0, 32], sizes = [2, 32], strides = [1, 1]} : vector<2x128xf32> to vector<2x32xf32>
    %458 = arith.negf %457 : vector<2x32xf32>
    %459 = math.exp %458 : vector<2x32xf32>
    %cst_104 = arith.constant 1.000000e+00 : f32
    %460 = vector.broadcast %cst_104 : f32 to vector<2x32xf32>
    %461 = arith.addf %460, %459 : vector<2x32xf32>
    %462 = arith.divf %460, %461 : vector<2x32xf32>
    %463 = vector.extract_strided_slice %450 {offsets = [0, 64], sizes = [2, 32], strides = [1, 1]} : vector<2x128xf32> to vector<2x32xf32>
    %464 = math.tanh %463 : vector<2x32xf32>
    %465 = vector.extract_strided_slice %450 {offsets = [0, 96], sizes = [2, 32], strides = [1, 1]} : vector<2x128xf32> to vector<2x32xf32>
    %466 = arith.negf %465 : vector<2x32xf32>
    %467 = math.exp %466 : vector<2x32xf32>
    %cst_105 = arith.constant 1.000000e+00 : f32
    %468 = vector.broadcast %cst_105 : f32 to vector<2x32xf32>
    %469 = arith.addf %468, %467 : vector<2x32xf32>
    %470 = arith.divf %468, %469 : vector<2x32xf32>
    %471 = arith.mulf %462, %411 : vector<2x32xf32>
    %472 = arith.mulf %456, %464 : vector<2x32xf32>
    %473 = arith.addf %471, %472 : vector<2x32xf32>
    %474 = math.tanh %473 : vector<2x32xf32>
    %475 = arith.mulf %470, %474 : vector<2x32xf32>
    %cst_106 = arith.constant dense<0.000000e+00> : vector<2x128xf32>
    %476 = tpu.matmul %475, %3, %cst_106 {dimension_numbers = #tpu.dot_dimension_numbers<[1], [0], [0], [1], [0, 0, 1, 1], [], []>} : vector<2x32xf32>, vector<32x128xf32>, vector<2x128xf32> -> vector<2x128xf32>
    %cst_107 = arith.constant dense<0.000000e+00> : vector<2x128xf32>
    %477 = tpu.matmul %443, %4, %cst_107 {dimension_numbers = #tpu.dot_dimension_numbers<[1], [0], [0], [1], [0, 0, 1, 1], [], []>} : vector<2x32xf32>, vector<32x128xf32>, vector<2x128xf32> -> vector<2x128xf32>
    %478 = arith.addf %476, %477 : vector<2x128xf32>
    %479 = vector.broadcast %5 : vector<1x128xf32> to vector<2x128xf32>
    %480 = arith.addf %478, %479 : vector<2x128xf32>
    %481 = vector.extract_strided_slice %480 {offsets = [0, 0], sizes = [2, 32], strides = [1, 1]} : vector<2x128xf32> to vector<2x32xf32>
    %482 = arith.negf %481 : vector<2x32xf32>
    %483 = math.exp %482 : vector<2x32xf32>
    %cst_108 = arith.constant 1.000000e+00 : f32
    %484 = vector.broadcast %cst_108 : f32 to vector<2x32xf32>
    %485 = arith.addf %484, %483 : vector<2x32xf32>
    %486 = arith.divf %484, %485 : vector<2x32xf32>
    %487 = vector.extract_strided_slice %480 {offsets = [0, 32], sizes = [2, 32], strides = [1, 1]} : vector<2x128xf32> to vector<2x32xf32>
    %488 = arith.negf %487 : vector<2x32xf32>
    %489 = math.exp %488 : vector<2x32xf32>
    %cst_109 = arith.constant 1.000000e+00 : f32
    %490 = vector.broadcast %cst_109 : f32 to vector<2x32xf32>
    %491 = arith.addf %490, %489 : vector<2x32xf32>
    %492 = arith.divf %490, %491 : vector<2x32xf32>
    %493 = vector.extract_strided_slice %480 {offsets = [0, 64], sizes = [2, 32], strides = [1, 1]} : vector<2x128xf32> to vector<2x32xf32>
    %494 = math.tanh %493 : vector<2x32xf32>
    %495 = vector.extract_strided_slice %480 {offsets = [0, 96], sizes = [2, 32], strides = [1, 1]} : vector<2x128xf32> to vector<2x32xf32>
    %496 = arith.negf %495 : vector<2x32xf32>
    %497 = math.exp %496 : vector<2x32xf32>
    %cst_110 = arith.constant 1.000000e+00 : f32
    %498 = vector.broadcast %cst_110 : f32 to vector<2x32xf32>
    %499 = arith.addf %498, %497 : vector<2x32xf32>
    %500 = arith.divf %498, %499 : vector<2x32xf32>
    %501 = arith.mulf %492, %441 : vector<2x32xf32>
    %502 = arith.mulf %486, %494 : vector<2x32xf32>
    %503 = arith.addf %501, %502 : vector<2x32xf32>
    %504 = math.tanh %503 : vector<2x32xf32>
    %505 = arith.mulf %500, %504 : vector<2x32xf32>
    %cst_111 = arith.constant -2.200000e+00 : f32
    %506 = vector.broadcast %cst_111 : f32 to vector<2x32xf32>
    %507 = arith.cmpf oge, %505, %506 : vector<2x32xf32>
    %cst_112 = arith.constant -1.800000e+00 : f32
    %508 = vector.broadcast %cst_112 : f32 to vector<2x32xf32>
    %509 = arith.cmpf olt, %505, %508 : vector<2x32xf32>
    %510 = arith.andi %507, %509 : vector<2x32xi1>
    %511 = arith.extui %510 : vector<2x32xi1> to vector<2x32xi32>
    %512 = arith.sitofp %511 : vector<2x32xi32> to vector<2x32xf32>
    %cst_113 = arith.constant -1.800000e+00 : f32
    %513 = vector.broadcast %cst_113 : f32 to vector<2x32xf32>
    %514 = arith.cmpf oge, %505, %513 : vector<2x32xf32>
    %cst_114 = arith.constant -1.400000e+00 : f32
    %515 = vector.broadcast %cst_114 : f32 to vector<2x32xf32>
    %516 = arith.cmpf olt, %505, %515 : vector<2x32xf32>
    %517 = arith.andi %514, %516 : vector<2x32xi1>
    %518 = arith.extui %517 : vector<2x32xi1> to vector<2x32xi32>
    %519 = arith.sitofp %518 : vector<2x32xi32> to vector<2x32xf32>
    %cst_115 = arith.constant -1.400000e+00 : f32
    %520 = vector.broadcast %cst_115 : f32 to vector<2x32xf32>
    %521 = arith.cmpf oge, %505, %520 : vector<2x32xf32>
    %cst_116 = arith.constant -1.000000e+00 : f32
    %522 = vector.broadcast %cst_116 : f32 to vector<2x32xf32>
    %523 = arith.cmpf olt, %505, %522 : vector<2x32xf32>
    %524 = arith.andi %521, %523 : vector<2x32xi1>
    %525 = arith.extui %524 : vector<2x32xi1> to vector<2x32xi32>
    %526 = arith.sitofp %525 : vector<2x32xi32> to vector<2x32xf32>
    %cst_117 = arith.constant -1.000000e+00 : f32
    %527 = vector.broadcast %cst_117 : f32 to vector<2x32xf32>
    %528 = arith.cmpf oge, %505, %527 : vector<2x32xf32>
    %cst_118 = arith.constant -6.000000e-01 : f32
    %529 = vector.broadcast %cst_118 : f32 to vector<2x32xf32>
    %530 = arith.cmpf olt, %505, %529 : vector<2x32xf32>
    %531 = arith.andi %528, %530 : vector<2x32xi1>
    %532 = arith.extui %531 : vector<2x32xi1> to vector<2x32xi32>
    %533 = arith.sitofp %532 : vector<2x32xi32> to vector<2x32xf32>
    %cst_119 = arith.constant -6.000000e-01 : f32
    %534 = vector.broadcast %cst_119 : f32 to vector<2x32xf32>
    %535 = arith.cmpf oge, %505, %534 : vector<2x32xf32>
    %cst_120 = arith.constant -2.000000e-01 : f32
    %536 = vector.broadcast %cst_120 : f32 to vector<2x32xf32>
    %537 = arith.cmpf olt, %505, %536 : vector<2x32xf32>
    %538 = arith.andi %535, %537 : vector<2x32xi1>
    %539 = arith.extui %538 : vector<2x32xi1> to vector<2x32xi32>
    %540 = arith.sitofp %539 : vector<2x32xi32> to vector<2x32xf32>
    %cst_121 = arith.constant -2.000000e-01 : f32
    %541 = vector.broadcast %cst_121 : f32 to vector<2x32xf32>
    %542 = arith.cmpf oge, %505, %541 : vector<2x32xf32>
    %cst_122 = arith.constant 2.000000e-01 : f32
    %543 = vector.broadcast %cst_122 : f32 to vector<2x32xf32>
    %544 = arith.cmpf olt, %505, %543 : vector<2x32xf32>
    %545 = arith.andi %542, %544 : vector<2x32xi1>
    %546 = arith.extui %545 : vector<2x32xi1> to vector<2x32xi32>
    %547 = arith.sitofp %546 : vector<2x32xi32> to vector<2x32xf32>
    %cst_123 = arith.constant 2.000000e-01 : f32
    %548 = vector.broadcast %cst_123 : f32 to vector<2x32xf32>
    %549 = arith.cmpf oge, %505, %548 : vector<2x32xf32>
    %cst_124 = arith.constant 6.000000e-01 : f32
    %550 = vector.broadcast %cst_124 : f32 to vector<2x32xf32>
    %551 = arith.cmpf olt, %505, %550 : vector<2x32xf32>
    %552 = arith.andi %549, %551 : vector<2x32xi1>
    %553 = arith.extui %552 : vector<2x32xi1> to vector<2x32xi32>
    %554 = arith.sitofp %553 : vector<2x32xi32> to vector<2x32xf32>
    %cst_125 = arith.constant 6.000000e-01 : f32
    %555 = vector.broadcast %cst_125 : f32 to vector<2x32xf32>
    %556 = arith.cmpf oge, %505, %555 : vector<2x32xf32>
    %cst_126 = arith.constant 1.000000e+00 : f32
    %557 = vector.broadcast %cst_126 : f32 to vector<2x32xf32>
    %558 = arith.cmpf olt, %505, %557 : vector<2x32xf32>
    %559 = arith.andi %556, %558 : vector<2x32xi1>
    %560 = arith.extui %559 : vector<2x32xi1> to vector<2x32xi32>
    %561 = arith.sitofp %560 : vector<2x32xi32> to vector<2x32xf32>
    %cst_127 = arith.constant 1.000000e+00 : f32
    %562 = vector.broadcast %cst_127 : f32 to vector<2x32xf32>
    %563 = arith.cmpf oge, %505, %562 : vector<2x32xf32>
    %cst_128 = arith.constant 1.400000e+00 : f32
    %564 = vector.broadcast %cst_128 : f32 to vector<2x32xf32>
    %565 = arith.cmpf olt, %505, %564 : vector<2x32xf32>
    %566 = arith.andi %563, %565 : vector<2x32xi1>
    %567 = arith.extui %566 : vector<2x32xi1> to vector<2x32xi32>
    %568 = arith.sitofp %567 : vector<2x32xi32> to vector<2x32xf32>
    %cst_129 = arith.constant 1.400000e+00 : f32
    %569 = vector.broadcast %cst_129 : f32 to vector<2x32xf32>
    %570 = arith.cmpf oge, %505, %569 : vector<2x32xf32>
    %cst_130 = arith.constant 1.800000e+00 : f32
    %571 = vector.broadcast %cst_130 : f32 to vector<2x32xf32>
    %572 = arith.cmpf olt, %505, %571 : vector<2x32xf32>
    %573 = arith.andi %570, %572 : vector<2x32xi1>
    %574 = arith.extui %573 : vector<2x32xi1> to vector<2x32xi32>
    %575 = arith.sitofp %574 : vector<2x32xi32> to vector<2x32xf32>
    %cst_131 = arith.constant 1.800000e+00 : f32
    %576 = vector.broadcast %cst_131 : f32 to vector<2x32xf32>
    %577 = arith.cmpf oge, %505, %576 : vector<2x32xf32>
    %cst_132 = arith.constant 2.200000e+00 : f32
    %578 = vector.broadcast %cst_132 : f32 to vector<2x32xf32>
    %579 = arith.cmpf olt, %505, %578 : vector<2x32xf32>
    %580 = arith.andi %577, %579 : vector<2x32xi1>
    %581 = arith.extui %580 : vector<2x32xi1> to vector<2x32xi32>
    %582 = arith.sitofp %581 : vector<2x32xi32> to vector<2x32xf32>
    %cst_133 = arith.constant -2.200000e+00 : f32
    %583 = vector.broadcast %cst_133 : f32 to vector<2x32xf32>
    %584 = arith.subf %505, %583 : vector<2x32xf32>
    %cst_134 = arith.constant 2.500000e+00 : f32
    %585 = vector.broadcast %cst_134 : f32 to vector<2x32xf32>
    %586 = arith.mulf %584, %585 : vector<2x32xf32>
    %cst_135 = arith.constant -1.400000e+00 : f32
    %587 = vector.broadcast %cst_135 : f32 to vector<2x32xf32>
    %588 = arith.subf %587, %505 : vector<2x32xf32>
    %cst_136 = arith.constant 2.500000e+00 : f32
    %589 = vector.broadcast %cst_136 : f32 to vector<2x32xf32>
    %590 = arith.mulf %588, %589 : vector<2x32xf32>
    %591 = arith.mulf %586, %512 : vector<2x32xf32>
    %592 = arith.mulf %590, %519 : vector<2x32xf32>
    %593 = arith.addf %591, %592 : vector<2x32xf32>
    %cst_137 = arith.constant -1.800000e+00 : f32
    %594 = vector.broadcast %cst_137 : f32 to vector<2x32xf32>
    %595 = arith.subf %505, %594 : vector<2x32xf32>
    %cst_138 = arith.constant 2.500000e+00 : f32
    %596 = vector.broadcast %cst_138 : f32 to vector<2x32xf32>
    %597 = arith.mulf %595, %596 : vector<2x32xf32>
    %cst_139 = arith.constant -1.000000e+00 : f32
    %598 = vector.broadcast %cst_139 : f32 to vector<2x32xf32>
    %599 = arith.subf %598, %505 : vector<2x32xf32>
    %cst_140 = arith.constant 2.500000e+00 : f32
    %600 = vector.broadcast %cst_140 : f32 to vector<2x32xf32>
    %601 = arith.mulf %599, %600 : vector<2x32xf32>
    %602 = arith.mulf %597, %519 : vector<2x32xf32>
    %603 = arith.mulf %601, %526 : vector<2x32xf32>
    %604 = arith.addf %602, %603 : vector<2x32xf32>
    %cst_141 = arith.constant -1.400000e+00 : f32
    %605 = vector.broadcast %cst_141 : f32 to vector<2x32xf32>
    %606 = arith.subf %505, %605 : vector<2x32xf32>
    %cst_142 = arith.constant 2.500000e+00 : f32
    %607 = vector.broadcast %cst_142 : f32 to vector<2x32xf32>
    %608 = arith.mulf %606, %607 : vector<2x32xf32>
    %cst_143 = arith.constant -6.000000e-01 : f32
    %609 = vector.broadcast %cst_143 : f32 to vector<2x32xf32>
    %610 = arith.subf %609, %505 : vector<2x32xf32>
    %cst_144 = arith.constant 2.500000e+00 : f32
    %611 = vector.broadcast %cst_144 : f32 to vector<2x32xf32>
    %612 = arith.mulf %610, %611 : vector<2x32xf32>
    %613 = arith.mulf %608, %526 : vector<2x32xf32>
    %614 = arith.mulf %612, %533 : vector<2x32xf32>
    %615 = arith.addf %613, %614 : vector<2x32xf32>
    %cst_145 = arith.constant -1.000000e+00 : f32
    %616 = vector.broadcast %cst_145 : f32 to vector<2x32xf32>
    %617 = arith.subf %505, %616 : vector<2x32xf32>
    %cst_146 = arith.constant 2.500000e+00 : f32
    %618 = vector.broadcast %cst_146 : f32 to vector<2x32xf32>
    %619 = arith.mulf %617, %618 : vector<2x32xf32>
    %cst_147 = arith.constant -2.000000e-01 : f32
    %620 = vector.broadcast %cst_147 : f32 to vector<2x32xf32>
    %621 = arith.subf %620, %505 : vector<2x32xf32>
    %cst_148 = arith.constant 2.500000e+00 : f32
    %622 = vector.broadcast %cst_148 : f32 to vector<2x32xf32>
    %623 = arith.mulf %621, %622 : vector<2x32xf32>
    %624 = arith.mulf %619, %533 : vector<2x32xf32>
    %625 = arith.mulf %623, %540 : vector<2x32xf32>
    %626 = arith.addf %624, %625 : vector<2x32xf32>
    %cst_149 = arith.constant -6.000000e-01 : f32
    %627 = vector.broadcast %cst_149 : f32 to vector<2x32xf32>
    %628 = arith.subf %505, %627 : vector<2x32xf32>
    %cst_150 = arith.constant 2.500000e+00 : f32
    %629 = vector.broadcast %cst_150 : f32 to vector<2x32xf32>
    %630 = arith.mulf %628, %629 : vector<2x32xf32>
    %cst_151 = arith.constant 2.000000e-01 : f32
    %631 = vector.broadcast %cst_151 : f32 to vector<2x32xf32>
    %632 = arith.subf %631, %505 : vector<2x32xf32>
    %cst_152 = arith.constant 2.500000e+00 : f32
    %633 = vector.broadcast %cst_152 : f32 to vector<2x32xf32>
    %634 = arith.mulf %632, %633 : vector<2x32xf32>
    %635 = arith.mulf %630, %540 : vector<2x32xf32>
    %636 = arith.mulf %634, %547 : vector<2x32xf32>
    %637 = arith.addf %635, %636 : vector<2x32xf32>
    %cst_153 = arith.constant -2.000000e-01 : f32
    %638 = vector.broadcast %cst_153 : f32 to vector<2x32xf32>
    %639 = arith.subf %505, %638 : vector<2x32xf32>
    %cst_154 = arith.constant 2.500000e+00 : f32
    %640 = vector.broadcast %cst_154 : f32 to vector<2x32xf32>
    %641 = arith.mulf %639, %640 : vector<2x32xf32>
    %cst_155 = arith.constant 6.000000e-01 : f32
    %642 = vector.broadcast %cst_155 : f32 to vector<2x32xf32>
    %643 = arith.subf %642, %505 : vector<2x32xf32>
    %cst_156 = arith.constant 2.500000e+00 : f32
    %644 = vector.broadcast %cst_156 : f32 to vector<2x32xf32>
    %645 = arith.mulf %643, %644 : vector<2x32xf32>
    %646 = arith.mulf %641, %547 : vector<2x32xf32>
    %647 = arith.mulf %645, %554 : vector<2x32xf32>
    %648 = arith.addf %646, %647 : vector<2x32xf32>
    %cst_157 = arith.constant 2.000000e-01 : f32
    %649 = vector.broadcast %cst_157 : f32 to vector<2x32xf32>
    %650 = arith.subf %505, %649 : vector<2x32xf32>
    %cst_158 = arith.constant 2.500000e+00 : f32
    %651 = vector.broadcast %cst_158 : f32 to vector<2x32xf32>
    %652 = arith.mulf %650, %651 : vector<2x32xf32>
    %cst_159 = arith.constant 1.000000e+00 : f32
    %653 = vector.broadcast %cst_159 : f32 to vector<2x32xf32>
    %654 = arith.subf %653, %505 : vector<2x32xf32>
    %cst_160 = arith.constant 2.500000e+00 : f32
    %655 = vector.broadcast %cst_160 : f32 to vector<2x32xf32>
    %656 = arith.mulf %654, %655 : vector<2x32xf32>
    %657 = arith.mulf %652, %554 : vector<2x32xf32>
    %658 = arith.mulf %656, %561 : vector<2x32xf32>
    %659 = arith.addf %657, %658 : vector<2x32xf32>
    %cst_161 = arith.constant 6.000000e-01 : f32
    %660 = vector.broadcast %cst_161 : f32 to vector<2x32xf32>
    %661 = arith.subf %505, %660 : vector<2x32xf32>
    %cst_162 = arith.constant 2.500000e+00 : f32
    %662 = vector.broadcast %cst_162 : f32 to vector<2x32xf32>
    %663 = arith.mulf %661, %662 : vector<2x32xf32>
    %cst_163 = arith.constant 1.400000e+00 : f32
    %664 = vector.broadcast %cst_163 : f32 to vector<2x32xf32>
    %665 = arith.subf %664, %505 : vector<2x32xf32>
    %cst_164 = arith.constant 2.500000e+00 : f32
    %666 = vector.broadcast %cst_164 : f32 to vector<2x32xf32>
    %667 = arith.mulf %665, %666 : vector<2x32xf32>
    %668 = arith.mulf %663, %561 : vector<2x32xf32>
    %669 = arith.mulf %667, %568 : vector<2x32xf32>
    %670 = arith.addf %668, %669 : vector<2x32xf32>
    %cst_165 = arith.constant 1.000000e+00 : f32
    %671 = vector.broadcast %cst_165 : f32 to vector<2x32xf32>
    %672 = arith.subf %505, %671 : vector<2x32xf32>
    %cst_166 = arith.constant 2.500000e+00 : f32
    %673 = vector.broadcast %cst_166 : f32 to vector<2x32xf32>
    %674 = arith.mulf %672, %673 : vector<2x32xf32>
    %cst_167 = arith.constant 1.800000e+00 : f32
    %675 = vector.broadcast %cst_167 : f32 to vector<2x32xf32>
    %676 = arith.subf %675, %505 : vector<2x32xf32>
    %cst_168 = arith.constant 2.500000e+00 : f32
    %677 = vector.broadcast %cst_168 : f32 to vector<2x32xf32>
    %678 = arith.mulf %676, %677 : vector<2x32xf32>
    %679 = arith.mulf %674, %568 : vector<2x32xf32>
    %680 = arith.mulf %678, %575 : vector<2x32xf32>
    %681 = arith.addf %679, %680 : vector<2x32xf32>
    %cst_169 = arith.constant 1.400000e+00 : f32
    %682 = vector.broadcast %cst_169 : f32 to vector<2x32xf32>
    %683 = arith.subf %505, %682 : vector<2x32xf32>
    %cst_170 = arith.constant 2.500000e+00 : f32
    %684 = vector.broadcast %cst_170 : f32 to vector<2x32xf32>
    %685 = arith.mulf %683, %684 : vector<2x32xf32>
    %cst_171 = arith.constant 2.200000e+00 : f32
    %686 = vector.broadcast %cst_171 : f32 to vector<2x32xf32>
    %687 = arith.subf %686, %505 : vector<2x32xf32>
    %cst_172 = arith.constant 2.500000e+00 : f32
    %688 = vector.broadcast %cst_172 : f32 to vector<2x32xf32>
    %689 = arith.mulf %687, %688 : vector<2x32xf32>
    %690 = arith.mulf %685, %575 : vector<2x32xf32>
    %691 = arith.mulf %689, %582 : vector<2x32xf32>
    %692 = arith.addf %690, %691 : vector<2x32xf32>
    %cst_173 = arith.constant -2.200000e+00 : f32
    %693 = vector.broadcast %cst_173 : f32 to vector<2x32xf32>
    %694 = arith.subf %505, %693 : vector<2x32xf32>
    %cst_174 = arith.constant 1.250000e+00 : f32
    %695 = vector.broadcast %cst_174 : f32 to vector<2x32xf32>
    %696 = arith.mulf %694, %695 : vector<2x32xf32>
    %cst_175 = arith.constant -1.000000e+00 : f32
    %697 = vector.broadcast %cst_175 : f32 to vector<2x32xf32>
    %698 = arith.subf %697, %505 : vector<2x32xf32>
    %cst_176 = arith.constant 1.250000e+00 : f32
    %699 = vector.broadcast %cst_176 : f32 to vector<2x32xf32>
    %700 = arith.mulf %698, %699 : vector<2x32xf32>
    %701 = arith.mulf %696, %593 : vector<2x32xf32>
    %702 = arith.mulf %700, %604 : vector<2x32xf32>
    %703 = arith.addf %701, %702 : vector<2x32xf32>
    %cst_177 = arith.constant -1.800000e+00 : f32
    %704 = vector.broadcast %cst_177 : f32 to vector<2x32xf32>
    %705 = arith.subf %505, %704 : vector<2x32xf32>
    %cst_178 = arith.constant 1.250000e+00 : f32
    %706 = vector.broadcast %cst_178 : f32 to vector<2x32xf32>
    %707 = arith.mulf %705, %706 : vector<2x32xf32>
    %cst_179 = arith.constant -6.000000e-01 : f32
    %708 = vector.broadcast %cst_179 : f32 to vector<2x32xf32>
    %709 = arith.subf %708, %505 : vector<2x32xf32>
    %cst_180 = arith.constant 1.250000e+00 : f32
    %710 = vector.broadcast %cst_180 : f32 to vector<2x32xf32>
    %711 = arith.mulf %709, %710 : vector<2x32xf32>
    %712 = arith.mulf %707, %604 : vector<2x32xf32>
    %713 = arith.mulf %711, %615 : vector<2x32xf32>
    %714 = arith.addf %712, %713 : vector<2x32xf32>
    %cst_181 = arith.constant -1.400000e+00 : f32
    %715 = vector.broadcast %cst_181 : f32 to vector<2x32xf32>
    %716 = arith.subf %505, %715 : vector<2x32xf32>
    %cst_182 = arith.constant 1.250000e+00 : f32
    %717 = vector.broadcast %cst_182 : f32 to vector<2x32xf32>
    %718 = arith.mulf %716, %717 : vector<2x32xf32>
    %cst_183 = arith.constant -2.000000e-01 : f32
    %719 = vector.broadcast %cst_183 : f32 to vector<2x32xf32>
    %720 = arith.subf %719, %505 : vector<2x32xf32>
    %cst_184 = arith.constant 1.250000e+00 : f32
    %721 = vector.broadcast %cst_184 : f32 to vector<2x32xf32>
    %722 = arith.mulf %720, %721 : vector<2x32xf32>
    %723 = arith.mulf %718, %615 : vector<2x32xf32>
    %724 = arith.mulf %722, %626 : vector<2x32xf32>
    %725 = arith.addf %723, %724 : vector<2x32xf32>
    %cst_185 = arith.constant -1.000000e+00 : f32
    %726 = vector.broadcast %cst_185 : f32 to vector<2x32xf32>
    %727 = arith.subf %505, %726 : vector<2x32xf32>
    %cst_186 = arith.constant 1.250000e+00 : f32
    %728 = vector.broadcast %cst_186 : f32 to vector<2x32xf32>
    %729 = arith.mulf %727, %728 : vector<2x32xf32>
    %cst_187 = arith.constant 2.000000e-01 : f32
    %730 = vector.broadcast %cst_187 : f32 to vector<2x32xf32>
    %731 = arith.subf %730, %505 : vector<2x32xf32>
    %cst_188 = arith.constant 1.250000e+00 : f32
    %732 = vector.broadcast %cst_188 : f32 to vector<2x32xf32>
    %733 = arith.mulf %731, %732 : vector<2x32xf32>
    %734 = arith.mulf %729, %626 : vector<2x32xf32>
    %735 = arith.mulf %733, %637 : vector<2x32xf32>
    %736 = arith.addf %734, %735 : vector<2x32xf32>
    %cst_189 = arith.constant -6.000000e-01 : f32
    %737 = vector.broadcast %cst_189 : f32 to vector<2x32xf32>
    %738 = arith.subf %505, %737 : vector<2x32xf32>
    %cst_190 = arith.constant 1.250000e+00 : f32
    %739 = vector.broadcast %cst_190 : f32 to vector<2x32xf32>
    %740 = arith.mulf %738, %739 : vector<2x32xf32>
    %cst_191 = arith.constant 6.000000e-01 : f32
    %741 = vector.broadcast %cst_191 : f32 to vector<2x32xf32>
    %742 = arith.subf %741, %505 : vector<2x32xf32>
    %cst_192 = arith.constant 1.250000e+00 : f32
    %743 = vector.broadcast %cst_192 : f32 to vector<2x32xf32>
    %744 = arith.mulf %742, %743 : vector<2x32xf32>
    %745 = arith.mulf %740, %637 : vector<2x32xf32>
    %746 = arith.mulf %744, %648 : vector<2x32xf32>
    %747 = arith.addf %745, %746 : vector<2x32xf32>
    %cst_193 = arith.constant -2.000000e-01 : f32
    %748 = vector.broadcast %cst_193 : f32 to vector<2x32xf32>
    %749 = arith.subf %505, %748 : vector<2x32xf32>
    %cst_194 = arith.constant 1.250000e+00 : f32
    %750 = vector.broadcast %cst_194 : f32 to vector<2x32xf32>
    %751 = arith.mulf %749, %750 : vector<2x32xf32>
    %cst_195 = arith.constant 1.000000e+00 : f32
    %752 = vector.broadcast %cst_195 : f32 to vector<2x32xf32>
    %753 = arith.subf %752, %505 : vector<2x32xf32>
    %cst_196 = arith.constant 1.250000e+00 : f32
    %754 = vector.broadcast %cst_196 : f32 to vector<2x32xf32>
    %755 = arith.mulf %753, %754 : vector<2x32xf32>
    %756 = arith.mulf %751, %648 : vector<2x32xf32>
    %757 = arith.mulf %755, %659 : vector<2x32xf32>
    %758 = arith.addf %756, %757 : vector<2x32xf32>
    %cst_197 = arith.constant 2.000000e-01 : f32
    %759 = vector.broadcast %cst_197 : f32 to vector<2x32xf32>
    %760 = arith.subf %505, %759 : vector<2x32xf32>
    %cst_198 = arith.constant 1.250000e+00 : f32
    %761 = vector.broadcast %cst_198 : f32 to vector<2x32xf32>
    %762 = arith.mulf %760, %761 : vector<2x32xf32>
    %cst_199 = arith.constant 1.400000e+00 : f32
    %763 = vector.broadcast %cst_199 : f32 to vector<2x32xf32>
    %764 = arith.subf %763, %505 : vector<2x32xf32>
    %cst_200 = arith.constant 1.250000e+00 : f32
    %765 = vector.broadcast %cst_200 : f32 to vector<2x32xf32>
    %766 = arith.mulf %764, %765 : vector<2x32xf32>
    %767 = arith.mulf %762, %659 : vector<2x32xf32>
    %768 = arith.mulf %766, %670 : vector<2x32xf32>
    %769 = arith.addf %767, %768 : vector<2x32xf32>
    %cst_201 = arith.constant 6.000000e-01 : f32
    %770 = vector.broadcast %cst_201 : f32 to vector<2x32xf32>
    %771 = arith.subf %505, %770 : vector<2x32xf32>
    %cst_202 = arith.constant 1.250000e+00 : f32
    %772 = vector.broadcast %cst_202 : f32 to vector<2x32xf32>
    %773 = arith.mulf %771, %772 : vector<2x32xf32>
    %cst_203 = arith.constant 1.800000e+00 : f32
    %774 = vector.broadcast %cst_203 : f32 to vector<2x32xf32>
    %775 = arith.subf %774, %505 : vector<2x32xf32>
    %cst_204 = arith.constant 1.250000e+00 : f32
    %776 = vector.broadcast %cst_204 : f32 to vector<2x32xf32>
    %777 = arith.mulf %775, %776 : vector<2x32xf32>
    %778 = arith.mulf %773, %670 : vector<2x32xf32>
    %779 = arith.mulf %777, %681 : vector<2x32xf32>
    %780 = arith.addf %778, %779 : vector<2x32xf32>
    %cst_205 = arith.constant 1.000000e+00 : f32
    %781 = vector.broadcast %cst_205 : f32 to vector<2x32xf32>
    %782 = arith.subf %505, %781 : vector<2x32xf32>
    %cst_206 = arith.constant 1.250000e+00 : f32
    %783 = vector.broadcast %cst_206 : f32 to vector<2x32xf32>
    %784 = arith.mulf %782, %783 : vector<2x32xf32>
    %cst_207 = arith.constant 2.200000e+00 : f32
    %785 = vector.broadcast %cst_207 : f32 to vector<2x32xf32>
    %786 = arith.subf %785, %505 : vector<2x32xf32>
    %cst_208 = arith.constant 1.250000e+00 : f32
    %787 = vector.broadcast %cst_208 : f32 to vector<2x32xf32>
    %788 = arith.mulf %786, %787 : vector<2x32xf32>
    %789 = arith.mulf %784, %681 : vector<2x32xf32>
    %790 = arith.mulf %788, %692 : vector<2x32xf32>
    %791 = arith.addf %789, %790 : vector<2x32xf32>
    %cst_209 = arith.constant -2.200000e+00 : f32
    %792 = vector.broadcast %cst_209 : f32 to vector<2x32xf32>
    %793 = arith.subf %505, %792 : vector<2x32xf32>
    %cst_210 = arith.constant 0.833333313 : f32
    %794 = vector.broadcast %cst_210 : f32 to vector<2x32xf32>
    %795 = arith.mulf %793, %794 : vector<2x32xf32>
    %cst_211 = arith.constant -6.000000e-01 : f32
    %796 = vector.broadcast %cst_211 : f32 to vector<2x32xf32>
    %797 = arith.subf %796, %505 : vector<2x32xf32>
    %cst_212 = arith.constant 0.833333313 : f32
    %798 = vector.broadcast %cst_212 : f32 to vector<2x32xf32>
    %799 = arith.mulf %797, %798 : vector<2x32xf32>
    %800 = arith.mulf %795, %703 : vector<2x32xf32>
    %801 = arith.mulf %799, %714 : vector<2x32xf32>
    %802 = arith.addf %800, %801 : vector<2x32xf32>
    %cst_213 = arith.constant -1.800000e+00 : f32
    %803 = vector.broadcast %cst_213 : f32 to vector<2x32xf32>
    %804 = arith.subf %505, %803 : vector<2x32xf32>
    %cst_214 = arith.constant 0.833333313 : f32
    %805 = vector.broadcast %cst_214 : f32 to vector<2x32xf32>
    %806 = arith.mulf %804, %805 : vector<2x32xf32>
    %cst_215 = arith.constant -2.000000e-01 : f32
    %807 = vector.broadcast %cst_215 : f32 to vector<2x32xf32>
    %808 = arith.subf %807, %505 : vector<2x32xf32>
    %cst_216 = arith.constant 0.833333313 : f32
    %809 = vector.broadcast %cst_216 : f32 to vector<2x32xf32>
    %810 = arith.mulf %808, %809 : vector<2x32xf32>
    %811 = arith.mulf %806, %714 : vector<2x32xf32>
    %812 = arith.mulf %810, %725 : vector<2x32xf32>
    %813 = arith.addf %811, %812 : vector<2x32xf32>
    %cst_217 = arith.constant -1.400000e+00 : f32
    %814 = vector.broadcast %cst_217 : f32 to vector<2x32xf32>
    %815 = arith.subf %505, %814 : vector<2x32xf32>
    %cst_218 = arith.constant 0.833333313 : f32
    %816 = vector.broadcast %cst_218 : f32 to vector<2x32xf32>
    %817 = arith.mulf %815, %816 : vector<2x32xf32>
    %cst_219 = arith.constant 2.000000e-01 : f32
    %818 = vector.broadcast %cst_219 : f32 to vector<2x32xf32>
    %819 = arith.subf %818, %505 : vector<2x32xf32>
    %cst_220 = arith.constant 0.833333313 : f32
    %820 = vector.broadcast %cst_220 : f32 to vector<2x32xf32>
    %821 = arith.mulf %819, %820 : vector<2x32xf32>
    %822 = arith.mulf %817, %725 : vector<2x32xf32>
    %823 = arith.mulf %821, %736 : vector<2x32xf32>
    %824 = arith.addf %822, %823 : vector<2x32xf32>
    %cst_221 = arith.constant -1.000000e+00 : f32
    %825 = vector.broadcast %cst_221 : f32 to vector<2x32xf32>
    %826 = arith.subf %505, %825 : vector<2x32xf32>
    %cst_222 = arith.constant 0.833333313 : f32
    %827 = vector.broadcast %cst_222 : f32 to vector<2x32xf32>
    %828 = arith.mulf %826, %827 : vector<2x32xf32>
    %cst_223 = arith.constant 6.000000e-01 : f32
    %829 = vector.broadcast %cst_223 : f32 to vector<2x32xf32>
    %830 = arith.subf %829, %505 : vector<2x32xf32>
    %cst_224 = arith.constant 0.833333313 : f32
    %831 = vector.broadcast %cst_224 : f32 to vector<2x32xf32>
    %832 = arith.mulf %830, %831 : vector<2x32xf32>
    %833 = arith.mulf %828, %736 : vector<2x32xf32>
    %834 = arith.mulf %832, %747 : vector<2x32xf32>
    %835 = arith.addf %833, %834 : vector<2x32xf32>
    %cst_225 = arith.constant -6.000000e-01 : f32
    %836 = vector.broadcast %cst_225 : f32 to vector<2x32xf32>
    %837 = arith.subf %505, %836 : vector<2x32xf32>
    %cst_226 = arith.constant 0.833333313 : f32
    %838 = vector.broadcast %cst_226 : f32 to vector<2x32xf32>
    %839 = arith.mulf %837, %838 : vector<2x32xf32>
    %cst_227 = arith.constant 1.000000e+00 : f32
    %840 = vector.broadcast %cst_227 : f32 to vector<2x32xf32>
    %841 = arith.subf %840, %505 : vector<2x32xf32>
    %cst_228 = arith.constant 0.833333313 : f32
    %842 = vector.broadcast %cst_228 : f32 to vector<2x32xf32>
    %843 = arith.mulf %841, %842 : vector<2x32xf32>
    %844 = arith.mulf %839, %747 : vector<2x32xf32>
    %845 = arith.mulf %843, %758 : vector<2x32xf32>
    %846 = arith.addf %844, %845 : vector<2x32xf32>
    %cst_229 = arith.constant -2.000000e-01 : f32
    %847 = vector.broadcast %cst_229 : f32 to vector<2x32xf32>
    %848 = arith.subf %505, %847 : vector<2x32xf32>
    %cst_230 = arith.constant 0.833333313 : f32
    %849 = vector.broadcast %cst_230 : f32 to vector<2x32xf32>
    %850 = arith.mulf %848, %849 : vector<2x32xf32>
    %cst_231 = arith.constant 1.400000e+00 : f32
    %851 = vector.broadcast %cst_231 : f32 to vector<2x32xf32>
    %852 = arith.subf %851, %505 : vector<2x32xf32>
    %cst_232 = arith.constant 0.833333313 : f32
    %853 = vector.broadcast %cst_232 : f32 to vector<2x32xf32>
    %854 = arith.mulf %852, %853 : vector<2x32xf32>
    %855 = arith.mulf %850, %758 : vector<2x32xf32>
    %856 = arith.mulf %854, %769 : vector<2x32xf32>
    %857 = arith.addf %855, %856 : vector<2x32xf32>
    %cst_233 = arith.constant 2.000000e-01 : f32
    %858 = vector.broadcast %cst_233 : f32 to vector<2x32xf32>
    %859 = arith.subf %505, %858 : vector<2x32xf32>
    %cst_234 = arith.constant 0.833333313 : f32
    %860 = vector.broadcast %cst_234 : f32 to vector<2x32xf32>
    %861 = arith.mulf %859, %860 : vector<2x32xf32>
    %cst_235 = arith.constant 1.800000e+00 : f32
    %862 = vector.broadcast %cst_235 : f32 to vector<2x32xf32>
    %863 = arith.subf %862, %505 : vector<2x32xf32>
    %cst_236 = arith.constant 0.833333313 : f32
    %864 = vector.broadcast %cst_236 : f32 to vector<2x32xf32>
    %865 = arith.mulf %863, %864 : vector<2x32xf32>
    %866 = arith.mulf %861, %769 : vector<2x32xf32>
    %867 = arith.mulf %865, %780 : vector<2x32xf32>
    %868 = arith.addf %866, %867 : vector<2x32xf32>
    %cst_237 = arith.constant 6.000000e-01 : f32
    %869 = vector.broadcast %cst_237 : f32 to vector<2x32xf32>
    %870 = arith.subf %505, %869 : vector<2x32xf32>
    %cst_238 = arith.constant 0.833333313 : f32
    %871 = vector.broadcast %cst_238 : f32 to vector<2x32xf32>
    %872 = arith.mulf %870, %871 : vector<2x32xf32>
    %cst_239 = arith.constant 2.200000e+00 : f32
    %873 = vector.broadcast %cst_239 : f32 to vector<2x32xf32>
    %874 = arith.subf %873, %505 : vector<2x32xf32>
    %cst_240 = arith.constant 0.833333313 : f32
    %875 = vector.broadcast %cst_240 : f32 to vector<2x32xf32>
    %876 = arith.mulf %874, %875 : vector<2x32xf32>
    %877 = arith.mulf %872, %780 : vector<2x32xf32>
    %878 = arith.mulf %876, %791 : vector<2x32xf32>
    %879 = arith.addf %877, %878 : vector<2x32xf32>
    %880 = arith.negf %505 : vector<2x32xf32>
    %881 = math.exp %880 : vector<2x32xf32>
    %cst_241 = arith.constant 1.000000e+00 : f32
    %882 = vector.broadcast %cst_241 : f32 to vector<2x32xf32>
    %883 = arith.addf %882, %881 : vector<2x32xf32>
    %884 = arith.divf %882, %883 : vector<2x32xf32>
    %885 = arith.mulf %505, %884 : vector<2x32xf32>
    %c0_242 = arith.constant 0 : index
    %c0_243 = arith.constant 0 : index
    %c0_244 = arith.constant 0 : index
    %886 = vector.load %arg8[%c0_242, %c0_243, %c0_244] : memref<9x32x16xf32, #tpu.memory_space<vmem>>, vector<1x32x16xf32>
    %887 = vector.shape_cast %886 : vector<1x32x16xf32> to vector<32x16xf32>
    %cst_245 = arith.constant dense<0.000000e+00> : vector<2x16xf32>
    %888 = tpu.matmul %885, %887, %cst_245 {dimension_numbers = #tpu.dot_dimension_numbers<[1], [0], [0], [1], [0, 0, 1, 1], [], []>} : vector<2x32xf32>, vector<32x16xf32>, vector<2x16xf32> -> vector<2x16xf32>
    %c1_246 = arith.constant 1 : index
    %c0_247 = arith.constant 0 : index
    %c0_248 = arith.constant 0 : index
    %889 = vector.load %arg8[%c1_246, %c0_247, %c0_248] : memref<9x32x16xf32, #tpu.memory_space<vmem>>, vector<1x32x16xf32>
    %890 = vector.shape_cast %889 : vector<1x32x16xf32> to vector<32x16xf32>
    %cst_249 = arith.constant dense<0.000000e+00> : vector<2x16xf32>
    %891 = tpu.matmul %802, %890, %cst_249 {dimension_numbers = #tpu.dot_dimension_numbers<[1], [0], [0], [1], [0, 0, 1, 1], [], []>} : vector<2x32xf32>, vector<32x16xf32>, vector<2x16xf32> -> vector<2x16xf32>
    %892 = arith.addf %888, %891 : vector<2x16xf32>
    %c2_250 = arith.constant 2 : index
    %c0_251 = arith.constant 0 : index
    %c0_252 = arith.constant 0 : index
    %893 = vector.load %arg8[%c2_250, %c0_251, %c0_252] : memref<9x32x16xf32, #tpu.memory_space<vmem>>, vector<1x32x16xf32>
    %894 = vector.shape_cast %893 : vector<1x32x16xf32> to vector<32x16xf32>
    %cst_253 = arith.constant dense<0.000000e+00> : vector<2x16xf32>
    %895 = tpu.matmul %813, %894, %cst_253 {dimension_numbers = #tpu.dot_dimension_numbers<[1], [0], [0], [1], [0, 0, 1, 1], [], []>} : vector<2x32xf32>, vector<32x16xf32>, vector<2x16xf32> -> vector<2x16xf32>
    %896 = arith.addf %892, %895 : vector<2x16xf32>
    %c3_254 = arith.constant 3 : index
    %c0_255 = arith.constant 0 : index
    %c0_256 = arith.constant 0 : index
    %897 = vector.load %arg8[%c3_254, %c0_255, %c0_256] : memref<9x32x16xf32, #tpu.memory_space<vmem>>, vector<1x32x16xf32>
    %898 = vector.shape_cast %897 : vector<1x32x16xf32> to vector<32x16xf32>
    %cst_257 = arith.constant dense<0.000000e+00> : vector<2x16xf32>
    %899 = tpu.matmul %824, %898, %cst_257 {dimension_numbers = #tpu.dot_dimension_numbers<[1], [0], [0], [1], [0, 0, 1, 1], [], []>} : vector<2x32xf32>, vector<32x16xf32>, vector<2x16xf32> -> vector<2x16xf32>
    %900 = arith.addf %896, %899 : vector<2x16xf32>
    %c4_258 = arith.constant 4 : index
    %c0_259 = arith.constant 0 : index
    %c0_260 = arith.constant 0 : index
    %901 = vector.load %arg8[%c4_258, %c0_259, %c0_260] : memref<9x32x16xf32, #tpu.memory_space<vmem>>, vector<1x32x16xf32>
    %902 = vector.shape_cast %901 : vector<1x32x16xf32> to vector<32x16xf32>
    %cst_261 = arith.constant dense<0.000000e+00> : vector<2x16xf32>
    %903 = tpu.matmul %835, %902, %cst_261 {dimension_numbers = #tpu.dot_dimension_numbers<[1], [0], [0], [1], [0, 0, 1, 1], [], []>} : vector<2x32xf32>, vector<32x16xf32>, vector<2x16xf32> -> vector<2x16xf32>
    %904 = arith.addf %900, %903 : vector<2x16xf32>
    %c5_262 = arith.constant 5 : index
    %c0_263 = arith.constant 0 : index
    %c0_264 = arith.constant 0 : index
    %905 = vector.load %arg8[%c5_262, %c0_263, %c0_264] : memref<9x32x16xf32, #tpu.memory_space<vmem>>, vector<1x32x16xf32>
    %906 = vector.shape_cast %905 : vector<1x32x16xf32> to vector<32x16xf32>
    %cst_265 = arith.constant dense<0.000000e+00> : vector<2x16xf32>
    %907 = tpu.matmul %846, %906, %cst_265 {dimension_numbers = #tpu.dot_dimension_numbers<[1], [0], [0], [1], [0, 0, 1, 1], [], []>} : vector<2x32xf32>, vector<32x16xf32>, vector<2x16xf32> -> vector<2x16xf32>
    %908 = arith.addf %904, %907 : vector<2x16xf32>
    %c6_266 = arith.constant 6 : index
    %c0_267 = arith.constant 0 : index
    %c0_268 = arith.constant 0 : index
    %909 = vector.load %arg8[%c6_266, %c0_267, %c0_268] : memref<9x32x16xf32, #tpu.memory_space<vmem>>, vector<1x32x16xf32>
    %910 = vector.shape_cast %909 : vector<1x32x16xf32> to vector<32x16xf32>
    %cst_269 = arith.constant dense<0.000000e+00> : vector<2x16xf32>
    %911 = tpu.matmul %857, %910, %cst_269 {dimension_numbers = #tpu.dot_dimension_numbers<[1], [0], [0], [1], [0, 0, 1, 1], [], []>} : vector<2x32xf32>, vector<32x16xf32>, vector<2x16xf32> -> vector<2x16xf32>
    %912 = arith.addf %908, %911 : vector<2x16xf32>
    %c7_270 = arith.constant 7 : index
    %c0_271 = arith.constant 0 : index
    %c0_272 = arith.constant 0 : index
    %913 = vector.load %arg8[%c7_270, %c0_271, %c0_272] : memref<9x32x16xf32, #tpu.memory_space<vmem>>, vector<1x32x16xf32>
    %914 = vector.shape_cast %913 : vector<1x32x16xf32> to vector<32x16xf32>
    %cst_273 = arith.constant dense<0.000000e+00> : vector<2x16xf32>
    %915 = tpu.matmul %868, %914, %cst_273 {dimension_numbers = #tpu.dot_dimension_numbers<[1], [0], [0], [1], [0, 0, 1, 1], [], []>} : vector<2x32xf32>, vector<32x16xf32>, vector<2x16xf32> -> vector<2x16xf32>
    %916 = arith.addf %912, %915 : vector<2x16xf32>
    %c8 = arith.constant 8 : index
    %c0_274 = arith.constant 0 : index
    %c0_275 = arith.constant 0 : index
    %917 = vector.load %arg8[%c8, %c0_274, %c0_275] : memref<9x32x16xf32, #tpu.memory_space<vmem>>, vector<1x32x16xf32>
    %918 = vector.shape_cast %917 : vector<1x32x16xf32> to vector<32x16xf32>
    %cst_276 = arith.constant dense<0.000000e+00> : vector<2x16xf32>
    %919 = tpu.matmul %879, %918, %cst_276 {dimension_numbers = #tpu.dot_dimension_numbers<[1], [0], [0], [1], [0, 0, 1, 1], [], []>} : vector<2x32xf32>, vector<32x16xf32>, vector<2x16xf32> -> vector<2x16xf32>
    %920 = arith.addf %916, %919 : vector<2x16xf32>
    %c0_277 = arith.constant 0 : index
    %c0_278 = arith.constant 0 : index
    %921 = vector.load %arg9[%c0_277, %c0_278] : memref<2x16xf32, #tpu.memory_space<vmem>>, vector<2x16xf32>
    tpu.vector_store %arg9[%c0_277, %c0_278], %920 {strides = array<i32>} : memref<2x16xf32, #tpu.memory_space<vmem>>, vector<2x16xf32>,
    return
  }
  func.func @transform_0(%arg0: i32) -> (i32, i32, i32) {
    %c0_i32 = arith.constant 0 : i32
    %c0_i32_0 = arith.constant 0 : i32
    %c0_i32_1 = arith.constant 0 : i32
    %c0_i32_2 = arith.constant 0 : i32
    return %c0_i32, %c0_i32_0, %c0_i32_1 : i32, i32, i32
  }
  func.func @transform_1(%arg0: i32) -> (i32, i32) {
    %c0_i32 = arith.constant 0 : i32
    %c0_i32_0 = arith.constant 0 : i32
    %c0_i32_1 = arith.constant 0 : i32
    return %c0_i32, %c0_i32_0 : i32, i32
  }
  func.func @transform_2(%arg0: i32) -> (i32, i32) {
    %c0_i32 = arith.constant 0 : i32
    %c0_i32_0 = arith.constant 0 : i32
    %c0_i32_1 = arith.constant 0 : i32
    return %c0_i32, %c0_i32_0 : i32, i32
  }
  func.func @transform_3(%arg0: i32) -> (i32, i32) {
    %c0_i32 = arith.constant 0 : i32
    %c0_i32_0 = arith.constant 0 : i32
    %c0_i32_1 = arith.constant 0 : i32
    return %c0_i32, %c0_i32_0 : i32, i32
  }
  func.func @transform_4(%arg0: i32) -> (i32, i32) {
    %c0_i32 = arith.constant 0 : i32
    %c0_i32_0 = arith.constant 0 : i32
    %c0_i32_1 = arith.constant 0 : i32
    return %c0_i32, %c0_i32_0 : i32, i32
  }
  func.func @transform_5(%arg0: i32) -> (i32, i32) {
    %c0_i32 = arith.constant 0 : i32
    %c0_i32_0 = arith.constant 0 : i32
    %c0_i32_1 = arith.constant 0 : i32
    return %c0_i32, %c0_i32_0 : i32, i32
  }
  func.func @transform_6(%arg0: i32) -> (i32, i32) {
    %c0_i32 = arith.constant 0 : i32
    %c0_i32_0 = arith.constant 0 : i32
    %c0_i32_1 = arith.constant 0 : i32
    return %c0_i32, %c0_i32_0 : i32, i32
  }
  func.func @transform_7(%arg0: i32) -> (i32, i32, i32) {
    %c0_i32 = arith.constant 0 : i32
    %c0_i32_0 = arith.constant 0 : i32
    %c0_i32_1 = arith.constant 0 : i32
    %c0_i32_2 = arith.constant 0 : i32
    return %c0_i32, %c0_i32_0, %c0_i32_1 : i32, i32, i32
  }
  func.func @transform_8(%arg0: i32) -> (i32, i32) {
    %c0_i32 = arith.constant 0 : i32
    %c0_i32_0 = arith.constant 0 : i32
    %c0_i32_1 = arith.constant 0 : i32
    return %c0_i32, %c0_i32_0 : i32, i32
  }
}

</mosaic_0001>

<bundles_post_ra>
// kernel: lstm_kan_forward.1
= control target key start
LH: loop header
LB: loop body
LE: loop exit
PB: predicated region body
PF: predicated region fallthrough
CT: control target
= control target key end

     0   :  { %v4868_v3 = vmov 0.0|0.0   ;;  %vm4869_vm0 = vmmov 0   ;;  %v4870_v6 = vmov 0.0   ;;  %s5642_s0 = inlined_call_operand.vmem [shape: f32[8,2,4], index: 0, kind: input, shape index: {}]   ;;  %s5643_s1 = inlined_call_operand.vmem [shape: f32[4,128], index: 1, kind: input, shape index: {}]   ;;  %s5644_s2 = inlined_call_operand.vmem [shape: f32[32,128], index: 2, kind: input, shape index: {}]   ;;  %s5645_s3 = inlined_call_operand.vmem [shape: f32[1,128], index: 3, kind: input, shape index: {}]   ;;  %s5646_s4 = inlined_call_operand.vmem [shape: f32[32,128], index: 4, kind: input, shape index: {}]   ;;  %s5647_s5 = inlined_call_operand.vmem [shape: f32[32,128], index: 5, kind: input, shape index: {}]   ;;  %s5648_s6 = inlined_call_operand.vmem [shape: f32[1,128], index: 6, kind: input, shape index: {}]   ;;  %s5649_s7 = inlined_call_operand.vmem [shape: f32[9,32,16], index: 7, kind: input, shape index: {}]   ;;  %s5650_s8 = inlined_call_operand.hbm [shape: f32[2,16], index: 8, kind: output, shape index: {}]  }
   0x1   :  { %v31_v0 = vld [vmem:[%s5644_s2] sm:$0xff]  ;;  %v32_v1 = vld [vmem:[%s5644_s2 + $0x8] sm:$0xff]  ;;  %v33_v2 = vld [vmem:[%s5644_s2 + $0x10] sm:$0xff]  ;;  %4489 = vmatprep.subr.bf16.mxu0 %v4868_v3  ;;  %4094 = vmatprep.mubr.msk.f32.mxu0 %vm4869_vm0, %v4870_v6 }
   0x2   :  { %v4929_v4 = vpack.c.bf16 %v32_v1, %v31_v0  ;;  %v34_v5 = vld [vmem:[%s5644_s2 + $0x18] sm:$0xff]  ;;  %4537 = vmatprep.subr.bf16.mxu1 %v4868_v3  ;;  %4197 = vmatprep.mubr.msk.f32.mxu1 %vm4869_vm0, %v4870_v6 }
   0x3   :  { %13 = vsyncpa [#allocation3], 0  ;;  %v4940_v7 = vpack.c.bf16 %v34_v5, %v33_v2  ;;  %v4948_v8 = vld [vmem:[%s5643_s1] sm:$0xf]  ;;  %vm124_vm1 = vcmask 1043456   ;;  %vm120_vm2 = vcmask 31744  }
   0x4   :  { %4491 = vmatpush3.bf16.msra.mxu0 %v4929_v4  ;;  %v45_v9 = vld [vmem:[%s5642_s0] sm:$0x3]  ;;  %s4871_s18 = smov 64   ;;  %s4872_s19 = smov 32   ;;  %v41_v28 = vld [vmem:[%s5647_s5 + $0x8] sm:$0xff]  ;;  %v42_v29 = vld [vmem:[%s5647_s5 + $0x10] sm:$0xff] }
   0x5   :  { %4492 = vmatprep.subr.bf16.mxu0 %v4868_v3  ;;  %v4965_v12 = vld [vmem:[%s5645_s3] ss:$0 sm:$0xff]  ;;  %v43_v31 = vld [vmem:[%s5647_s5 + $0x18] sm:$0xff]  ;;  %v37_v33 = vld [vmem:[%s5646_s4 + $0x8] sm:$0xff]  ;;  %vm46_vm3 = vcmask 261120   ;;  %s4873_s21 = smov [#allocation2]  }
   0x6   :  { %v40_v27 = vld [vmem:[%s5647_s5] sm:$0xff]  ;;  %v4996_v35 = vpack.c.bf16 %v43_v31, %v42_v29  ;;  %v38_v36 = vld [vmem:[%s5646_s4 + $0x10] sm:$0xff]  ;;  %v39_v37 = vld [vmem:[%s5646_s4 + $0x18] sm:$0xff]  ;;  %s3771_s22 = sshll.u32 %s4873_s21, 4  ;;  %s3772_s22 = int_to_ptr.vmem [resolvable:$true] %s3771_s22 }
   0x7   :  { %v4982_v30 = vpack.c.bf16 %v41_v28, %v40_v27  ;;  %v36_v32 = vld [vmem:[%s5646_s4] sm:$0xff]  ;;  %v5007_v38 = vpack.c.bf16 %v39_v37, %v38_v36  ;;  %p4849_p1 = scmp.lt.s32.totalorder %s3772_s22, %s3772_s22 }
   0x8   :  { %4494 = vmatpush3.bf16.msra.mxu0 %v4940_v7  ;;  %v4993_v34 = vpack.c.bf16 %v37_v33, %v36_v32  ;;  %v3786_v45 = vld [vmem:[%s5642_s0 + $0x2] sm:$0x3]  ;;  %v5048_v46 = vld [vmem:[%s5648_s6] ss:$0 sm:$0xff]  ;;  %v3794_v27 = vld [vmem:[%s5642_s0 + $0x4] sm:$0x3] }
   0x9   :  { %4097 = vmatprep.subr.mxu0 %v4870_v6 }
   0xa   :  { %4539 = vmatpush3.bf16.msra.mxu1 %v4993_v34 }
   0xb   :  { %4095 = vmatmul.mubr.f32.vlgmr.msra.gmra.mrb[0].mxu0 %v4870_v6  ;;  %4540 = vmatprep.subr.bf16.mxu1 %v4868_v3 }
   0xc   :  { %4098 = vmatpush3.msk.msra.mxu0 %vm124_vm1, %v4948_v8  ;;  %4099 = vmatprep.mubr.msk.f32.mxu0 %vm4869_vm0, %v4870_v6 }
   0xd   :  { %4495 = vmatprep.subr.bf16.mxu0 %v4868_v3 }
   0xe   :  { %4542 = vmatpush3.bf16.msra.mxu1 %v5007_v38 }
   0xf   :  { %4100 = vmatmul.mubr.msk.f32.vlgmr.msra.gmra.mrb[2].mxu0 %vm120_vm2, %v45_v9  ;;  %4211 = vmatprep.subr.mxu1 %v4870_v6 }
  0x10   :  { %4110 = vmatprep.mubr.msk.f32.mxu0 %vm4869_vm0, %v4870_v6  ;;  %4497 = vmatpush3.bf16.msra.mxu0 %v4982_v30 }
  0x11   :  { %4498 = vmatprep.subr.bf16.mxu0 %v4868_v3 }
  0x14   :  { %4500 = vmatpush3.bf16.msra.mxu0 %v4996_v35 }
  0x15   :  { %4501 = vmatprep.subr.bf16.mxu0 %v4868_v3 }
  0x17   :  { %4111 = vmatmul.mubr.f32.vlgmr.msra.gmra.mrb[4].mxu0 %v4870_v6 }
  0x18   :  { %4503 = vmatpush3.bf16.msra.mxu0 %v4993_v34  ;;  %4121 = vmatprep.mubr.msk.f32.mxu0 %vm4869_vm0, %v4870_v6 }
  0x19   :  { %4504 = vmatprep.subr.bf16.mxu0 %v4868_v3 }
  0x1c   :  { %4506 = vmatpush3.bf16.msra.mxu0 %v5007_v38 }
  0x1d   :  { %4507 = vmatprep.subr.bf16.mxu0 %v4868_v3 }
  0xde   :  { %v116_v10 = vpop.f32.mrb[0].mxu0 }
  0xdf   :  { %v4096_v11 = vpop.f32.mrb[1].mxu0 }
  0xe2   :  { %v194_v13 = vpop.f32.mrb[2].mxu0 }
  0xe3   :  { %v195_v14 = vadd.f32 %v194_v13, %v116_v10  ;;  %v4101_v15 = vpop.f32.mrb[3].mxu0 }
  0xe5   :  { %v204_v16 = vadd.f32 %v4965_v12, %v195_v14 }
  0xe7   :  { %4709 = vtanh.f32 %v204_v16  ;;  %v3782_v18 = vmul.f32 -1.442695, %v204_v16 }
  0xe9   :  { %4711 = vpow2.f32 %v3782_v18 }
  0xea   :  { %v295_v42 = vpop.f32.mrb[4].mxu0 }
  0xeb   :  { %v4112_v43 = vpop.f32.mrb[5].mxu0 }
  0xf1   :  { %v4710_v17 = vpop.eup %4709 }
  0xf2   :  { %214 = vrot.lane.b32.xlu0 %v4710_v17, %s4871_s18 }
  0xf3   :  { %v4712_v19 = vpop.eup %4711 }
  0xf4   :  { %v208_v20 = vadd.f32 1.0, %v4712_v19 }
  0xf6   :  { %4713 = vrcp.f32 %v208_v20 }
 0x100   :  { %v4714_v21 = vpop.eup %4713 }
 0x101   :  { %v212_v24 = vmul.f32 0.0, %v4714_v21 }
 0x164   :  { %v215_v22 = vpop.permute.xlu0 %214 }
 0x165   :  { %v217_v23 = vmul.f32 %v4714_v21, %v215_v22 }
 0x167   :  { %219 = vrot.lane.b32.xlu0 %v217_v23, %s4872_s19 }
 0x1d9   :  { %v220_v25 = vpop.permute.xlu0 %219 }
 0x1da   :  { %v4970_v26 = vadd.f32 %v220_v25, %v212_v24 }
 0x1dc   :  { %4715 = vtanh.f32 %v4970_v26 }
 0x1e6   :  { %v4716_v39 = vpop.eup %4715 }
 0x1e7   :  { %225 = vrot.lane.b32.xlu1 %v4716_v39, %s4871_s18 }
 0x259   :  { %v226_v40 = vpop.permute.xlu1 %225 }
 0x25a   :  { %v228_v41 = vmul.f32 %v4714_v21, %v226_v40 }
 0x25c   :  { %300 = vrot.lane.b32.xlu1 %v228_v41, %s4872_s19 }
 0x2ce   :  { %v301_v44 = vpop.permute.xlu1 %300 }
 0x2cf   :  { %4122 = vmatmul.mubr.msk.f32.vlgmr.msra.gmra.mrb[6].mxu0 %vm46_vm3, %v301_v44 }
 0x2d0   :  { %4509 = vmatpush3.bf16.msra.mxu0 %v4929_v4  ;;  %4132 = vmatprep.mubr.msk.f32.mxu0 %vm4869_vm0, %v4870_v6 }
 0x2d1   :  { %4510 = vmatprep.subr.bf16.mxu0 %v4868_v3 }
 0x2d4   :  { %4512 = vmatpush3.bf16.msra.mxu0 %v4940_v7 }
 0x2d5   :  { %4135 = vmatprep.subr.mxu0 %v4870_v6 }
 0x2d7   :  { %4133 = vmatmul.mubr.msk.f32.vlgmr.msra.gmra.mrb[8].mxu0 %vm46_vm3, %v301_v44 }
 0x2d8   :  { %4136 = vmatpush3.msk.msra.mxu0 %vm124_vm1, %v4948_v8  ;;  %4137 = vmatprep.mubr.msk.f32.mxu0 %vm4869_vm0, %v4870_v6 }
 0x2d9   :  { %4513 = vmatprep.subr.bf16.mxu0 %v4868_v3 }
 0x2db   :  { %4138 = vmatmul.mubr.msk.f32.vlgmr.msra.gmra.mrb[10].mxu0 %vm120_vm2, %v3786_v45 }
 0x2dc   :  { %4515 = vmatpush3.bf16.msra.mxu0 %v4982_v30  ;;  %4148 = vmatprep.mubr.msk.f32.mxu0 %vm4869_vm0, %v4870_v6 }
 0x2dd   :  { %4516 = vmatprep.subr.bf16.mxu0 %v4868_v3 }
 0x2e0   :  { %4518 = vmatpush3.bf16.msra.mxu0 %v4996_v35 }
 0x2e1   :  { %4519 = vmatprep.subr.bf16.mxu0 %v4868_v3 }
 0x3a2   :  { %v370_v47 = vpop.f32.mrb[6].mxu0 }
 0x3a3   :  { %v371_v48 = vadd.f32 %v370_v47, %v295_v42  ;;  %v4123_v49 = vpop.f32.mrb[7].mxu0 }
 0x3a5   :  { %v380_v50 = vadd.f32 %v5048_v46, %v371_v48 }
 0x3a7   :  { %4717 = vtanh.f32 %v380_v50  ;;  %v3785_v59 = vmul.f32 -1.442695, %v380_v50 }
 0x3aa   :  { %v473_v51 = vpop.f32.mrb[8].mxu0 }
 0x3ab   :  { %v4134_v52 = vpop.f32.mrb[9].mxu0 }
 0x3ae   :  { %v546_v53 = vpop.f32.mrb[10].mxu0 }
 0x3af   :  { %v547_v54 = vadd.f32 %v546_v53, %v473_v51  ;;  %v4139_v55 = vpop.f32.mrb[11].mxu0 }
 0x3b1   :  { %v4718_v56 = vpop.eup %4717  ;;  %v550_v57 = vadd.f32 %v4965_v12, %v547_v54 }
 0x3b2   :  { %390 = vrot.lane.b32.xlu0 %v4718_v56, %s4871_s18 }
 0x3b3   :  { %4719 = vtanh.f32 %v550_v57  ;;  %v3790_v60 = vmul.f32 -1.442695, %v550_v57 }
 0x3b4   :  { %4721 = vpow2.f32 %v3785_v59 }
 0x3b5   :  { %4723 = vpow2.f32 %v3790_v60 }
 0x3bd   :  { %v4720_v58 = vpop.eup %4719 }
 0x3be   :  { %560 = vrot.lane.b32.xlu1 %v4720_v58, %s4871_s18  ;;  %v4722_v61 = vpop.eup %4721 }
 0x3bf   :  { %v384_v62 = vadd.f32 1.0, %v4722_v61  ;;  %v4724_v63 = vpop.eup %4723 }
 0x3c0   :  { %v554_v0 = vadd.f32 1.0, %v4724_v63 }
 0x3c1   :  { %4725 = vrcp.f32 %v384_v62 }
 0x3c2   :  { %4727 = vrcp.f32 %v554_v0 }
 0x3cb   :  { %v4726_v1 = vpop.eup %4725 }
 0x3cc   :  { %v4728_v9 = vpop.eup %4727  ;;  %v388_v13 = vmul.f32 0.0, %v4726_v1 }
 0x3cd   :  { %v558_v16 = vmul.f32 %v4728_v9, %v4970_v26 }
 0x424   :  { %v391_v2 = vpop.permute.xlu0 %390 }
 0x425   :  { %v393_v5 = vmul.f32 %v4726_v1, %v391_v2 }
 0x427   :  { %395 = vrot.lane.b32.xlu0 %v393_v5, %s4872_s19 }
 0x430   :  { %v561_v10 = vpop.permute.xlu1 %560 }
 0x431   :  { %v563_v11 = vmul.f32 %v4728_v9, %v561_v10 }
 0x433   :  { %565 = vrot.lane.b32.xlu1 %v563_v11, %s4872_s19 }
 0x499   :  { %v396_v14 = vpop.permute.xlu0 %395 }
 0x49a   :  { %v5056_v15 = vadd.f32 %v396_v14, %v388_v13 }
 0x49c   :  { %4729 = vtanh.f32 %v5056_v15 }
 0x4a5   :  { %v566_v17 = vpop.permute.xlu1 %565 }
 0x4a6   :  { %v4730_v18 = vpop.eup %4729  ;;  %v5060_v19 = vadd.f32 %v566_v17, %v558_v16 }
 0x4a7   :  { %401 = vrot.lane.b32.xlu0 %v4730_v18, %s4871_s18 }
 0x4a8   :  { %4731 = vtanh.f32 %v5060_v19 }
 0x4b2   :  { %v4732_v20 = vpop.eup %4731 }
 0x4b3   :  { %571 = vrot.lane.b32.xlu1 %v4732_v20, %s4871_s18 }
 0x519   :  { %v402_v21 = vpop.permute.xlu0 %401 }
 0x51a   :  { %v404_v22 = vmul.f32 %v4726_v1, %v402_v21 }
 0x51c   :  { %576 = vrot.lane.b32.xlu0 %v404_v22, %s4872_s19 }
 0x525   :  { %v572_v23 = vpop.permute.xlu1 %571 }
 0x526   :  { %v574_v24 = vmul.f32 %v4728_v9, %v572_v23 }
 0x528   :  { %651 = vrot.lane.b32.xlu1 %v574_v24, %s4872_s19 }
 0x58e   :  { %v577_v25 = vpop.permute.xlu0 %576 }
 0x58f   :  { %4149 = vmatmul.mubr.msk.f32.vlgmr.msra.gmra.mrb[12].mxu0 %vm46_vm3, %v577_v25 }
 0x590   :  { %4521 = vmatpush3.bf16.msra.mxu0 %v4993_v34  ;;  %4159 = vmatprep.mubr.msk.f32.mxu0 %vm4869_vm0, %v4870_v6 }
 0x591   :  { %4522 = vmatprep.subr.bf16.mxu0 %v4868_v3 }
 0x594   :  { %4524 = vmatpush3.bf16.msra.mxu0 %v5007_v38 }
 0x595   :  { %4525 = vmatprep.subr.bf16.mxu0 %v4868_v3 }
 0x59a   :  { %v652_v26 = vpop.permute.xlu1 %651 }
 0x59b   :  { %4160 = vmatmul.mubr.msk.f32.vlgmr.msra.gmra.mrb[14].mxu0 %vm46_vm3, %v652_v26 }
 0x59c   :  { %4527 = vmatpush3.bf16.msra.mxu0 %v4929_v4  ;;  %4170 = vmatprep.mubr.msk.f32.mxu0 %vm4869_vm0, %v4870_v6 }
 0x59d   :  { %4528 = vmatprep.subr.bf16.mxu0 %v4868_v3 }
 0x5a0   :  { %4530 = vmatpush3.bf16.msra.mxu0 %v4940_v7 }
 0x5a1   :  { %4173 = vmatprep.subr.mxu0 %v4870_v6 }
 0x5a3   :  { %4171 = vmatmul.mubr.msk.f32.vlgmr.msra.gmra.mrb[16].mxu0 %vm46_vm3, %v652_v26 }
 0x5a4   :  { %4174 = vmatpush3.msk.msra.mxu0 %vm124_vm1, %v4948_v8  ;;  %4175 = vmatprep.mubr.msk.f32.mxu0 %vm4869_vm0, %v4870_v6 }
 0x5a5   :  { %4531 = vmatprep.subr.bf16.mxu0 %v4868_v3 }
 0x5a7   :  { %4176 = vmatmul.mubr.msk.f32.vlgmr.msra.gmra.mrb[18].mxu0 %vm120_vm2, %v3794_v27 }
 0x5a8   :  { %4533 = vmatpush3.bf16.msra.mxu0 %v4982_v30  ;;  %4186 = vmatprep.mubr.msk.f32.mxu0 %vm4869_vm0, %v4870_v6 }
 0x5a9   :  { %4534 = vmatprep.subr.bf16.mxu0 %v4868_v3 }
 0x5ac   :  { %4536 = vmatpush3.bf16.msra.mxu0 %v4996_v35 }
 0x5ad   :  { %4543 = vmatprep.subr.bf16.mxu0 %v4868_v3 }
 0x662   :  { %v646_v28 = vpop.f32.mrb[12].mxu0 }
 0x663   :  { %v4150_v29 = vpop.f32.mrb[13].mxu0 }
 0x66e   :  { %v721_v31 = vpop.f32.mrb[14].mxu0 }
 0x66f   :  { %v722_v32 = vadd.f32 %v721_v31, %v646_v28  ;;  %v4161_v33 = vpop.f32.mrb[15].mxu0 }
 0x671   :  { %v725_v36 = vadd.f32 %v5048_v46, %v722_v32 }
 0x673   :  { %4733 = vtanh.f32 %v725_v36  ;;  %v3793_v47 = vmul.f32 -1.442695, %v725_v36 }
 0x676   :  { %v818_v37 = vpop.f32.mrb[16].mxu0 }
 0x677   :  { %v4172_v39 = vpop.f32.mrb[17].mxu0 }
 0x67a   :  { %v891_v40 = vpop.f32.mrb[18].mxu0 }
 0x67b   :  { %v892_v41 = vadd.f32 %v891_v40, %v818_v37  ;;  %v4177_v42 = vpop.f32.mrb[19].mxu0 }
 0x67d   :  { %v4734_v43 = vpop.eup %4733  ;;  %v895_v44 = vadd.f32 %v4965_v12, %v892_v41 }
 0x67e   :  { %735 = vrot.lane.b32.xlu0 %v4734_v43, %s4871_s18 }
 0x67f   :  { %4735 = vtanh.f32 %v895_v44  ;;  %v3798_v48 = vmul.f32 -1.442695, %v895_v44 }
 0x680   :  { %4737 = vpow2.f32 %v3793_v47 }
 0x681   :  { %4739 = vpow2.f32 %v3798_v48 }
 0x689   :  { %v4736_v45 = vpop.eup %4735 }
 0x68a   :  { %905 = vrot.lane.b32.xlu1 %v4736_v45, %s4871_s18  ;;  %v4738_v49 = vpop.eup %4737 }
 0x68b   :  { %v729_v50 = vadd.f32 1.0, %v4738_v49  ;;  %v4740_v51 = vpop.eup %4739 }
 0x68c   :  { %v899_v52 = vadd.f32 1.0, %v4740_v51 }
 0x68d   :  { %4741 = vrcp.f32 %v729_v50 }
 0x68e   :  { %4743 = vrcp.f32 %v899_v52 }
 0x697   :  { %v4742_v53 = vpop.eup %4741 }
 0x698   :  { %v4744_v56 = vpop.eup %4743  ;;  %v733_v59 = vmul.f32 %v4742_v53, %v5056_v15  ;;  %v3802_v15 = vld [vmem:[%s5642_s0 + $0x6] sm:$0x3] }
 0x699   :  { %v903_v62 = vmul.f32 %v4744_v56, %v5060_v19 }
 0x6f0   :  { %v736_v54 = vpop.permute.xlu0 %735 }
 0x6f1   :  { %v738_v55 = vmul.f32 %v4742_v53, %v736_v54 }
 0x6f3   :  { %740 = vrot.lane.b32.xlu0 %v738_v55, %s4872_s19 }
 0x6fc   :  { %v906_v57 = vpop.permute.xlu1 %905 }
 0x6fd   :  { %v908_v58 = vmul.f32 %v4744_v56, %v906_v57 }
 0x6ff   :  { %910 = vrot.lane.b32.xlu1 %v908_v58, %s4872_s19 }
 0x765   :  { %v741_v60 = vpop.permute.xlu0 %740 }
 0x766   :  { %v5104_v61 = vadd.f32 %v741_v60, %v733_v59 }
 0x768   :  { %4745 = vtanh.f32 %v5104_v61 }
 0x771   :  { %v911_v63 = vpop.permute.xlu1 %910 }
 0x772   :  { %v4746_v0 = vpop.eup %4745  ;;  %v5108_v1 = vadd.f32 %v911_v63, %v903_v62 }
 0x773   :  { %746 = vrot.lane.b32.xlu0 %v4746_v0, %s4871_s18 }
 0x774   :  { %4747 = vtanh.f32 %v5108_v1 }
 0x77e   :  { %v4748_v2 = vpop.eup %4747 }
 0x77f   :  { %916 = vrot.lane.b32.xlu1 %v4748_v2, %s4871_s18 }
 0x7e5   :  { %v747_v5 = vpop.permute.xlu0 %746 }
 0x7e6   :  { %v749_v9 = vmul.f32 %v4742_v53, %v747_v5 }
 0x7e8   :  { %921 = vrot.lane.b32.xlu0 %v749_v9, %s4872_s19 }
 0x7f1   :  { %v917_v10 = vpop.permute.xlu1 %916 }
 0x7f2   :  { %v919_v11 = vmul.f32 %v4744_v56, %v917_v10 }
 0x7f4   :  { %996 = vrot.lane.b32.xlu1 %v919_v11, %s4872_s19 }
 0x85a   :  { %v922_v13 = vpop.permute.xlu0 %921 }
 0x85b   :  { %4187 = vmatmul.mubr.msk.f32.vlgmr.msra.gmra.mrb[20].mxu0 %vm46_vm3, %v922_v13 }
 0x85c   :  { %4545 = vmatpush3.bf16.msra.mxu0 %v4929_v4  ;;  %4208 = vmatprep.mubr.msk.f32.mxu0 %vm4869_vm0, %v4870_v6 }
 0x85d   :  { %4546 = vmatprep.subr.bf16.mxu0 %v4868_v3 }
 0x860   :  { %4548 = vmatpush3.bf16.msra.mxu0 %v4940_v7 }
 0x861   :  { %4555 = vmatprep.subr.bf16.mxu0 %v4868_v3 }
 0x866   :  { %v997_v14 = vpop.permute.xlu1 %996 }
 0x867   :  { %4198 = vmatmul.mubr.msk.f32.vlgmr.msra.gmra.mrb[0].mxu1 %vm46_vm3, %v997_v14  ;;  %4209 = vmatmul.mubr.msk.f32.vlgmr.msra.gmra.mrb[22].mxu0 %vm46_vm3, %v997_v14 }
 0x868   :  { %4212 = vmatpush3.msk.msra.mxu1 %vm124_vm1, %v4948_v8  ;;  %4213 = vmatprep.mubr.msk.f32.mxu1 %vm4869_vm0, %v4870_v6 }
 0x869   :  { %4549 = vmatprep.subr.bf16.mxu1 %v4868_v3  ;;  %4557 = vmatpush3.bf16.msra.mxu0 %v4993_v34 }
 0x86a   :  { %4558 = vmatprep.subr.bf16.mxu0 %v4868_v3  ;;  %4235 = vmatprep.mubr.msk.f32.mxu0 %vm4869_vm0, %v4870_v6 }
 0x86b   :  { %4214 = vmatmul.mubr.msk.f32.vlgmr.msra.gmra.mrb[2].mxu1 %vm120_vm2, %v3802_v15 }
 0x86c   :  { %4551 = vmatpush3.bf16.msra.mxu1 %v4982_v30  ;;  %4224 = vmatprep.mubr.msk.f32.mxu1 %vm4869_vm0, %v4870_v6 }
 0x86d   :  { %4552 = vmatprep.subr.bf16.mxu1 %v4868_v3  ;;  %4560 = vmatpush3.bf16.msra.mxu0 %v5007_v38 }
 0x86e   :  { %4249 = vmatprep.subr.mxu0 %v4870_v6 }
 0x870   :  { %4554 = vmatpush3.bf16.msra.mxu1 %v4996_v35 }
 0x871   :  { %4561 = vmatprep.subr.bf16.mxu1 %v4868_v3 }
 0x92e   :  { %v991_v16 = vpop.f32.mrb[20].mxu0 }
 0x92f   :  { %v4188_v17 = vpop.f32.mrb[21].mxu0 }
 0x93a   :  { %v1066_v18 = vpop.f32.mrb[0].mxu1  ;;  %v1163_v19 = vpop.f32.mrb[22].mxu0 }
 0x93b   :  { %v1067_v20 = vadd.f32 %v1066_v18, %v991_v16  ;;  %v4199_v21 = vpop.f32.mrb[1].mxu1  ;;  %v4210_v22 = vpop.f32.mrb[23].mxu0 }
 0x93d   :  { %v1070_v23 = vadd.f32 %v5048_v46, %v1067_v20 }
 0x93e   :  { %v1236_v24 = vpop.f32.mrb[2].mxu1 }
 0x93f   :  { %4749 = vtanh.f32 %v1070_v23  ;;  %v1237_v25 = vadd.f32 %v1236_v24, %v1163_v19  ;;  %v4215_v26 = vpop.f32.mrb[3].mxu1  ;;  %v3801_v31 = vmul.f32 -1.442695, %v1070_v23 }
 0x941   :  { %v1240_v27 = vadd.f32 %v4965_v12, %v1237_v25 }
 0x943   :  { %4751 = vtanh.f32 %v1240_v27  ;;  %v3806_v32 = vmul.f32 -1.442695, %v1240_v27 }
 0x944   :  { %4753 = vpow2.f32 %v3801_v31 }
 0x945   :  { %4755 = vpow2.f32 %v3806_v32 }
 0x949   :  { %v4750_v28 = vpop.eup %4749 }
 0x94a   :  { %1080 = vrot.lane.b32.xlu0 %v4750_v28, %s4871_s18 }
 0x94d   :  { %v4752_v29 = vpop.eup %4751 }
 0x94e   :  { %1250 = vrot.lane.b32.xlu1 %v4752_v29, %s4871_s18  ;;  %v4754_v33 = vpop.eup %4753 }
 0x94f   :  { %v1074_v36 = vadd.f32 1.0, %v4754_v33  ;;  %v4756_v37 = vpop.eup %4755 }
 0x950   :  { %v1244_v39 = vadd.f32 1.0, %v4756_v37 }
 0x951   :  { %4757 = vrcp.f32 %v1074_v36 }
 0x952   :  { %4759 = vrcp.f32 %v1244_v39 }
 0x95b   :  { %v4758_v40 = vpop.eup %4757 }
 0x95c   :  { %v4760_v43 = vpop.eup %4759  ;;  %v1078_v47 = vmul.f32 %v4758_v40, %v5104_v61  ;;  %v3810_v61 = vld [vmem:[%s5642_s0 + $0x8] sm:$0x3] }
 0x95d   :  { %v1248_v50 = vmul.f32 %v4760_v43, %v5108_v1 }
 0x9bc   :  { %v1081_v41 = vpop.permute.xlu0 %1080 }
 0x9bd   :  { %v1083_v42 = vmul.f32 %v4758_v40, %v1081_v41 }
 0x9bf   :  { %1085 = vrot.lane.b32.xlu0 %v1083_v42, %s4872_s19 }
 0x9c0   :  { %v1251_v44 = vpop.permute.xlu1 %1250 }
 0x9c1   :  { %v1253_v45 = vmul.f32 %v4760_v43, %v1251_v44 }
 0x9c3   :  { %1255 = vrot.lane.b32.xlu1 %v1253_v45, %s4872_s19 }
 0xa31   :  { %v1086_v48 = vpop.permute.xlu0 %1085 }
 0xa32   :  { %v5152_v49 = vadd.f32 %v1086_v48, %v1078_v47 }
 0xa34   :  { %4761 = vtanh.f32 %v5152_v49 }
 0xa35   :  { %v1256_v51 = vpop.permute.xlu1 %1255 }
 0xa36   :  { %v5156_v52 = vadd.f32 %v1256_v51, %v1248_v50 }
 0xa38   :  { %4763 = vtanh.f32 %v5156_v52 }
 0xa3e   :  { %v4762_v53 = vpop.eup %4761 }
 0xa3f   :  { %1091 = vrot.lane.b32.xlu0 %v4762_v53, %s4871_s18 }
 0xa42   :  { %v4764_v54 = vpop.eup %4763 }
 0xa43   :  { %1261 = vrot.lane.b32.xlu1 %v4764_v54, %s4871_s18 }
 0xab1   :  { %v1092_v55 = vpop.permute.xlu0 %1091 }
 0xab2   :  { %v1094_v56 = vmul.f32 %v4758_v40, %v1092_v55 }
 0xab4   :  { %1266 = vrot.lane.b32.xlu0 %v1094_v56, %s4872_s19 }
 0xab5   :  { %v1262_v57 = vpop.permute.xlu1 %1261 }
 0xab6   :  { %v1264_v58 = vmul.f32 %v4760_v43, %v1262_v57 }
 0xab8   :  { %1341 = vrot.lane.b32.xlu1 %v1264_v58, %s4872_s19 }
 0xb26   :  { %v1267_v59 = vpop.permute.xlu0 %1266 }
 0xb27   :  { %4225 = vmatmul.mubr.msk.f32.vlgmr.msra.gmra.mrb[4].mxu1 %vm46_vm3, %v1267_v59 }
 0xb28   :  { %4563 = vmatpush3.bf16.msra.mxu1 %v4929_v4  ;;  %4246 = vmatprep.mubr.msk.f32.mxu1 %vm4869_vm0, %v4870_v6 }
 0xb29   :  { %4564 = vmatprep.subr.bf16.mxu1 %v4868_v3 }
 0xb2a   :  { %v1342_v60 = vpop.permute.xlu1 %1341 }
 0xb2b   :  { %4236 = vmatmul.mubr.msk.f32.vlgmr.msra.gmra.mrb[24].mxu0 %vm46_vm3, %v1342_v60 }
 0xb2c   :  { %4566 = vmatpush3.bf16.msra.mxu1 %v4940_v7  ;;  %4250 = vmatpush3.msk.msra.mxu0 %vm124_vm1, %v4948_v8 }
 0xb2d   :  { %4251 = vmatprep.mubr.msk.f32.mxu0 %vm4869_vm0, %v4870_v6  ;;  %4567 = vmatprep.subr.bf16.mxu0 %v4868_v3 }
 0xb2e   :  { %4573 = vmatprep.subr.bf16.mxu1 %v4868_v3 }
 0xb2f   :  { %4247 = vmatmul.mubr.msk.f32.vlgmr.msra.gmra.mrb[6].mxu1 %vm46_vm3, %v1342_v60  ;;  %4252 = vmatmul.mubr.msk.f32.vlgmr.msra.gmra.mrb[26].mxu0 %vm120_vm2, %v3810_v61 }
 0xb30   :  { %4569 = vmatpush3.bf16.msra.mxu0 %v4982_v30  ;;  %4575 = vmatpush3.bf16.msra.mxu1 %v4993_v34 }
 0xb31   :  { %4570 = vmatprep.subr.bf16.mxu0 %v4868_v3  ;;  %4262 = vmatprep.mubr.msk.f32.mxu0 %vm4869_vm0, %v4870_v6 }
 0xb32   :  { %4576 = vmatprep.subr.bf16.mxu1 %v4868_v3  ;;  %4273 = vmatprep.mubr.msk.f32.mxu1 %vm4869_vm0, %v4870_v6 }
 0xb34   :  { %4572 = vmatpush3.bf16.msra.mxu0 %v4996_v35  ;;  %4578 = vmatpush3.bf16.msra.mxu1 %v5007_v38 }
 0xb35   :  { %4579 = vmatprep.subr.bf16.mxu0 %v4868_v3  ;;  %4287 = vmatprep.subr.mxu1 %v4870_v6 }
 0xbfa   :  { %v1336_v62 = vpop.f32.mrb[4].mxu1 }
 0xbfb   :  { %v4226_v63 = vpop.f32.mrb[5].mxu1 }
 0xbfe   :  { %v1411_v0 = vpop.f32.mrb[24].mxu0 }
 0xbff   :  { %v1412_v1 = vadd.f32 %v1411_v0, %v1336_v62  ;;  %v4237_v2 = vpop.f32.mrb[25].mxu0 }
 0xc01   :  { %v1415_v5 = vadd.f32 %v5048_v46, %v1412_v1 }
 0xc02   :  { %v1508_v9 = vpop.f32.mrb[6].mxu1  ;;  %v1581_v10 = vpop.f32.mrb[26].mxu0 }
 0xc03   :  { %4765 = vtanh.f32 %v1415_v5  ;;  %v4248_v11 = vpop.f32.mrb[7].mxu1  ;;  %v1582_v13 = vadd.f32 %v1581_v10, %v1508_v9  ;;  %v4253_v14 = vpop.f32.mrb[27].mxu0  ;;  %v3809_v18 = vmul.f32 -1.442695, %v1415_v5 }
 0xc05   :  { %v1585_v15 = vadd.f32 %v4965_v12, %v1582_v13 }
 0xc07   :  { %4767 = vtanh.f32 %v1585_v15  ;;  %v3814_v19 = vmul.f32 -1.442695, %v1585_v15 }
 0xc08   :  { %4769 = vpow2.f32 %v3809_v18 }
 0xc09   :  { %4771 = vpow2.f32 %v3814_v19 }
 0xc0d   :  { %v4766_v16 = vpop.eup %4765 }
 0xc0e   :  { %1425 = vrot.lane.b32.xlu0 %v4766_v16, %s4871_s18 }
 0xc11   :  { %v4768_v17 = vpop.eup %4767 }
 0xc12   :  { %1595 = vrot.lane.b32.xlu1 %v4768_v17, %s4871_s18  ;;  %v4770_v20 = vpop.eup %4769 }
 0xc13   :  { %v1419_v21 = vadd.f32 1.0, %v4770_v20  ;;  %v4772_v22 = vpop.eup %4771 }
 0xc14   :  { %v1589_v23 = vadd.f32 1.0, %v4772_v22 }
 0xc15   :  { %4773 = vrcp.f32 %v1419_v21 }
 0xc16   :  { %4775 = vrcp.f32 %v1589_v23 }
 0xc1f   :  { %v4774_v24 = vpop.eup %4773 }
 0xc20   :  { %v4776_v27 = vpop.eup %4775  ;;  %v1423_v31 = vmul.f32 %v4774_v24, %v5152_v49  ;;  %v3818_v49 = vld [vmem:[%s5642_s0 + $0xa] sm:$0x3] }
 0xc21   :  { %v1593_v36 = vmul.f32 %v4776_v27, %v5156_v52 }
 0xc80   :  { %v1426_v25 = vpop.permute.xlu0 %1425 }
 0xc81   :  { %v1428_v26 = vmul.f32 %v4774_v24, %v1426_v25 }
 0xc83   :  { %1430 = vrot.lane.b32.xlu0 %v1428_v26, %s4872_s19 }
 0xc84   :  { %v1596_v28 = vpop.permute.xlu1 %1595 }
 0xc85   :  { %v1598_v29 = vmul.f32 %v4776_v27, %v1596_v28 }
 0xc87   :  { %1600 = vrot.lane.b32.xlu1 %v1598_v29, %s4872_s19 }
 0xcf5   :  { %v1431_v32 = vpop.permute.xlu0 %1430 }
 0xcf6   :  { %v5200_v33 = vadd.f32 %v1431_v32, %v1423_v31 }
 0xcf8   :  { %4777 = vtanh.f32 %v5200_v33 }
 0xcf9   :  { %v1601_v37 = vpop.permute.xlu1 %1600 }
 0xcfa   :  { %v5204_v39 = vadd.f32 %v1601_v37, %v1593_v36 }
 0xcfc   :  { %4779 = vtanh.f32 %v5204_v39 }
 0xd02   :  { %v4778_v40 = vpop.eup %4777 }
 0xd03   :  { %1436 = vrot.lane.b32.xlu0 %v4778_v40, %s4871_s18 }
 0xd06   :  { %v4780_v41 = vpop.eup %4779 }
 0xd07   :  { %1606 = vrot.lane.b32.xlu1 %v4780_v41, %s4871_s18 }
 0xd75   :  { %v1437_v42 = vpop.permute.xlu0 %1436 }
 0xd76   :  { %v1439_v43 = vmul.f32 %v4774_v24, %v1437_v42 }
 0xd78   :  { %1611 = vrot.lane.b32.xlu0 %v1439_v43, %s4872_s19 }
 0xd79   :  { %v1607_v44 = vpop.permute.xlu1 %1606 }
 0xd7a   :  { %v1609_v45 = vmul.f32 %v4776_v27, %v1607_v44 }
 0xd7c   :  { %1686 = vrot.lane.b32.xlu1 %v1609_v45, %s4872_s19 }
 0xdea   :  { %v1612_v47 = vpop.permute.xlu0 %1611 }
 0xdeb   :  { %4263 = vmatmul.mubr.msk.f32.vlgmr.msra.gmra.mrb[28].mxu0 %vm46_vm3, %v1612_v47 }
 0xdec   :  { %4581 = vmatpush3.bf16.msra.mxu0 %v4929_v4  ;;  %4284 = vmatprep.mubr.msk.f32.mxu0 %vm4869_vm0, %v4870_v6 }
 0xded   :  { %4582 = vmatprep.subr.bf16.mxu0 %v4868_v3 }
 0xdee   :  { %v1687_v48 = vpop.permute.xlu1 %1686 }
 0xdef   :  { %4274 = vmatmul.mubr.msk.f32.vlgmr.msra.gmra.mrb[8].mxu1 %vm46_vm3, %v1687_v48 }
 0xdf0   :  { %4584 = vmatpush3.bf16.msra.mxu0 %v4940_v7  ;;  %4288 = vmatpush3.msk.msra.mxu1 %vm124_vm1, %v4948_v8 }
 0xdf1   :  { %4289 = vmatprep.mubr.msk.f32.mxu1 %vm4869_vm0, %v4870_v6  ;;  %4585 = vmatprep.subr.bf16.mxu1 %v4868_v3 }
 0xdf2   :  { %4591 = vmatprep.subr.bf16.mxu0 %v4868_v3 }
 0xdf3   :  { %4285 = vmatmul.mubr.msk.f32.vlgmr.msra.gmra.mrb[30].mxu0 %vm46_vm3, %v1687_v48  ;;  %4290 = vmatmul.mubr.msk.f32.vlgmr.msra.gmra.mrb[10].mxu1 %vm120_vm2, %v3818_v49 }
 0xdf4   :  { %4587 = vmatpush3.bf16.msra.mxu1 %v4982_v30  ;;  %4593 = vmatpush3.bf16.msra.mxu0 %v4993_v34 }
 0xdf5   :  { %4588 = vmatprep.subr.bf16.mxu1 %v4868_v3  ;;  %4300 = vmatprep.mubr.msk.f32.mxu1 %vm4869_vm0, %v4870_v6 }
 0xdf6   :  { %4594 = vmatprep.subr.bf16.mxu0 %v4868_v3  ;;  %4311 = vmatprep.mubr.msk.f32.mxu0 %vm4869_vm0, %v4870_v6 }
 0xdf8   :  { %4590 = vmatpush3.bf16.msra.mxu1 %v4996_v35  ;;  %4596 = vmatpush3.bf16.msra.mxu0 %v5007_v38 }
 0xdf9   :  { %4597 = vmatprep.subr.bf16.mxu1 %v4868_v3  ;;  %4325 = vmatprep.subr.mxu0 %v4870_v6 }
 0xebe   :  { %v1681_v50 = vpop.f32.mrb[28].mxu0 }
 0xebf   :  { %v4264_v51 = vpop.f32.mrb[29].mxu0 }
 0xec2   :  { %v1756_v52 = vpop.f32.mrb[8].mxu1 }
 0xec3   :  { %v1757_v53 = vadd.f32 %v1756_v52, %v1681_v50  ;;  %v4275_v54 = vpop.f32.mrb[9].mxu1 }
 0xec5   :  { %v1760_v55 = vadd.f32 %v5048_v46, %v1757_v53 }
 0xec6   :  { %v1853_v56 = vpop.f32.mrb[30].mxu0  ;;  %v1926_v57 = vpop.f32.mrb[10].mxu1 }
 0xec7   :  { %4781 = vtanh.f32 %v1760_v55  ;;  %v4286_v58 = vpop.f32.mrb[31].mxu0  ;;  %v1927_v59 = vadd.f32 %v1926_v57, %v1853_v56  ;;  %v4291_v60 = vpop.f32.mrb[11].mxu1  ;;  %v3817_v0 = vmul.f32 -1.442695, %v1760_v55 }
 0xec9   :  { %v1930_v61 = vadd.f32 %v4965_v12, %v1927_v59 }
 0xecb   :  { %4783 = vtanh.f32 %v1930_v61  ;;  %v3822_v1 = vmul.f32 -1.442695, %v1930_v61 }
 0xecc   :  { %4785 = vpow2.f32 %v3817_v0 }
 0xecd   :  { %4787 = vpow2.f32 %v3822_v1 }
 0xed1   :  { %v4782_v62 = vpop.eup %4781 }
 0xed2   :  { %1770 = vrot.lane.b32.xlu0 %v4782_v62, %s4871_s18 }
 0xed5   :  { %v4784_v63 = vpop.eup %4783 }
 0xed6   :  { %1940 = vrot.lane.b32.xlu1 %v4784_v63, %s4871_s18  ;;  %v4786_v2 = vpop.eup %4785 }
 0xed7   :  { %v1764_v5 = vadd.f32 1.0, %v4786_v2  ;;  %v4788_v9 = vpop.eup %4787 }
 0xed8   :  { %v1934_v10 = vadd.f32 1.0, %v4788_v9 }
 0xed9   :  { %4789 = vrcp.f32 %v1764_v5 }
 0xeda   :  { %4791 = vrcp.f32 %v1934_v10 }
 0xee3   :  { %v4790_v11 = vpop.eup %4789 }
 0xee4   :  { %v4792_v15 = vpop.eup %4791  ;;  %v1768_v18 = vmul.f32 %v4790_v11, %v5200_v33  ;;  %v3826_v33 = vld [vmem:[%s5642_s0 + $0xc] sm:$0x3] }
 0xee5   :  { %v1938_v21 = vmul.f32 %v4792_v15, %v5204_v39 }
 0xf44   :  { %v1771_v13 = vpop.permute.xlu0 %1770 }
 0xf45   :  { %v1773_v14 = vmul.f32 %v4790_v11, %v1771_v13 }
 0xf47   :  { %1775 = vrot.lane.b32.xlu0 %v1773_v14, %s4872_s19 }
 0xf48   :  { %v1941_v16 = vpop.permute.xlu1 %1940 }
 0xf49   :  { %v1943_v17 = vmul.f32 %v4792_v15, %v1941_v16 }
 0xf4b   :  { %1945 = vrot.lane.b32.xlu1 %v1943_v17, %s4872_s19 }
 0xfb9   :  { %v1776_v19 = vpop.permute.xlu0 %1775 }
 0xfba   :  { %v5248_v20 = vadd.f32 %v1776_v19, %v1768_v18  ;;  %v4841_v18 = vld [vmem:[%s5643_s1] sm:$0xf] }
 0xfbc   :  { %4793 = vtanh.f32 %v5248_v20 }
 0xfbd   :  { %v1946_v22 = vpop.permute.xlu1 %1945 }
 0xfbe   :  { %v5252_v23 = vadd.f32 %v1946_v22, %v1938_v21 }
 0xfc0   :  { %4795 = vtanh.f32 %v5252_v23 }
 0xfc6   :  { %v4794_v24 = vpop.eup %4793 }
 0xfc7   :  { %1781 = vrot.lane.b32.xlu0 %v4794_v24, %s4871_s18 }
 0xfca   :  { %v4796_v25 = vpop.eup %4795 }
 0xfcb   :  { %1951 = vrot.lane.b32.xlu1 %v4796_v25, %s4871_s18 }
0x1039   :  { %v1782_v26 = vpop.permute.xlu0 %1781 }
0x103a   :  { %v1784_v27 = vmul.f32 %v4790_v11, %v1782_v26 }
0x103c   :  { %1956 = vrot.lane.b32.xlu0 %v1784_v27, %s4872_s19 }
0x103d   :  { %v1952_v28 = vpop.permute.xlu1 %1951 }
0x103e   :  { %v1954_v29 = vmul.f32 %v4792_v15, %v1952_v28 }
0x1040   :  { %2031 = vrot.lane.b32.xlu1 %v1954_v29, %s4872_s19 }
0x10ae   :  { %v1957_v31 = vpop.permute.xlu0 %1956 }
0x10af   :  { %4301 = vmatmul.mubr.msk.f32.vlgmr.msra.gmra.mrb[12].mxu1 %vm46_vm3, %v1957_v31 }
0x10b0   :  { %4599 = vmatpush3.bf16.msra.mxu1 %v4929_v4  ;;  %4322 = vmatprep.mubr.msk.f32.mxu1 %vm4869_vm0, %v4870_v6 }
0x10b1   :  { %4600 = vmatprep.subr.bf16.mxu1 %v4868_v3 }
0x10b2   :  { %v2032_v32 = vpop.permute.xlu1 %2031 }
0x10b3   :  { %4312 = vmatmul.mubr.msk.f32.vlgmr.msra.gmra.mrb[32].mxu0 %vm46_vm3, %v2032_v32 }
0x10b4   :  { %4602 = vmatpush3.bf16.msra.mxu1 %v4940_v7  ;;  %4326 = vmatpush3.msk.msra.mxu0 %vm124_vm1, %v4948_v8 }
0x10b5   :  { %4327 = vmatprep.mubr.msk.f32.mxu0 %vm4869_vm0, %v4870_v6  ;;  %4603 = vmatprep.subr.bf16.mxu0 %v4868_v3 }
0x10b6   :  { %4609 = vmatprep.subr.bf16.mxu1 %v4868_v3 }
0x10b7   :  { %4323 = vmatmul.mubr.msk.f32.vlgmr.msra.gmra.mrb[14].mxu1 %vm46_vm3, %v2032_v32  ;;  %4328 = vmatmul.mubr.msk.f32.vlgmr.msra.gmra.mrb[34].mxu0 %vm120_vm2, %v3826_v33 }
0x10b8   :  { %4605 = vmatpush3.bf16.msra.mxu0 %v4982_v30  ;;  %4611 = vmatpush3.bf16.msra.mxu1 %v4993_v34 }
0x10b9   :  { %4606 = vmatprep.subr.bf16.mxu0 %v4868_v3  ;;  %4338 = vmatprep.mubr.msk.f32.mxu0 %vm4869_vm0, %v4870_v6 }
0x10ba   :  { %4612 = vmatprep.subr.bf16.mxu1 %v4868_v3  ;;  %4349 = vmatprep.mubr.msk.f32.mxu1 %vm4869_vm0, %v4870_v6 }
0x10bc   :  { %4608 = vmatpush3.bf16.msra.mxu0 %v4996_v35  ;;  %4614 = vmatpush3.bf16.msra.mxu1 %v5007_v38 }
0x10bd   :  { %4615 = vmatprep.subr.bf16.mxu0 %v4868_v3  ;;  %4363 = vmatprep.subr.mxu1 %v4870_v6 }
0x1182   :  { %v2026_v8 = vpop.f32.mrb[12].mxu1 }
0x1183   :  { %v4302_v36 = vpop.f32.mrb[13].mxu1 }
0x1186   :  { %v2101_v37 = vpop.f32.mrb[32].mxu0 }
0x1187   :  { %v2102_v39 = vadd.f32 %v2101_v37, %v2026_v8  ;;  %v4313_v40 = vpop.f32.mrb[33].mxu0 }
0x1189   :  { %v2105_v41 = vadd.f32 %v5048_v46, %v2102_v39 }
0x118a   :  { %v2198_v42 = vpop.f32.mrb[14].mxu1  ;;  %v2271_v43 = vpop.f32.mrb[34].mxu0 }
0x118b   :  { %4797 = vtanh.f32 %v2105_v41  ;;  %v4324_v44 = vpop.f32.mrb[15].mxu1  ;;  %v2272_v45 = vadd.f32 %v2271_v43, %v2198_v42  ;;  %v4329_v47 = vpop.f32.mrb[35].mxu0  ;;  %v3825_v51 = vmul.f32 -1.442695, %v2105_v41 }
0x118d   :  { %v2275_v48 = vadd.f32 %v4965_v12, %v2272_v45 }
0x118f   :  { %4799 = vtanh.f32 %v2275_v48  ;;  %v3830_v52 = vmul.f32 -1.442695, %v2275_v48 }
0x1190   :  { %4801 = vpow2.f32 %v3825_v51 }
0x1191   :  { %4803 = vpow2.f32 %v3830_v52 }
0x1195   :  { %v4798_v49 = vpop.eup %4797 }
0x1196   :  { %2115 = vrot.lane.b32.xlu0 %v4798_v49, %s4871_s18 }
0x1199   :  { %v4800_v50 = vpop.eup %4799 }
0x119a   :  { %2285 = vrot.lane.b32.xlu1 %v4800_v50, %s4871_s18  ;;  %v4802_v53 = vpop.eup %4801 }
0x119b   :  { %v2109_v54 = vadd.f32 1.0, %v4802_v53  ;;  %v4804_v55 = vpop.eup %4803 }
0x119c   :  { %v2279_v56 = vadd.f32 1.0, %v4804_v55 }
0x119d   :  { %4805 = vrcp.f32 %v2109_v54 }
0x119e   :  { %4807 = vrcp.f32 %v2279_v56 }
0x11a7   :  { %v4806_v57 = vpop.eup %4805 }
0x11a8   :  { %v4808_v59 = vpop.eup %4807  ;;  %v2113_v62 = vmul.f32 %v4806_v57, %v5248_v20 }
0x11a9   :  { %v2283_v1 = vmul.f32 %v4808_v59, %v5252_v23 }
0x1208   :  { %v2116_v58 = vpop.permute.xlu0 %2115 }
0x1209   :  { %v2118_v12 = vmul.f32 %v4806_v57, %v2116_v58 }
0x120b   :  { %2120 = vrot.lane.b32.xlu0 %v2118_v12, %s4872_s19 }
0x120c   :  { %v2286_v60 = vpop.permute.xlu1 %2285 }
0x120d   :  { %v2288_v61 = vmul.f32 %v4808_v59, %v2286_v60 }
0x120f   :  { %2290 = vrot.lane.b32.xlu1 %v2288_v61, %s4872_s19 }
0x127d   :  { %v2121_v63 = vpop.permute.xlu0 %2120 }
0x127e   :  { %v5296_v0 = vadd.f32 %v2121_v63, %v2113_v62  ;;  %v4843_v62 = vld [vmem:[%s5648_s6] ss:$0 sm:$0xff] }
0x1280   :  { %4809 = vtanh.f32 %v5296_v0 }
0x1281   :  { %v2291_v2 = vpop.permute.xlu1 %2290 }
0x1282   :  { %v5300_v5 = vadd.f32 %v2291_v2, %v2283_v1 }
0x1284   :  { %4811 = vtanh.f32 %v5300_v5 }
0x128a   :  { %v4810_v9 = vpop.eup %4809 }
0x128b   :  { %2126 = vrot.lane.b32.xlu0 %v4810_v9, %s4871_s18 }
0x128e   :  { %v4812_v10 = vpop.eup %4811 }
0x128f   :  { %2296 = vrot.lane.b32.xlu1 %v4812_v10, %s4871_s18 }
0x12fd   :  { %v2127_v11 = vpop.permute.xlu0 %2126 }
0x12fe   :  { %v2129_v13 = vmul.f32 %v4806_v57, %v2127_v11 }
0x1300   :  { %2301 = vrot.lane.b32.xlu0 %v2129_v13, %s4872_s19 }
0x1301   :  { %v2297_v14 = vpop.permute.xlu1 %2296 }
0x1302   :  { %v2299_v15 = vmul.f32 %v4808_v59, %v2297_v14 }
0x1304   :  { %2376 = vrot.lane.b32.xlu1 %v2299_v15, %s4872_s19 }
0x1372   :  { %v2302_v16 = vpop.permute.xlu0 %2301 }
0x1373   :  { %4339 = vmatmul.mubr.msk.f32.vlgmr.msra.gmra.mrb[36].mxu0 %vm46_vm3, %v2302_v16 }
0x1374   :  { %4617 = vmatpush3.bf16.msra.mxu0 %v4929_v4  ;;  %4360 = vmatprep.mubr.msk.f32.mxu0 %vm4869_vm0, %v4870_v6  ;;  %v3834_v4 = vld [vmem:[%s5642_s0 + $0xe] sm:$0x3] }
0x1375   :  { %4618 = vmatprep.subr.bf16.mxu0 %v4868_v3 }
0x1376   :  { %v2377_v17 = vpop.permute.xlu1 %2376 }
0x1377   :  { %4350 = vmatmul.mubr.msk.f32.vlgmr.msra.gmra.mrb[16].mxu1 %vm46_vm3, %v2377_v17 }
0x1378   :  { %4620 = vmatpush3.bf16.msra.mxu0 %v4940_v7  ;;  %4364 = vmatpush3.msk.msra.mxu1 %vm124_vm1, %v4841_v18  ;;  %v3865_v18 = vld [vmem:[%s5649_s7 + $0x28] sm:$0xff] }
0x1379   :  { %4365 = vmatprep.mubr.msk.f32.mxu1 %vm4869_vm0, %v4870_v6  ;;  %4621 = vmatprep.subr.bf16.mxu1 %v4868_v3 }
0x137a   :  { %4627 = vmatprep.subr.bf16.mxu0 %v4868_v3 }
0x137b   :  { %4361 = vmatmul.mubr.msk.f32.vlgmr.msra.gmra.mrb[38].mxu0 %vm46_vm3, %v2377_v17  ;;  %4366 = vmatmul.mubr.msk.f32.vlgmr.msra.gmra.mrb[18].mxu1 %vm120_vm2, %v3834_v4  ;;  %v3864_v17 = vld [vmem:[%s5649_s7 + $0x20] sm:$0xff]  ;;  %v3866_v4 = vld [vmem:[%s5649_s7 + $0x30] sm:$0xff] }
0x137c   :  { %4623 = vmatpush3.bf16.msra.mxu1 %v4982_v30  ;;  %4629 = vmatpush3.bf16.msra.mxu0 %v4993_v34 }
0x137d   :  { %4624 = vmatprep.subr.bf16.mxu1 %v4868_v3  ;;  %4376 = vmatprep.mubr.msk.f32.mxu1 %vm4869_vm0, %v4870_v6 }
0x137e   :  { %4630 = vmatprep.subr.bf16.mxu0 %v4868_v3  ;;  %4387 = vmatprep.mubr.msk.f32.mxu0 %vm4869_vm0, %v4870_v6 }
0x1380   :  { %4626 = vmatpush3.bf16.msra.mxu1 %v4996_v35  ;;  %4632 = vmatpush3.bf16.msra.mxu0 %v5007_v38  ;;  %v4842_v35 = vld [vmem:[%s5645_s3] ss:$0 sm:$0xff] }
0x1381   :  { %4633 = vmatprep.subr.bf16.mxu1 %v4868_v3 }
0x1446   :  { %v2371_v7 = vpop.f32.mrb[36].mxu0 }
0x1447   :  { %v4340_v30 = vpop.f32.mrb[37].mxu0 }
0x1448   :  { %v3867_v30 = vld [vmem:[%s5649_s7 + $0x38] sm:$0xff] }
0x144a   :  { %v2446_v19 = vpop.f32.mrb[16].mxu1 }
0x144b   :  { %v2447_v34 = vadd.f32 %v2446_v19, %v2371_v7  ;;  %v4351_v20 = vpop.f32.mrb[17].mxu1  ;;  %v4634_v7 = vpack.c.bf16 %v3865_v18, %v3864_v17  ;;  %v4637_v19 = vpack.c.bf16 %v3867_v30, %v3866_v4 }
0x144d   :  { %v2450_v21 = vadd.f32 %v5048_v46, %v2447_v34 }
0x144e   :  { %v2543_v22 = vpop.f32.mrb[38].mxu0  ;;  %v2616_v23 = vpop.f32.mrb[18].mxu1 }
0x144f   :  { %4813 = vtanh.f32 %v2450_v21  ;;  %v4362_v24 = vpop.f32.mrb[39].mxu0  ;;  %v2617_v25 = vadd.f32 %v2616_v23, %v2543_v22  ;;  %v4367_v26 = vpop.f32.mrb[19].mxu1  ;;  %v3833_v29 = vmul.f32 -1.442695, %v2450_v21 }
0x1451   :  { %v2620_v38 = vadd.f32 %v4842_v35, %v2617_v25 }
0x1453   :  { %4815 = vtanh.f32 %v2620_v38  ;;  %v3838_v46 = vmul.f32 -1.442695, %v2620_v38 }
0x1454   :  { %4817 = vpow2.f32 %v3833_v29 }
0x1455   :  { %4819 = vpow2.f32 %v3838_v46 }
0x1459   :  { %v4814_v27 = vpop.eup %4813 }
0x145a   :  { %2460 = vrot.lane.b32.xlu0 %v4814_v27, %s4871_s18 }
0x145d   :  { %v4816_v28 = vpop.eup %4815 }
0x145e   :  { %2630 = vrot.lane.b32.xlu1 %v4816_v28, %s4871_s18  ;;  %v4818_v31 = vpop.eup %4817 }
0x145f   :  { %v2454_v32 = vadd.f32 1.0, %v4818_v31  ;;  %v4820_v33 = vpop.eup %4819 }
0x1460   :  { %v2624_v8 = vadd.f32 1.0, %v4820_v33 }
0x1461   :  { %4821 = vrcp.f32 %v2454_v32 }
0x1462   :  { %4823 = vrcp.f32 %v2624_v8 }
0x146b   :  { %v4822_v36 = vpop.eup %4821 }
0x146c   :  { %v4824_v40 = vpop.eup %4823  ;;  %v2458_v43 = vmul.f32 %v4822_v36, %v5296_v0 }
0x146d   :  { %v2628_v47 = vmul.f32 %v4824_v40, %v5300_v5 }
0x14cc   :  { %v2461_v37 = vpop.permute.xlu0 %2460 }
0x14cd   :  { %v2463_v39 = vmul.f32 %v4822_v36, %v2461_v37 }
0x14cf   :  { %2465 = vrot.lane.b32.xlu0 %v2463_v39, %s4872_s19 }
0x14d0   :  { %v2631_v41 = vpop.permute.xlu1 %2630 }
0x14d1   :  { %v2633_v42 = vmul.f32 %v4824_v40, %v2631_v41 }
0x14d3   :  { %2635 = vrot.lane.b32.xlu1 %v2633_v42, %s4872_s19 }
0x1541   :  { %v2466_v44 = vpop.permute.xlu0 %2465 }
0x1542   :  { %v2468_v45 = vadd.f32 %v2466_v44, %v2458_v43 }
0x1544   :  { %4825 = vtanh.f32 %v2468_v45 }
0x1545   :  { %v2636_v48 = vpop.permute.xlu1 %2635 }
0x1546   :  { %v2638_v49 = vadd.f32 %v2636_v48, %v2628_v47 }
0x1548   :  { %4827 = vtanh.f32 %v2638_v49 }
0x154e   :  { %v4826_v50 = vpop.eup %4825 }
0x154f   :  { %2471 = vrot.lane.b32.xlu0 %v4826_v50, %s4871_s18 }
0x1552   :  { %v4828_v51 = vpop.eup %4827 }
0x1553   :  { %2641 = vrot.lane.b32.xlu1 %v4828_v51, %s4871_s18 }
0x15c1   :  { %v2472_v52 = vpop.permute.xlu0 %2471 }
0x15c2   :  { %v2474_v53 = vmul.f32 %v4822_v36, %v2472_v52 }
0x15c4   :  { %2646 = vrot.lane.b32.xlu0 %v2474_v53, %s4872_s19 }
0x15c5   :  { %v2642_v54 = vpop.permute.xlu1 %2641 }
0x15c6   :  { %v2644_v55 = vmul.f32 %v4824_v40, %v2642_v54 }
0x15c8   :  { %2721 = vrot.lane.b32.xlu1 %v2644_v55, %s4872_s19 }
0x1636   :  { %v2647_v56 = vpop.permute.xlu0 %2646 }
0x1637   :  { %4377 = vmatmul.mubr.msk.f32.vlgmr.msra.gmra.mrb[20].mxu1 %vm46_vm3, %v2647_v56 }
0x1638   :  { %4398 = vmatprep.mubr.msk.f32.mxu1 %vm4869_vm0, %v4870_v6  ;;  %4635 = vmatpush3.bf16.msra.mxu1 %v4634_v7 }
0x1639   :  { %4636 = vmatprep.subr.bf16.mxu1 %v4868_v3 }
0x163a   :  { %v2722_v57 = vpop.permute.xlu1 %2721 }
0x163b   :  { %4388 = vmatmul.mubr.msk.f32.vlgmr.msra.gmra.mrb[40].mxu0 %vm46_vm3, %v2722_v57 }
0x163c   :  { %4638 = vmatpush3.bf16.msra.mxu1 %v4637_v19 }
0x163d   :  { %4639 = vmatprep.subr.bf16.mxu1 %v4868_v3 }
0x170a   :  { %v2716_v58 = vpop.f32.mrb[20].mxu1 }
0x170b   :  { %v4378_v12 = vpop.f32.mrb[21].mxu1 }
0x170e   :  { %v2791_v59 = vpop.f32.mrb[40].mxu0 }
0x170f   :  { %v2792_v60 = vadd.f32 %v2791_v59, %v2716_v58  ;;  %v4389_v61 = vpop.f32.mrb[41].mxu0 }
0x1711   :  { %v2795_v63 = vadd.f32 %v4843_v62, %v2792_v60 }
0x1713   :  { %4829 = vtanh.f32 %v2795_v63  ;;  %v3841_v1 = vmul.f32 -1.442695, %v2795_v63 }
0x1715   :  { %4831 = vpow2.f32 %v3841_v1 }
0x171d   :  { %v4830_v0 = vpop.eup %4829 }
0x171e   :  { %2805 = vrot.lane.b32.xlu0 %v4830_v0, %s4871_s18 }
0x171f   :  { %v4832_v2 = vpop.eup %4831 }
0x1720   :  { %v2799_v5 = vadd.f32 1.0, %v4832_v2 }
0x1722   :  { %4833 = vrcp.f32 %v2799_v5 }
0x172c   :  { %v4834_v9 = vpop.eup %4833 }
0x172d   :  { %v2803_v13 = vmul.f32 %v4834_v9, %v2468_v45 }
0x1790   :  { %v2806_v10 = vpop.permute.xlu0 %2805 }
0x1791   :  { %v2808_v11 = vmul.f32 %v4834_v9, %v2806_v10 }
0x1793   :  { %2810 = vrot.lane.b32.xlu1 %v2808_v11, %s4872_s19 }
0x1805   :  { %v2811_v14 = vpop.permute.xlu1 %2810 }
0x1806   :  { %v2813_v15 = vadd.f32 %v2811_v14, %v2803_v13 }
0x1808   :  { %4835 = vtanh.f32 %v2813_v15 }
0x1812   :  { %v4836_v16 = vpop.eup %4835 }
0x1813   :  { %2816 = vrot.lane.b32.xlu0 %v4836_v16, %s4871_s18 }
0x1885   :  { %v2817_v34 = vpop.permute.xlu0 %2816 }
0x1886   :  { %v5376_v20 = vmul.f32 %v4834_v9, %v2817_v34 }
0x1888   :  { %vm2820_vm4 = vcmp.ge.f32.partialorder %v5376_v20, -2.2  ;;  %vm2821_vm5 = vcmp.lt.f32.partialorder %v5376_v20, -1.8  ;;  %vm2825_vm6 = vcmp.ge.f32.partialorder %v5376_v20, -1.8 }
0x1889   :  { %vm2822_vm7 = vmand %vm2820_vm4, %vm2821_vm5  ;;  %vm2826_vm8 = vcmp.lt.f32.partialorder %v5376_v20, -1.4  ;;  %vm2830_vm9 = vcmp.ge.f32.partialorder %v5376_v20, -1.4  ;;  %vm2831_vm10 = vcmp.lt.f32.partialorder %v5376_v20, -1.0  ;;  %vm2835_vm11 = vcmp.ge.f32.partialorder %v5376_v20, -1.0 }
0x188a   :  { %v3842_v21 = vsel %vm2822_vm7, 1.0, %v4870_v6  ;;  %vm2827_vm12 = vmand %vm2825_vm6, %vm2826_vm8  ;;  %vm2836_vm13 = vcmp.lt.f32.partialorder %v5376_v20, -0.6  ;;  %v3853_v22 = vadd.f32 2.2, %v5376_v20  ;;  %v2884_v23 = vsub.f32 -1.0, %v5376_v20 }
0x188b   :  { %v3843_v24 = vsel %vm2827_vm12, 1.0, %v4870_v6  ;;  %vm2832_vm14 = vmand %vm2830_vm9, %vm2831_vm10  ;;  %v2877_v25 = vsub.f32 -1.4, %v5376_v20  ;;  %v3854_v26 = vadd.f32 1.8, %v5376_v20  ;;  %v5393_v35 = vadd.f32 1.0, %v5376_v20 }
0x188c   :  { %v3844_v38 = vsel %vm2832_vm14, 1.0, %v4870_v6  ;;  %vm2837_vm15 = vmand %vm2835_vm11, %vm2836_vm13  ;;  %v2876_v27 = vmul.f32 2.5, %v3853_v22  ;;  %v2885_v28 = vmul.f32 2.5, %v2884_v23  ;;  %v5397_v29 = vadd.f32 1.4, %v5376_v20 }
0x188d   :  { %v3845_v46 = vsel %vm2837_vm15, 1.0, %v4870_v6  ;;  %v2878_v31 = vmul.f32 2.5, %v2877_v25  ;;  %v2883_v32 = vmul.f32 2.5, %v3854_v26  ;;  %v2891_v33 = vsub.f32 -0.6, %v5376_v20 }
0x188e   :  { %v2879_v8 = vmul.f32 %v3842_v21, %v2876_v27  ;;  %v2887_v36 = vmul.f32 %v3844_v38, %v2885_v28  ;;  %v2890_v37 = vmul.f32 2.5, %v5397_v29  ;;  %v2945_v39 = vmul.f32 1.25, %v3853_v22 }
0x188f   :  { %v2880_v40 = vmul.f32 %v3843_v24, %v2878_v31  ;;  %v2886_v41 = vmul.f32 %v3843_v24, %v2883_v32  ;;  %v2892_v42 = vmul.f32 2.5, %v2891_v33  ;;  %v2946_v43 = vmul.f32 1.25, %v2884_v23 }
0x1890   :  { %v2893_v44 = vmul.f32 %v3844_v38, %v2890_v37  ;;  %v2950_v45 = vmul.f32 1.25, %v3854_v26  ;;  %v2951_v47 = vmul.f32 1.25, %v2891_v33  ;;  %v2990_v48 = vmul.f32 0.8333333, %v3853_v22 }
0x1891   :  { %v2881_v49 = vadd.f32 %v2880_v40, %v2879_v8  ;;  %v2888_v50 = vadd.f32 %v2887_v36, %v2886_v41  ;;  %v2894_v51 = vmul.f32 %v3845_v46, %v2892_v42  ;;  %v2991_v52 = vmul.f32 0.8333333, %v2891_v33 }
0x1892   :  { %vm2840_vm1 = vcmp.ge.f32.partialorder %v5376_v20, -0.6  ;;  %vm2841_vm2 = vcmp.lt.f32.partialorder %v5376_v20, -0.2  ;;  %v2897_v53 = vmul.f32 2.5, %v5393_v35  ;;  %v2955_v54 = vmul.f32 1.25, %v5397_v29 }
0x1893   :  { %v2895_v55 = vadd.f32 %v2894_v51, %v2893_v44  ;;  %v2947_v56 = vmul.f32 %v2945_v39, %v2881_v49  ;;  %v2948_v57 = vmul.f32 %v2946_v43, %v2888_v50  ;;  %v2952_v58 = vmul.f32 %v2950_v45, %v2888_v50  ;;  %vm2842_vm4 = vmand %vm2840_vm1, %vm2841_vm2 }
0x1894   :  { %v3846_v12 = vsel %vm2842_vm4, 1.0, %v4870_v6  ;;  %v2898_v59 = vsub.f32 -0.2, %v5376_v20  ;;  %v2900_v60 = vmul.f32 %v3845_v46, %v2897_v53  ;;  %v2995_v61 = vmul.f32 0.8333333, %v3854_v26 }
0x1895   :  { %v2949_v62 = vadd.f32 %v2948_v57, %v2947_v56  ;;  %v2953_v63 = vmul.f32 %v2951_v47, %v2895_v55  ;;  %v2957_v0 = vmul.f32 %v2955_v54, %v2895_v55  ;;  %vm2845_vm5 = vcmp.ge.f32.partialorder %v5376_v20, -0.2 }
0x1896   :  { %v2899_v1 = vmul.f32 2.5, %v2898_v59  ;;  %v2956_v2 = vmul.f32 1.25, %v2898_v59  ;;  %v2996_v5 = vmul.f32 0.8333333, %v2898_v59  ;;  %vm2846_vm6 = vcmp.lt.f32.partialorder %v5376_v20, 0.2 }
0x1897   :  { %v2954_v9 = vadd.f32 %v2953_v63, %v2952_v58  ;;  %v2992_v10 = vmul.f32 %v2990_v48, %v2949_v62  ;;  %vm2847_vm7 = vmand %vm2845_vm5, %vm2846_vm6  ;;  %vm2850_vm8 = vcmp.ge.f32.partialorder %v5376_v20, 0.2  ;;  %vm2851_vm9 = vcmp.lt.f32.partialorder %v5376_v20, 0.6 }
0x1898   :  { %v2901_v11 = vmul.f32 %v3846_v12, %v2899_v1  ;;  %v3847_v13 = vsel %vm2847_vm7, 1.0, %v4870_v6  ;;  %vm2852_vm10 = vmand %vm2850_vm8, %vm2851_vm9  ;;  %v5414_v14 = vadd.f32 0.6, %v5376_v20  ;;  %v5417_v15 = vsub.f32 0.2, %v5376_v20 }
0x1899   :  { %v2993_v16 = vmul.f32 %v2991_v52, %v2954_v9  ;;  %v2997_v17 = vmul.f32 %v2995_v61, %v2954_v9  ;;  %v3848_v18 = vsel %vm2852_vm10, 1.0, %v4870_v6  ;;  %v5421_v4 = vadd.f32 0.2, %v5376_v20 }
0x189a   :  { %v2902_v7 = vadd.f32 %v2901_v11, %v2900_v60  ;;  %v2904_v30 = vmul.f32 2.5, %v5414_v14  ;;  %v2906_v19 = vmul.f32 2.5, %v5417_v15  ;;  %v2912_v34 = vsub.f32 0.6, %v5376_v20 }
0x189b   :  { %v2994_v21 = vadd.f32 %v2993_v16, %v2992_v10  ;;  %v2911_v22 = vmul.f32 2.5, %v5421_v4  ;;  %v2960_v23 = vmul.f32 1.25, %v5393_v35  ;;  %v2961_v24 = vmul.f32 1.25, %v5417_v15 }
0x189c   :  { %v2958_v25 = vmul.f32 %v2956_v2, %v2902_v7  ;;  %v2907_v26 = vmul.f32 %v3846_v12, %v2904_v30  ;;  %v2908_v38 = vmul.f32 %v3847_v13, %v2906_v19  ;;  %v2913_v27 = vmul.f32 2.5, %v2912_v34 }
0x189d   :  { %3047 = vrot.lane.b32.xlu1 %v2994_v21, %s4872_s19  ;;  %v2914_v28 = vmul.f32 %v3847_v13, %v2911_v22  ;;  %v2962_v46 = vmul.f32 %v2960_v23, %v2902_v7  ;;  %v2965_v31 = vmul.f32 1.25, %v5414_v14  ;;  %v2966_v32 = vmul.f32 1.25, %v2912_v34 }
0x189e   :  { %v5431_v33 = vadd.f32 %v2958_v25, %v2957_v0  ;;  %v2909_v8 = vadd.f32 %v2908_v38, %v2907_v26  ;;  %v2915_v36 = vmul.f32 %v3848_v18, %v2913_v27  ;;  %v3005_v37 = vmul.f32 0.8333333, %v5393_v35 }
0x189f   :  { %v3006_v39 = vmul.f32 0.8333333, %v2912_v34  ;;  %v3863_v40 = vmul.f32 -1.442695, %v5376_v20  ;;  %vm2855_vm11 = vcmp.ge.f32.partialorder %v5376_v20, 0.6 }
0x18a0   :  { %v2998_v41 = vmul.f32 %v2996_v5, %v5431_v33  ;;  %v2916_v42 = vadd.f32 %v2915_v36, %v2914_v28  ;;  %v2963_v43 = vmul.f32 %v2961_v24, %v2909_v8  ;;  %v2967_v44 = vmul.f32 %v2965_v31, %v2909_v8 }
0x18a1   :  { %4837 = vpow2.f32 %v3863_v40  ;;  %vm2856_vm12 = vcmp.lt.f32.partialorder %v5376_v20, 1.0  ;;  %vm2860_vm13 = vcmp.ge.f32.partialorder %v5376_v20, 1.0  ;;  %vm2861_vm14 = vcmp.lt.f32.partialorder %v5376_v20, 1.4 }
0x18a2   :  { %v2999_v45 = vadd.f32 %v2998_v41, %v2997_v17  ;;  %v5440_v47 = vadd.f32 %v2963_v43, %v2962_v46  ;;  %v2968_v35 = vmul.f32 %v2966_v32, %v2916_v42  ;;  %vm2857_vm15 = vmand %vm2855_vm11, %vm2856_vm12  ;;  %v5443_v48 = vadd.f32 -0.2, %v5376_v20 }
0x18a3   :  { %v3849_v49 = vsel %vm2857_vm15, 1.0, %v4870_v6  ;;  %vm2862_vm1 = vmand %vm2860_vm13, %vm2861_vm14  ;;  %v5447_v50 = vsub.f32 1.0, %v5376_v20  ;;  %v5450_v51 = vadd.f32 -0.6, %v5376_v20  ;;  %v2926_v52 = vsub.f32 1.4, %v5376_v20 }
0x18a4   :  { %3202 = vrot.lane.b32.xlu1 %v2999_v45, %s4872_s19  ;;  %v5454_v53 = vadd.f32 %v2968_v35, %v2967_v44  ;;  %v3007_v54 = vmul.f32 %v3005_v37, %v5440_v47  ;;  %v3850_v55 = vsel %vm2862_vm1, 1.0, %v4870_v6  ;;  %v2918_v56 = vmul.f32 2.5, %v5443_v48 }
0x18a5   :  { %v2920_v57 = vmul.f32 2.5, %v5447_v50  ;;  %v2925_v58 = vmul.f32 2.5, %v5450_v51  ;;  %v2927_v12 = vmul.f32 2.5, %v2926_v52  ;;  %v2970_v0 = vmul.f32 1.25, %v5421_v4 }
0x18a6   :  { %v3008_v59 = vmul.f32 %v3006_v39, %v5454_v53  ;;  %v2921_v60 = vmul.f32 %v3848_v18, %v2918_v56  ;;  %v2971_v2 = vmul.f32 1.25, %v5447_v50  ;;  %v2975_v5 = vmul.f32 1.25, %v5443_v48 }
0x18a7   :  { %v2922_v61 = vmul.f32 %v3849_v49, %v2920_v57  ;;  %v2928_v62 = vmul.f32 %v3849_v49, %v2925_v58  ;;  %v2929_v63 = vmul.f32 %v3850_v55, %v2927_v12  ;;  %v2972_v11 = vmul.f32 %v2970_v0, %v2916_v42 }
0x18a8   :  { %v3009_v1 = vadd.f32 %v3008_v59, %v3007_v54  ;;  %v2976_v13 = vmul.f32 1.25, %v2926_v52  ;;  %vm2865_vm2 = vcmp.ge.f32.partialorder %v5376_v20, 1.4  ;;  %vm2866_vm4 = vcmp.lt.f32.partialorder %v5376_v20, 1.8 }
0x18a9   :  { %v2923_v9 = vadd.f32 %v2922_v61, %v2921_v60  ;;  %v2930_v10 = vadd.f32 %v2929_v63, %v2928_v62  ;;  %vm2870_vm5 = vcmp.ge.f32.partialorder %v5376_v20, 1.8  ;;  %v3015_v30 = vmul.f32 0.8333333, %v5421_v4  ;;  %vm2867_vm6 = vmand %vm2865_vm2, %vm2866_vm4 }
0x18aa   :  { %3364 = vrot.lane.b32.xlu1 %v3009_v1, %s4872_s19  ;;  %v3016_v34 = vmul.f32 0.8333333, %v2926_v52  ;;  %vm2871_vm7 = vcmp.lt.f32.partialorder %v5376_v20, 2.2  ;;  %v3861_v23 = vadd.f32 -1.0, %v5376_v20  ;;  %v3851_v25 = vsel %vm2867_vm6, 1.0, %v4870_v6 }
0x18ab   :  { %v4838_v16 = vpop.eup %4837  ;;  %v2973_v17 = vmul.f32 %v2971_v2, %v2923_v9  ;;  %v2977_v18 = vmul.f32 %v2975_v5, %v2923_v9  ;;  %v2978_v7 = vmul.f32 %v2976_v13, %v2930_v10  ;;  %vm2872_vm8 = vmand %vm2870_vm5, %vm2871_vm7  ;;  %v2933_v24 = vsub.f32 1.8, %v5376_v20 }
0x18ac   :  { %v3033_v19 = vadd.f32 1.0, %v4838_v16  ;;  %v3862_v26 = vadd.f32 -1.4, %v5376_v20  ;;  %v2932_v4 = vmul.f32 2.5, %v3861_v23  ;;  %v3852_v46 = vsel %vm2872_vm8, 1.0, %v4870_v6 }
0x18ad   :  { %v2974_v21 = vadd.f32 %v2973_v17, %v2972_v11  ;;  %v2979_v22 = vadd.f32 %v2978_v7, %v2977_v18  ;;  %v2934_v28 = vmul.f32 2.5, %v2933_v24  ;;  %v2940_v32 = vsub.f32 2.2, %v5376_v20  ;;  %v3039_v17 = vld [vmem:[%s5649_s7 + $0x10] sm:$0xff]  ;;  %v3040_v18 = vld [vmem:[%s5649_s7 + $0x18] sm:$0xff] }
0x18ae   :  { %4839 = vrcp.f32 %v3033_v19  ;;  %v2939_v31 = vmul.f32 2.5, %v3862_v26  ;;  %v2935_v36 = vmul.f32 %v3850_v55, %v2932_v4  ;;  %v2980_v39 = vmul.f32 1.25, %v5450_v51  ;;  %v3870_v19 = vld [vmem:[%s5649_s7 + $0x40] sm:$0xff]  ;;  %v3877_v4 = vld [vmem:[%s5649_s7 + $0x70] sm:$0xff] }
0x18af   :  { %v3017_v38 = vmul.f32 %v3015_v30, %v2974_v21  ;;  %v3018_v27 = vmul.f32 %v3016_v34, %v2979_v22  ;;  %v2936_v37 = vmul.f32 %v3851_v25, %v2934_v28  ;;  %v2941_v40 = vmul.f32 2.5, %v2940_v32  ;;  %v3871_v34 = vld [vmem:[%s5649_s7 + $0x48] sm:$0xff]  ;;  %v3875_v26 = vld [vmem:[%s5649_s7 + $0x60] sm:$0xff]  ;;  %v3878_v28 = vld [vmem:[%s5649_s7 + $0x78] sm:$0xff] }
0x18b0   :  { %v2942_v41 = vmul.f32 %v3851_v25, %v2939_v31  ;;  %v2981_v43 = vmul.f32 1.25, %v2933_v24  ;;  %v2982_v44 = vmul.f32 %v2980_v39, %v2930_v10  ;;  %v2985_v35 = vmul.f32 1.25, %v3861_v23  ;;  %v3873_v23 = vld [vmem:[%s5649_s7 + $0x58] sm:$0xff] }
0x18b1   :  { %v3019_v8 = vadd.f32 %v3018_v27, %v3017_v38  ;;  %v2937_v42 = vadd.f32 %v2936_v37, %v2935_v36  ;;  %v2943_v45 = vmul.f32 %v3852_v46, %v2941_v40  ;;  %v2986_v54 = vmul.f32 1.25, %v2940_v32  ;;  %v3876_v38 = vld [vmem:[%s5649_s7 + $0x68] sm:$0xff]  ;;  %v3882_v37 = vld [vmem:[%s5649_s7 + $0x90] sm:$0xff]  ;;  %v3883_v39 = vld [vmem:[%s5649_s7 + $0x98] sm:$0xff] }
0x18b2   :  { %v3000_v57 = vmul.f32 0.8333333, %v5397_v29  ;;  %v3001_v55 = vmul.f32 0.8333333, %v5417_v15  ;;  %v3025_v60 = vmul.f32 0.8333333, %v5450_v51  ;;  %v4643_v30 = vpack.c.bf16 %v3040_v18, %v3039_v17 }
0x18b3   :  { %3526 = vrot.lane.b32.xlu1 %v3019_v8, %s4872_s19  ;;  %v2983_v49 = vmul.f32 %v2981_v43, %v2937_v42  ;;  %v2944_v52 = vadd.f32 %v2943_v45, %v2942_v41  ;;  %v2987_v56 = vmul.f32 %v2985_v35, %v2937_v42  ;;  %v3026_v1 = vmul.f32 0.8333333, %v2940_v32  ;;  %v3880_v32 = vld [vmem:[%s5649_s7 + $0x80] sm:$0xff]  ;;  %v3881_v8 = vld [vmem:[%s5649_s7 + $0x88] sm:$0xff]  ;;  %v3887_v45 = vld [vmem:[%s5649_s7 + $0xb0] sm:$0xff] }
0x18b4   :  { %v3002_v62 = vmul.f32 %v3000_v57, %v5431_v33  ;;  %v3003_v63 = vmul.f32 %v3001_v55, %v5440_v47  ;;  %v3010_v29 = vmul.f32 0.8333333, %v5414_v14  ;;  %v3011_v15 = vmul.f32 0.8333333, %v5447_v50  ;;  %v3037_v50 = vld [vmem:[%s5649_s7] sm:$0xff]  ;;  %v3886_v43 = vld [vmem:[%s5649_s7 + $0xa8] sm:$0xff] }
0x18b5   :  { %v2984_v58 = vadd.f32 %v2983_v49, %v2982_v44  ;;  %v2988_v59 = vmul.f32 %v2986_v54, %v2944_v52  ;;  %v3021_v33 = vmul.f32 0.8333333, %v2933_v24  ;;  %v4652_v27 = vpack.c.bf16 %v3876_v38, %v3875_v26  ;;  %v3885_v42 = vld [vmem:[%s5649_s7 + $0xa0] sm:$0xff]  ;;  %v3888_v35 = vld [vmem:[%s5649_s7 + $0xb8] sm:$0xff]  ;;  %v3892_v55 = vld [vmem:[%s5649_s7 + $0xd0] sm:$0xff] }
0x18b6   :  { %v3004_v9 = vadd.f32 %v3003_v63, %v3002_v62  ;;  %v3012_v10 = vmul.f32 %v3010_v29, %v5454_v53  ;;  %v3013_v51 = vmul.f32 %v3011_v15, %v2974_v21  ;;  %v3038_v53 = vld [vmem:[%s5649_s7 + $0x8] sm:$0xff]  ;;  %v4646_v21 = vpack.c.bf16 %v3871_v34, %v3870_v19  ;;  %v3890_v54 = vld [vmem:[%s5649_s7 + $0xc0] sm:$0xff]  ;;  %v3897_v63 = vld [vmem:[%s5649_s7 + $0xf0] sm:$0xff] }
0x18b7   :  { %v2989_v0 = vadd.f32 %v2988_v59, %v2987_v56  ;;  %v3027_v2 = vmul.f32 %v3025_v60, %v2984_v58  ;;  %v3023_v16 = vmul.f32 %v3021_v33, %v2984_v58  ;;  %v4655_v31 = vpack.c.bf16 %v3878_v28, %v3877_v4  ;;  %v3891_v56 = vld [vmem:[%s5649_s7 + $0xc8] sm:$0xff]  ;;  %v3893_v58 = vld [vmem:[%s5649_s7 + $0xd8] sm:$0xff]  ;;  %v3895_v60 = vld [vmem:[%s5649_s7 + $0xe0] sm:$0xff] }
0x18b8   :  { %v4840_v12 = vpop.eup %4839  ;;  %v3014_v47 = vadd.f32 %v3013_v51, %v3012_v10  ;;  %v4658_v36 = vpack.c.bf16 %v3881_v8, %v3880_v32  ;;  %v4661_v41 = vpack.c.bf16 %v3883_v39, %v3882_v37  ;;  %v4664_v44 = vpack.c.bf16 %v3886_v43, %v3885_v42  ;;  %v3900_v29 = vld [vmem:[%s5649_s7 + $0x100] sm:$0xff]  ;;  %v3901_v15 = vld [vmem:[%s5649_s7 + $0x108] sm:$0xff]  ;;  %v3903_v10 = vld [vmem:[%s5649_s7 + $0x118] sm:$0xff] }
0x18b9   :  { %v3036_v61 = vmul.f32 %v4840_v12, %v5376_v20  ;;  %v3028_v5 = vmul.f32 %v3026_v1, %v2989_v0  ;;  %v3020_v20 = vmul.f32 0.8333333, %v5443_v48  ;;  %v4640_v48 = vpack.c.bf16 %v3038_v53, %v3037_v50  ;;  %v3898_v0 = vld [vmem:[%s5649_s7 + $0xf8] sm:$0xff] }
0x18ba   :  { %v4667_v52 = vpack.c.bf16 %v3888_v35, %v3887_v45  ;;  %v4670_v57 = vpack.c.bf16 %v3891_v56, %v3890_v54  ;;  %v4673_v59 = vpack.c.bf16 %v3893_v58, %v3892_v55  ;;  %vm3763_vm9 = vcmask 123904  }
0x18bb   :  { %3122 = vrot.lane.b32.xlu0 %v3036_v61, %s4872_s19  ;;  %v3029_v11 = vadd.f32 %v3028_v5, %v3027_v2  ;;  %v3022_v13 = vmul.f32 %v3020_v20, %v2979_v22  ;;  %v3872_v22 = vld [vmem:[%s5649_s7 + $0x50] sm:$0xff]  ;;  %v3896_v61 = vld [vmem:[%s5649_s7 + $0xe8] sm:$0xff]  ;;  %v4679_v2 = vpack.c.bf16 %v3898_v0, %v3897_v63  ;;  %v4682_v5 = vpack.c.bf16 %v3901_v15, %v3900_v29 }
0x18bc   :  { %v4649_v25 = vpack.c.bf16 %v3873_v23, %v3872_v22  ;;  %v4676_v62 = vpack.c.bf16 %v3896_v61, %v3895_v60 }
0x18bd   :  { %3688 = vrot.lane.b32.xlu1 %v3029_v11, %s4872_s19  ;;  %v3024_v14 = vadd.f32 %v3023_v16, %v3022_v13 }
0x18bf   :  { %3283 = vrot.lane.b32.xlu0 %v3004_v9, %s4872_s19  ;;  %v3902_v9 = vld [vmem:[%s5649_s7 + $0x110] sm:$0xff]  ;;  %s4844_s7 = scalar_lea.vmem %s3772_s22, 32 }
0x18c0   :  { %v4685_v11 = vpack.c.bf16 %v3903_v10, %v3902_v9  ;;  %p4845_p0 = scmp.ne.s32.totalorder %s3772_s22, %s4844_s7  ;;  %p4850_p2 = scmp.lt.s32.totalorder %s4844_s7, %s4844_s7 }
0x18c2   :  { %p4851_p3 = por %p4850_p2, %p4849_p1 }
0x18c3   :  { %3445 = vrot.lane.b32.xlu0 %v3014_v47, %s4872_s19 }
0x18c4   :  { %p4852_p4 = pnand %p4851_p3, %p4845_p0 }
0x18c7   :  { %3607 = vrot.lane.b32.xlu0 %v3024_v14, %s4872_s19 }
0x190f   :  { %v3048_v7 = vpop.permute.xlu1 %3047 }
0x1910   :  { %4399 = vmatmul.mubr.msk.f32.vlgmr.msra.gmra.mrb[22].mxu1 %vm46_vm3, %v3048_v7 }
0x1911   :  { %4641 = vmatpush3.bf16.msra.mxu1 %v4640_v48  ;;  %4409 = vmatprep.mubr.msk.f32.mxu1 %vm4869_vm0, %v4870_v6 }
0x1912   :  { %4642 = vmatprep.subr.bf16.mxu1 %v4868_v3 }
0x1915   :  { %4644 = vmatpush3.bf16.msra.mxu1 %v4643_v30 }
0x1916   :  { %4645 = vmatprep.subr.bf16.mxu1 %v4868_v3  ;;  %v3203_v46 = vpop.permute.xlu1 %3202 }
0x191c   :  { %v3365_v49 = vpop.permute.xlu1 %3364 }
0x1925   :  { %v3527_v1 = vpop.permute.xlu1 %3526 }
0x192d   :  { %v3123_v24 = vpop.permute.xlu0 %3122 }
0x192e   :  { %4410 = vmatmul.mubr.msk.f32.vlgmr.msra.gmra.mrb[22].mxu1 %vm46_vm3, %v3123_v24 }
0x192f   :  { %4647 = vmatpush3.bf16.msra.mxu1 %v4646_v21  ;;  %4420 = vmatprep.mubr.msk.f32.mxu1 %vm4869_vm0, %v4870_v6  ;;  %v3689_v20 = vpop.permute.xlu1 %3688 }
0x1930   :  { %4648 = vmatprep.subr.bf16.mxu1 %v4868_v3 }
0x1931   :  { %v3284_v40 = vpop.permute.xlu0 %3283 }
0x1933   :  { %4650 = vmatpush3.bf16.msra.mxu1 %v4649_v25 }
0x1934   :  { %4651 = vmatprep.subr.bf16.mxu1 %v4868_v3 }
0x1935   :  { %v3446_v12 = vpop.permute.xlu0 %3445 }
0x1936   :  { %4421 = vmatmul.mubr.msk.f32.vlgmr.msra.gmra.mrb[22].mxu1 %vm46_vm3, %v3203_v46 }
0x1937   :  { %4653 = vmatpush3.bf16.msra.mxu1 %v4652_v27  ;;  %4431 = vmatprep.mubr.msk.f32.mxu1 %vm4869_vm0, %v4870_v6 }
0x1938   :  { %4654 = vmatprep.subr.bf16.mxu1 %v4868_v3 }
0x1939   :  { %v3608_v51 = vpop.permute.xlu0 %3607 }
0x193b   :  { %4656 = vmatpush3.bf16.msra.mxu1 %v4655_v31 }
0x193c   :  { %4657 = vmatprep.subr.bf16.mxu1 %v4868_v3 }
0x193e   :  { %4432 = vmatmul.mubr.msk.f32.vlgmr.msra.gmra.mrb[22].mxu1 %vm46_vm3, %v3284_v40 }
0x193f   :  { %4659 = vmatpush3.bf16.msra.mxu1 %v4658_v36  ;;  %4442 = vmatprep.mubr.msk.f32.mxu1 %vm4869_vm0, %v4870_v6 }
0x1940   :  { %4660 = vmatprep.subr.bf16.mxu1 %v4868_v3 }
0x1943   :  { %4662 = vmatpush3.bf16.msra.mxu1 %v4661_v41 }
0x1944   :  { %4663 = vmatprep.subr.bf16.mxu1 %v4868_v3 }
0x1946   :  { %4443 = vmatmul.mubr.msk.f32.vlgmr.msra.gmra.mrb[22].mxu1 %vm46_vm3, %v3365_v49 }
0x1947   :  { %4665 = vmatpush3.bf16.msra.mxu1 %v4664_v44  ;;  %4453 = vmatprep.mubr.msk.f32.mxu1 %vm4869_vm0, %v4870_v6 }
0x1948   :  { %4666 = vmatprep.subr.bf16.mxu1 %v4868_v3 }
0x194b   :  { %4668 = vmatpush3.bf16.msra.mxu1 %v4667_v52 }
0x194c   :  { %4669 = vmatprep.subr.bf16.mxu1 %v4868_v3 }
0x194e   :  { %4454 = vmatmul.mubr.msk.f32.vlgmr.msra.gmra.mrb[22].mxu1 %vm46_vm3, %v3446_v12 }
0x194f   :  { %4671 = vmatpush3.bf16.msra.mxu1 %v4670_v57  ;;  %4464 = vmatprep.mubr.msk.f32.mxu1 %vm4869_vm0, %v4870_v6 }
0x1950   :  { %4672 = vmatprep.subr.bf16.mxu1 %v4868_v3 }
0x1953   :  { %4674 = vmatpush3.bf16.msra.mxu1 %v4673_v59 }
0x1954   :  { %4675 = vmatprep.subr.bf16.mxu1 %v4868_v3 }
0x1956   :  { %4465 = vmatmul.mubr.msk.f32.vlgmr.msra.gmra.mrb[22].mxu1 %vm46_vm3, %v3527_v1 }
0x1957   :  { %4677 = vmatpush3.bf16.msra.mxu1 %v4676_v62  ;;  %4475 = vmatprep.mubr.msk.f32.mxu1 %vm4869_vm0, %v4870_v6 }
0x1958   :  { %4678 = vmatprep.subr.bf16.mxu1 %v4868_v3 }
0x195b   :  { %4680 = vmatpush3.bf16.msra.mxu1 %v4679_v2 }
0x195c   :  { %4681 = vmatprep.subr.bf16.mxu1 %v4868_v3 }
0x195e   :  { %4476 = vmatmul.mubr.msk.f32.vlgmr.msra.gmra.mrb[22].mxu1 %vm46_vm3, %v3608_v51 }
0x195f   :  { %4683 = vmatpush3.bf16.msra.mxu1 %v4682_v5  ;;  %4486 = vmatprep.mubr.msk.f32.mxu1 %vm4869_vm0, %v4870_v6 }
0x1960   :  { %4684 = vmatprep.subr.bf16.mxu1 %v4868_v3 }
0x1963   :  { %4686 = vmatpush3.bf16.msra.mxu1 %v4685_v11 }
0x1966   :  { %4487 = vmatmul.mubr.msk.f32.vlgmr.msra.gmra.mrb[22].mxu1 %vm46_vm3, %v3689_v20 }
0x1a39   :  { %v3758_v33 = vpop.f32.mrb[22].mxu1 }
0x1a3a   :  { %3764 = vst.msk [vmem:[#allocation2] sm:$0x3] %vm3763_vm9, %v3758_v33  ;;  %v4488_v47 = vpop.f32.mrb[23].mxu1 }
0x1a3b   :  { %4855 = shalt.err (!%p4852_p4)
}
0x1a3c   :  { %s4856_s24 = scalar_lea.hbm %s5650_s8, 32 }
0x1a3d   :  { %p4857_p5 = scmp.ne.s32.totalorder %s5650_s8, %s4856_s24  ;;  %p4860_p6 = scmp.lt.u32.totalorder %s4856_s24, %s5650_s8 }
0x1a3f   :  { %p4862_p7 = pnand %p4860_p6, %p4857_p5 }
0x1a41   :  { %4865 = shalt.err (!%p4862_p7)
}
0x1a42   :  { %3774 = dma.vmem_to_hbm [thread:$0]  %s3772_s22, 32, %s5650_s8, [#allocation3]  }
0x1a43   :  { %4866 = dma.done.wait [#allocation3], 32  }
0x1a44   :  { %4867 = vsyncadd [#allocation3], 4294967264 }
0x1a45   :  { %3778 = vsyncpa [#allocation3], 1 }

</bundles_post_ra>
